<compile_context>
chip_gen: v7x
topology: tpu7x:2x2x1
jax: 0.10.0
libtpu: 0.0.40
codegen_flags: <defaults>
</compile_context>

<pallas_src>
import functools

import jax
import jax.numpy as jnp
from jax.experimental import pallas as pl
from jax.experimental.pallas import tpu as pltpu


def decoder_kernel(
    enc_ref, att1_ref, emb_proj_ref, dl_ref, h0_ref, c0_ref,
    w_h_ref, b_dec_ref, b_fbeta_ref, w_full_ref, b_full_ref, w_awe_ref,
    h_seq_ref, alpha_ref, *, p_real,
):
    """Recurrent part: attention + gated awe + LSTMCell. Vocab fc is deferred."""
    T = emb_proj_ref.shape[0]
    H = h0_ref.shape[1]
    A = b_dec_ref.shape[1]
    E = b_fbeta_ref.shape[1]
    Pp = alpha_ref.shape[2]
    f32 = jnp.float32

    # Pixel-validity mask: padded pixels get exactly-zero attention weight so the
    # lane-dense (Bp, Pp) alpha store is correct (loop-invariant, computed once).
    pix_valid = jax.lax.broadcasted_iota(jnp.int32, (1, Pp), 1) < p_real

    def step(t, carry):
        h, c = carry  # f32 (Bp, H)

        # ---- single fused h-driven matmul: [decoder_att | f_beta | lstm-hh] ----
        hp = jnp.dot(h.astype(jnp.bfloat16), w_h_ref[...],
                     preferred_element_type=f32)                        # (Bp, A+E+4H)
        att2 = hp[:, :A] + b_dec_ref[...]                               # (Bp, A)
        gate = jax.nn.sigmoid(hp[:, A:A + E] + b_fbeta_ref[...])        # (Bp, E)
        gates_h = hp[:, A + E:]                                         # (Bp, 4H)

        # ---- attention (encoder projection att1 hoisted to the wrapper) ----
        # VPU math kept in f32; enc/att1 only stored in bf16 (cast on load).
        e_act = jnp.maximum(att1_ref[...].astype(f32) + att2[:, None, :], 0.0)
        att = jnp.sum(e_act * w_full_ref[...], axis=-1) + b_full_ref[...]   # (Bp, Pp)
        att = jnp.where(pix_valid, att, -1e30)
        att_max = jnp.max(att, axis=-1, keepdims=True)
        exp_att = jnp.where(pix_valid, jnp.exp(att - att_max), 0.0)
        den = jnp.sum(exp_att, axis=-1, keepdims=True)
        alpha = exp_att * pl.reciprocal(den)                            # exact softmax
        awe = jnp.sum(alpha[:, :, None] * enc_ref[...].astype(f32), axis=1)  # (Bp, E)
        awe = gate * awe

        # ---- LSTMCell: embedding projection (incl. both biases) precomputed ----
        gates = (emb_proj_ref[t] + gates_h
                 + jnp.dot(awe.astype(jnp.bfloat16), w_awe_ref[...],
                           preferred_element_type=f32))                 # (Bp, 4H)
        i_g = jax.nn.sigmoid(gates[:, 0 * H:1 * H])
        f_g = jax.nn.sigmoid(gates[:, 1 * H:2 * H])
        g_g = jnp.tanh(gates[:, 2 * H:3 * H])
        o_g = jax.nn.sigmoid(gates[:, 3 * H:4 * H])
        c_new = f_g * c + i_g * g_g
        h_new = o_g * jnp.tanh(c_new)

        # rows with decode_length <= t freeze their state (PyTorch shrinks the batch)
        active = dl_ref[...] > t                                        # (Bp, 1) bool
        h_next = jnp.where(active, h_new, h)
        c_next = jnp.where(active, c_new, c)

        h_seq_ref[t] = h_new.astype(h_seq_ref.dtype)   # fc applied after the loop
        alpha_ref[t] = alpha * active.astype(f32)      # inactive rows -> 0
        return (h_next, c_next)

    jax.lax.fori_loop(0, T, step, (h0_ref[...], c0_ref[...]))


def fc_kernel(h_ref, w_ref, b_ref, mask_ref, out_ref):
    """Deferred vocab projection: one high-M, lane-dense matmul tile per grid step."""
    acc = jnp.dot(h_ref[...], w_ref[...], preferred_element_type=jnp.float32)
    out_ref[...] = (acc + b_ref[...]) * mask_ref[...]


def init_params(key, attention_dim, embed_dim, decoder_dim, vocab_size, encoder_dim):
    """Deterministic synthetic parameters; linear weights stored as (in, out).

    NOTE: real PyTorch LSTMCell weights are (4H, in) with i,f,g,o chunk order; loading
    them here requires a transpose while preserving the chunk order.
    """
    A, Ed, H, V, E = attention_dim, embed_dim, decoder_dim, vocab_size, encoder_dim
    ks = jax.random.split(key, 20)

    def lin(k, fan_in, shape):
        b = 1.0 / (fan_in ** 0.5)
        return jax.random.uniform(k, shape, jnp.float32, -b, b)

    p = {}
    p["emb_w"] = jax.random.uniform(ks[0], (V, Ed), jnp.float32, -0.1, 0.1)
    p["enc_att_w"] = lin(ks[1], E, (E, A)); p["enc_att_b"] = lin(ks[2], E, (1, A))
    p["dec_att_w"] = lin(ks[3], H, (H, A)); p["dec_att_b"] = lin(ks[4], H, (1, A))
    p["full_att_w"] = lin(ks[5], A, (1, A)); p["full_att_b"] = lin(ks[6], A, (1, 1))
    p["init_h_w"] = lin(ks[7], E, (E, H)); p["init_h_b"] = lin(ks[8], E, (H,))
    p["init_c_w"] = lin(ks[9], E, (E, H)); p["init_c_b"] = lin(ks[10], E, (H,))
    p["f_beta_w"] = lin(ks[11], H, (H, E)); p["f_beta_b"] = lin(ks[12], H, (1, E))
    p["w_ih_e"] = lin(ks[13], H, (Ed, 4 * H))   # weight_ih split: embedding part
    p["w_ih_a"] = lin(ks[14], H, (E, 4 * H))    # weight_ih split: attention-encoding part
    p["b_ih"] = lin(ks[15], H, (1, 4 * H))
    p["w_hh"] = lin(ks[16], H, (H, 4 * H))
    p["b_hh"] = lin(ks[17], H, (1, 4 * H))
    p["fc_w"] = jax.random.uniform(ks[18], (H, V), jnp.float32, -0.1, 0.1)
    p["fc_b"] = jnp.zeros((1, V), jnp.float32)
    return p


def decoder_forward(params, encoder_out, encoded_captions, caption_lengths):
    f32, bf16 = jnp.float32, jnp.bfloat16
    B = encoder_out.shape[0]
    E = encoder_out.shape[-1]
    enc = encoder_out.reshape(B, -1, E).astype(f32)        # (B, P, E)
    P = enc.shape[1]

    # sort by caption length, descending (tie-breaking may differ from torch.sort)
    cap_len = caption_lengths[:, 0]
    sort_ind = jnp.argsort(-cap_len)
    cap_len_sorted = cap_len[sort_ind]
    enc = enc[sort_ind]
    caps_sorted = encoded_captions[sort_ind]

    # embedding lookup (glue)
    emb = params["emb_w"][caps_sorted]                     # (B, L, Ed)
    Ed = emb.shape[-1]

    # init_hidden_state (glue)
    mean_enc = jnp.mean(enc, axis=1)
    h0 = (mean_enc @ params["init_h_w"] + params["init_h_b"]).astype(f32)
    c0 = (mean_enc @ params["init_c_w"] + params["init_c_b"]).astype(f32)

    decode_lengths = (cap_len_sorted - 1).astype(jnp.int32)
    # TODO(synk): host sync + retrace per distinct max length; acceptable for this script.
    T = int(jax.device_get(jnp.max(decode_lengths)))

    H = params["dec_att_w"].shape[0]
    A = params["dec_att_w"].shape[1]
    V = params["fc_w"].shape[1]

    # ---- padding: batch -> sublane mult (8), pixels & vocab -> lane mult (128) ----
    Bp = max(8, -(-B // 8) * 8)
    pad = Bp - B
    Pp = max(128, -(-P // 128) * 128)
    Vp = max(128, -(-V // 128) * 128)

    def pad_batch(x):
        return jnp.pad(x, ((0, pad),) + ((0, 0),) * (x.ndim - 1))

    enc_p = pad_batch(enc)                                          # (Bp, P, E)
    emb_p = pad_batch(emb[:, :T, :].astype(f32))                    # (Bp, T, Ed)
    h0_p = pad_batch(h0)
    c0_p = pad_batch(c0)
    dl_p = jnp.pad(decode_lengths, (0, pad))                        # (Bp,)  padded rows: 0
    dl2 = dl_p[:, None].astype(jnp.int32)                           # (Bp, 1)

    # pixel-padded encoder features + hoisted loop-invariant encoder projection
    enc_pp = jnp.pad(enc_p, ((0, 0), (0, Pp - P), (0, 0)))          # (Bp, Pp, E)
    att1 = enc_pp @ params["enc_att_w"] + params["enc_att_b"]       # (Bp, Pp, A)
    enc_bf = enc_pp.astype(bf16)
    att1_bf = att1.astype(bf16)

    # hoisted, loop-invariant embedding projection (one big matmul, biases folded)
    emb_tm = jnp.transpose(emb_p, (1, 0, 2)).reshape(T * Bp, Ed)    # (T*Bp, Ed)
    emb_proj = (emb_tm @ params["w_ih_e"] + params["b_ih"] + params["b_hh"]
                ).reshape(T, Bp, 4 * H).astype(f32)

    # fused h-driven weight: [decoder_att | f_beta | lstm w_hh]  (bf16 MXU operand)
    w_h = jnp.concatenate(
        [params["dec_att_w"], params["f_beta_w"], params["w_hh"]], axis=1).astype(bf16)
    w_awe = params["w_ih_a"].astype(bf16)                           # (E, 4H)

    # ---- recurrent kernel: emits h_seq (bf16) + alphas ----
    rec_inputs = (enc_bf, att1_bf, emb_proj, dl2, h0_p, c0_p, w_h,
                  params["dec_att_b"], params["f_beta_b"],
                  params["full_att_w"], params["full_att_b"], w_awe)
    rec_bytes = int(sum(int(x.size) * x.dtype.itemsize for x in rec_inputs)
                    + T * Bp * H * 2 + T * Bp * Pp * 4)
    rec_flops = int(T * Bp * (2 * H * (A + E + 4 * H) + 8 * E * H
                              + Pp * (3 * A + 2 * E + 8)))
    rec_trans = int(T * Bp * (Pp + 5 * H + E))

    h_seq, alpha_tm = pl.pallas_call(
        functools.partial(decoder_kernel, p_real=P),
        out_shape=(jax.ShapeDtypeStruct((T, Bp, H), bf16),
                   jax.ShapeDtypeStruct((T, Bp, Pp), f32)),
        compiler_params=pltpu.CompilerParams(vmem_limit_bytes=64 * 1024 * 1024),
        cost_estimate=pl.CostEstimate(flops=rec_flops, transcendentals=rec_trans,
                                      bytes_accessed=rec_bytes),
    )(*rec_inputs)

    # ---- deferred vocab projection: one lane-dense (T*Bp, H) @ (H, Vp) matmul ----
    M = T * Bp
    tv = 512 if Vp % 512 == 0 else 128
    w_fc = jnp.pad(params["fc_w"], ((0, 0), (0, Vp - V))).astype(bf16)
    b_fc = jnp.pad(params["fc_b"], ((0, 0), (0, Vp - V))).astype(f32)
    row_mask = (jnp.arange(T)[:, None] < dl_p[None, :]).astype(f32).reshape(M, 1)
    h_flat = h_seq.reshape(M, H)

    fc_bytes = int(M * H * 2 + H * Vp * 2 + Vp * 4 + M * 4 + M * Vp * 4)
    preds_flat = pl.pallas_call(
        fc_kernel,
        out_shape=jax.ShapeDtypeStruct((M, Vp), f32),
        grid=(Vp // tv,),
        in_specs=[pl.BlockSpec((M, H), lambda j: (0, 0)),
                  pl.BlockSpec((H, tv), lambda j: (0, j)),
                  pl.BlockSpec((1, tv), lambda j: (0, j)),
                  pl.BlockSpec((M, 1), lambda j: (0, 0))],
        out_specs=pl.BlockSpec((M, tv), lambda j: (0, j)),
        compiler_params=pltpu.CompilerParams(
            dimension_semantics=("parallel",),
            vmem_limit_bytes=64 * 1024 * 1024),
        cost_estimate=pl.CostEstimate(flops=2 * M * H * Vp, transcendentals=0,
                                      bytes_accessed=fc_bytes),
    )(h_flat, w_fc, b_fc, row_mask)

    predictions = jnp.transpose(preds_flat.reshape(T, Bp, Vp), (1, 0, 2))[:B, :, :V]
    alphas = jnp.transpose(alpha_tm, (1, 0, 2))[:B, :, :P]
    return predictions, caps_sorted, decode_lengths, alphas, sort_ind


if __name__ == "__main__":
    key = jax.random.PRNGKey(0)
    k_param, k_enc, k_cap = jax.random.split(key, 3)

    # small, module-consistent shapes
    batch = 4
    enc_image_size = 4
    encoder_dim = 32
    attention_dim = 32
    embed_dim = 16
    decoder_dim = 32
    vocab_size = 64
    max_caption_length = 8

    params = init_params(k_param, attention_dim, embed_dim, decoder_dim,
                         vocab_size, encoder_dim)

    encoder_out = jax.random.normal(
        k_enc, (batch, enc_image_size, enc_image_size, encoder_dim), jnp.float32)
    encoded_captions = jax.random.randint(
        k_cap, (batch, max_caption_length), 0, vocab_size, jnp.int32)
    caption_lengths = jnp.array([[6], [8], [4], [7]], dtype=jnp.int32)

    predictions, caps_sorted, decode_lengths, alphas, sort_ind = decoder_forward(
        params, encoder_out, encoded_captions, caption_lengths)

    jax.block_until_ready(predictions)
    jax.block_until_ready(alphas)
    assert predictions.shape == (batch, 7, vocab_size)
    assert alphas.shape == (batch, 7, enc_image_size * enc_image_size)
    print("KERNEL_OK")
</pallas_src>

<mosaic_0001>
module attributes {stable_mosaic.version = 11 : i64} {
  func.func @decoder_kernel(%arg0: memref<8x128x32xbf16, #tpu.memory_space<vmem>>, %arg1: memref<8x128x32xbf16, #tpu.memory_space<vmem>>, %arg2: memref<7x8x128xf32, #tpu.memory_space<vmem>>, %arg3: memref<8x1xi32, #tpu.memory_space<vmem>>, %arg4: memref<8x32xf32, #tpu.memory_space<vmem>>, %arg5: memref<8x32xf32, #tpu.memory_space<vmem>>, %arg6: memref<32x192xbf16, #tpu.memory_space<vmem>>, %arg7: memref<1x32xf32, #tpu.memory_space<vmem>>, %arg8: memref<1x32xf32, #tpu.memory_space<vmem>>, %arg9: memref<1x32xf32, #tpu.memory_space<vmem>>, %arg10: memref<1x1xf32, #tpu.memory_space<vmem>>, %arg11: memref<32x128xbf16, #tpu.memory_space<vmem>>, %arg12: memref<7x8x32xbf16, #tpu.memory_space<vmem>>, %arg13: memref<7x8x128xf32, #tpu.memory_space<vmem>>) attributes {dimension_semantics = [], scalar_prefetch = 0 : i64, scratch_operands = 0 : i64, tpu.core_type = #tpu.core_type<tc>} {
    %0 = tpu.iota {dimensions = array<i32: 1>} : vector<1x128xi32>
    %c16_i32 = arith.constant 16 : i32
    %1 = vector.broadcast %c16_i32 : i32 to vector<1x128xi32>
    %2 = arith.cmpi slt, %0, %1 : vector<1x128xi32>
    %c0 = arith.constant 0 : index
    %c0_0 = arith.constant 0 : index
    %3 = vector.load %arg4[%c0, %c0_0] : memref<8x32xf32, #tpu.memory_space<vmem>>, vector<8x32xf32>
    %c0_1 = arith.constant 0 : index
    %c0_2 = arith.constant 0 : index
    %4 = vector.load %arg5[%c0_1, %c0_2] : memref<8x32xf32, #tpu.memory_space<vmem>>, vector<8x32xf32>
    %c0_i32 = arith.constant 0 : i32
    %c7_i32 = arith.constant 7 : i32
    %5 = arith.addi %c0_i32, %c7_i32 : i32
    %c1_i32 = arith.constant 1 : i32
    %6:2 = scf.for %arg14 = %c0_i32 to %5 step %c1_i32 iter_args(%arg15 = %3, %arg16 = %4) -> (vector<8x32xf32>, vector<8x32xf32>)  : i32 {
      %7 = arith.truncf %arg15 : vector<8x32xf32> to vector<8x32xbf16>
      %c0_4 = arith.constant 0 : index
      %c0_5 = arith.constant 0 : index
      %8 = vector.load %arg6[%c0_4, %c0_5] : memref<32x192xbf16, #tpu.memory_space<vmem>>, vector<32x192xbf16>
      %cst = arith.constant dense<0.000000e+00> : vector<8x192xf32>
      %9 = tpu.matmul %7, %8, %cst {dimension_numbers = #tpu.dot_dimension_numbers<[1], [0], [0], [1], [0, 0, 1, 1], [], []>} : vector<8x32xbf16>, vector<32x192xbf16>, vector<8x192xf32> -> vector<8x192xf32>
      %10 = vector.extract_strided_slice %9 {offsets = [0, 0], sizes = [8, 32], strides = [1, 1]} : vector<8x192xf32> to vector<8x32xf32>
      %c0_6 = arith.constant 0 : index
      %c0_7 = arith.constant 0 : index
      %11 = vector.load %arg7[%c0_6, %c0_7] : memref<1x32xf32, #tpu.memory_space<vmem>>, vector<1x32xf32>
      %12 = vector.broadcast %11 : vector<1x32xf32> to vector<8x32xf32>
      %13 = arith.addf %10, %12 : vector<8x32xf32>
      %14 = vector.extract_strided_slice %9 {offsets = [0, 32], sizes = [8, 32], strides = [1, 1]} : vector<8x192xf32> to vector<8x32xf32>
      %c0_8 = arith.constant 0 : index
      %c0_9 = arith.constant 0 : index
      %15 = vector.load %arg8[%c0_8, %c0_9] : memref<1x32xf32, #tpu.memory_space<vmem>>, vector<1x32xf32>
      %16 = vector.broadcast %15 : vector<1x32xf32> to vector<8x32xf32>
      %17 = arith.addf %14, %16 : vector<8x32xf32>
      %18 = arith.negf %17 : vector<8x32xf32>
      %19 = math.exp %18 : vector<8x32xf32>
      %cst_10 = arith.constant 1.000000e+00 : f32
      %20 = vector.broadcast %cst_10 : f32 to vector<8x32xf32>
      %21 = arith.addf %20, %19 : vector<8x32xf32>
      %22 = arith.divf %20, %21 : vector<8x32xf32>
      %23 = vector.extract_strided_slice %9 {offsets = [0, 64], sizes = [8, 128], strides = [1, 1]} : vector<8x192xf32> to vector<8x128xf32>
      %c0_11 = arith.constant 0 : index
      %c0_12 = arith.constant 0 : index
      %c0_13 = arith.constant 0 : index
      %24 = vector.load %arg1[%c0_11, %c0_12, %c0_13] : memref<8x128x32xbf16, #tpu.memory_space<vmem>>, vector<8x128x32xbf16>
      %25 = arith.extf %24 : vector<8x128x32xbf16> to vector<8x128x32xf32>
      %26 = vector.shape_cast %13 : vector<8x32xf32> to vector<8x1x32xf32>
      %27 = vector.broadcast %26 : vector<8x1x32xf32> to vector<8x128x32xf32>
      %28 = arith.addf %25, %27 : vector<8x128x32xf32>
      %cst_14 = arith.constant 0.000000e+00 : f32
      %29 = vector.broadcast %cst_14 : f32 to vector<8x128x32xf32>
      %30 = arith.maximumf %28, %29 : vector<8x128x32xf32>
      %c0_15 = arith.constant 0 : index
      %c0_16 = arith.constant 0 : index
      %31 = vector.load %arg9[%c0_15, %c0_16] : memref<1x32xf32, #tpu.memory_space<vmem>>, vector<1x32xf32>
      %32 = vector.shape_cast %31 : vector<1x32xf32> to vector<1x1x32xf32>
      %33 = vector.broadcast %32 : vector<1x1x32xf32> to vector<8x128x32xf32>
      %34 = arith.mulf %30, %33 : vector<8x128x32xf32>
      %cst_17 = arith.constant dense<0.000000e+00> : vector<8x128xf32>
      %35 = vector.multi_reduction <add>, %34, %cst_17 [2] : vector<8x128x32xf32> to vector<8x128xf32>
      %c0_18 = arith.constant 0 : index
      %c0_19 = arith.constant 0 : index
      %36 = vector.load %arg10[%c0_18, %c0_19] : memref<1x1xf32, #tpu.memory_space<vmem>>, vector<1x1xf32>
      %37 = vector.broadcast %36 : vector<1x1xf32> to vector<8x128xf32>
      %38 = arith.addf %35, %37 : vector<8x128xf32>
      %cst_20 = arith.constant -1.000000e+30 : f32
      %39 = vector.shape_cast %2 : vector<1x128xi1> to vector<1x128xi1>
      %40 = vector.broadcast %39 : vector<1x128xi1> to vector<8x128xi1>
      %41 = vector.broadcast %cst_20 : f32 to vector<8x128xf32>
      %42 = arith.select %40, %38, %41 : vector<8x128xi1>, vector<8x128xf32>
      %cst_21 = arith.constant dense<0xFF800000> : vector<8xf32>
      %43 = vector.multi_reduction <maximumf>, %42, %cst_21 [1] : vector<8x128xf32> to vector<8xf32>
      %44 = vector.shape_cast %43 : vector<8xf32> to vector<8x1xf32>
      %45 = vector.broadcast %44 : vector<8x1xf32> to vector<8x128xf32>
      %46 = arith.subf %42, %45 : vector<8x128xf32>
      %47 = math.exp %46 : vector<8x128xf32>
      %cst_22 = arith.constant 0.000000e+00 : f32
      %48 = vector.shape_cast %2 : vector<1x128xi1> to vector<1x128xi1>
      %49 = vector.broadcast %48 : vector<1x128xi1> to vector<8x128xi1>
      %50 = vector.broadcast %cst_22 : f32 to vector<8x128xf32>
      %51 = arith.select %49, %47, %50 : vector<8x128xi1>, vector<8x128xf32>
      %cst_23 = arith.constant dense<0.000000e+00> : vector<8xf32>
      %52 = vector.multi_reduction <add>, %51, %cst_23 [1] : vector<8x128xf32> to vector<8xf32>
      %53 = vector.shape_cast %52 : vector<8xf32> to vector<8x1xf32>
      %54 = tpu.reciprocal %53 : vector<8x1xf32> -> vector<8x1xf32>
      %55 = vector.broadcast %54 : vector<8x1xf32> to vector<8x128xf32>
      %56 = arith.mulf %51, %55 : vector<8x128xf32>
      %57 = vector.shape_cast %56 : vector<8x128xf32> to vector<8x128x1xf32>
      %c0_24 = arith.constant 0 : index
      %c0_25 = arith.constant 0 : index
      %c0_26 = arith.constant 0 : index
      %58 = vector.load %arg0[%c0_24, %c0_25, %c0_26] : memref<8x128x32xbf16, #tpu.memory_space<vmem>>, vector<8x128x32xbf16>
      %59 = arith.extf %58 : vector<8x128x32xbf16> to vector<8x128x32xf32>
      %60 = vector.broadcast %57 : vector<8x128x1xf32> to vector<8x128x32xf32>
      %61 = arith.mulf %60, %59 : vector<8x128x32xf32>
      %cst_27 = arith.constant dense<0.000000e+00> : vector<8x32xf32>
      %62 = vector.multi_reduction <add>, %61, %cst_27 [1] : vector<8x128x32xf32> to vector<8x32xf32>
      %63 = arith.mulf %22, %62 : vector<8x32xf32>
      %64 = arith.index_cast %arg14 : i32 to index
      %c0_28 = arith.constant 0 : index
      %c0_29 = arith.constant 0 : index
      %65 = vector.load %arg2[%64, %c0_28, %c0_29] : memref<7x8x128xf32, #tpu.memory_space<vmem>>, vector<1x8x128xf32>
      %66 = vector.shape_cast %65 : vector<1x8x128xf32> to vector<8x128xf32>
      %67 = arith.addf %66, %23 : vector<8x128xf32>
      %68 = arith.truncf %63 : vector<8x32xf32> to vector<8x32xbf16>
      %c0_30 = arith.constant 0 : index
      %c0_31 = arith.constant 0 : index
      %69 = vector.load %arg11[%c0_30, %c0_31] : memref<32x128xbf16, #tpu.memory_space<vmem>>, vector<32x128xbf16>
      %cst_32 = arith.constant dense<0.000000e+00> : vector<8x128xf32>
      %70 = tpu.matmul %68, %69, %cst_32 {dimension_numbers = #tpu.dot_dimension_numbers<[1], [0], [0], [1], [0, 0, 1, 1], [], []>} : vector<8x32xbf16>, vector<32x128xbf16>, vector<8x128xf32> -> vector<8x128xf32>
      %71 = arith.addf %67, %70 : vector<8x128xf32>
      %72 = vector.extract_strided_slice %71 {offsets = [0, 0], sizes = [8, 32], strides = [1, 1]} : vector<8x128xf32> to vector<8x32xf32>
      %73 = arith.negf %72 : vector<8x32xf32>
      %74 = math.exp %73 : vector<8x32xf32>
      %cst_33 = arith.constant 1.000000e+00 : f32
      %75 = vector.broadcast %cst_33 : f32 to vector<8x32xf32>
      %76 = arith.addf %75, %74 : vector<8x32xf32>
      %77 = arith.divf %75, %76 : vector<8x32xf32>
      %78 = vector.extract_strided_slice %71 {offsets = [0, 32], sizes = [8, 32], strides = [1, 1]} : vector<8x128xf32> to vector<8x32xf32>
      %79 = arith.negf %78 : vector<8x32xf32>
      %80 = math.exp %79 : vector<8x32xf32>
      %cst_34 = arith.constant 1.000000e+00 : f32
      %81 = vector.broadcast %cst_34 : f32 to vector<8x32xf32>
      %82 = arith.addf %81, %80 : vector<8x32xf32>
      %83 = arith.divf %81, %82 : vector<8x32xf32>
      %84 = vector.extract_strided_slice %71 {offsets = [0, 64], sizes = [8, 32], strides = [1, 1]} : vector<8x128xf32> to vector<8x32xf32>
      %85 = math.tanh %84 : vector<8x32xf32>
      %86 = vector.extract_strided_slice %71 {offsets = [0, 96], sizes = [8, 32], strides = [1, 1]} : vector<8x128xf32> to vector<8x32xf32>
      %87 = arith.negf %86 : vector<8x32xf32>
      %88 = math.exp %87 : vector<8x32xf32>
      %cst_35 = arith.constant 1.000000e+00 : f32
      %89 = vector.broadcast %cst_35 : f32 to vector<8x32xf32>
      %90 = arith.addf %89, %88 : vector<8x32xf32>
      %91 = arith.divf %89, %90 : vector<8x32xf32>
      %92 = arith.mulf %83, %arg16 : vector<8x32xf32>
      %93 = arith.mulf %77, %85 : vector<8x32xf32>
      %94 = arith.addf %92, %93 : vector<8x32xf32>
      %95 = math.tanh %94 : vector<8x32xf32>
      %96 = arith.mulf %91, %95 : vector<8x32xf32>
      %c0_36 = arith.constant 0 : index
      %c0_37 = arith.constant 0 : index
      %97 = vector.load %arg3[%c0_36, %c0_37] : memref<8x1xi32, #tpu.memory_space<vmem>>, vector<8x1xi32>
      %98 = vector.broadcast %arg14 : i32 to vector<8x1xi32>
      %99 = arith.cmpi sgt, %97, %98 : vector<8x1xi32>
      %100 = vector.shape_cast %99 : vector<8x1xi1> to vector<8x1xi1>
      %101 = vector.broadcast %100 : vector<8x1xi1> to vector<8x32xi1>
      %102 = arith.select %101, %96, %arg15 : vector<8x32xi1>, vector<8x32xf32>
      %103 = vector.shape_cast %99 : vector<8x1xi1> to vector<8x1xi1>
      %104 = vector.broadcast %103 : vector<8x1xi1> to vector<8x32xi1>
      %105 = arith.select %104, %94, %arg16 : vector<8x32xi1>, vector<8x32xf32>
      %106 = arith.truncf %96 : vector<8x32xf32> to vector<8x32xbf16>
      %107 = arith.index_cast %arg14 : i32 to index
      %c0_38 = arith.constant 0 : index
      %c0_39 = arith.constant 0 : index
      %108 = vector.load %arg12[%107, %c0_38, %c0_39] : memref<7x8x32xbf16, #tpu.memory_space<vmem>>, vector<1x8x32xbf16>
      %109 = vector.shape_cast %108 : vector<1x8x32xbf16> to vector<8x32xbf16>
      %110 = vector.shape_cast %106 : vector<8x32xbf16> to vector<1x8x32xbf16>
      tpu.vector_store %arg12[%107, %c0_38, %c0_39], %110 {strides = array<i32>} : memref<7x8x32xbf16, #tpu.memory_space<vmem>>, vector<1x8x32xbf16>,
      %111 = arith.extui %99 : vector<8x1xi1> to vector<8x1xi32>
      %112 = arith.sitofp %111 : vector<8x1xi32> to vector<8x1xf32>
      %113 = vector.broadcast %112 : vector<8x1xf32> to vector<8x128xf32>
      %114 = arith.mulf %56, %113 : vector<8x128xf32>
      %115 = arith.index_cast %arg14 : i32 to index
      %c0_40 = arith.constant 0 : index
      %c0_41 = arith.constant 0 : index
      %116 = vector.load %arg13[%115, %c0_40, %c0_41] : memref<7x8x128xf32, #tpu.memory_space<vmem>>, vector<1x8x128xf32>
      %117 = vector.shape_cast %116 : vector<1x8x128xf32> to vector<8x128xf32>
      %118 = vector.shape_cast %114 : vector<8x128xf32> to vector<1x8x128xf32>
      tpu.vector_store %arg13[%115, %c0_40, %c0_41], %118 {strides = array<i32>} : memref<7x8x128xf32, #tpu.memory_space<vmem>>, vector<1x8x128xf32>,
      scf.yield %102, %105 : vector<8x32xf32>, vector<8x32xf32>
    }
    %c7_i32_3 = arith.constant 7 : i32
    return
  }
}

</mosaic_0001>

<bundles_post_ra>
// kernel: tpu_custom_call.1
= control target key start
LH: loop header
LB: loop body
LE: loop exit
PB: predicated region body
PF: predicated region fallthrough
CT: control target
= control target key end

     0   :  { %s7531_s0 = inlined_call_operand.hbm [shape: bf16[8,128,32], index: 0, kind: input, shape index: {}]   ;;  %s7532_s1 = inlined_call_operand.hbm [shape: bf16[8,128,32], index: 1, kind: input, shape index: {}]   ;;  %s7533_s2 = inlined_call_operand.hbm [shape: f32[7,8,128], index: 2, kind: input, shape index: {}]   ;;  %s7534_s3 = inlined_call_operand.hbm [shape: s32[8,1], index: 3, kind: input, shape index: {}]   ;;  %s7535_s4 = inlined_call_operand.hbm [shape: f32[8,32], index: 4, kind: input, shape index: {}]   ;;  %s7536_s5 = inlined_call_operand.hbm [shape: f32[8,32], index: 5, kind: input, shape index: {}]   ;;  %s7537_s6 = inlined_call_operand.hbm [shape: bf16[32,192], index: 6, kind: input, shape index: {}]   ;;  %s7538_s7 = inlined_call_operand.hbm [shape: f32[1,32], index: 7, kind: input, shape index: {}]   ;;  %s7539_s8 = inlined_call_operand.hbm [shape: f32[1,32], index: 8, kind: input, shape index: {}]   ;;  %s7540_s9 = inlined_call_operand.hbm [shape: f32[1,32], index: 9, kind: input, shape index: {}]   ;;  %s7541_s10 = inlined_call_operand.<no memory space> [shape: f32[1,1], index: 10, kind: input, shape index: {}]   ;;  %s7542_s11 = inlined_call_operand.hbm [shape: bf16[32,128], index: 11, kind: input, shape index: {}]   ;;  %s7543_s12 = inlined_call_operand.hbm [shape: bf16[7,8,32], index: 12, kind: output, shape index: {0}]   ;;  %s7544_s13 = inlined_call_operand.hbm [shape: f32[7,8,128], index: 13, kind: output, shape index: {1}]  }
   0x1   :  { %v19_v0 = vstv %s7541_s10 }
   0x2   :  { %20 = vst [vmem:[#allocation2] sm:$0x1] %v19_v0 }
   0x3   :  { %21 = vsyncpa [#allocation4], 0 }
   0x4   :  { %22 = vsyncpa [#allocation7], 0 }
   0x5   :  { %23 = vsyncpa [#allocation10], 0 }
   0x6   :  { %24 = vsyncpa [#allocation13], 0 }
   0x7   :  { %25 = vsyncpa [#allocation16], 0 }
   0x8   :  { %26 = vsyncpa [#allocation19], 0 }
   0x9   :  { %27 = vsyncpa [#allocation5], 0 }
   0xa   :  { %28 = vsyncpa [#allocation23], 0  ;;  %s4876_s27 = smov [#allocation6]   ;;  %s4877_s29 = smov [#allocation9]  }
   0xb   :  { %s46_s28 = sshll.u32 %s4876_s27, 4  ;;  %s71_s30 = sshll.u32 %s4877_s29, 4  ;;  %s47_s28 = int_to_ptr.vmem [resolvable:$true] %s46_s28  ;;  %s72_s30 = int_to_ptr.vmem [resolvable:$true] %s71_s30 }
   0xc   :  { %s4550_s16 = scalar_lea.hbm %s7532_s1, 8192 }
   0xd   :  { %p4551_p0 = scmp.ne.s32.totalorder %s7532_s1, %s4550_s16  ;;  %p4554_p1 = scmp.lt.u32.totalorder %s4550_s16, %s7532_s1 }
   0xf   :  { %p4556_p2 = pnand %p4554_p1, %p4551_p0 }
  0x11   :  { %4559 = shalt.err (!%p4556_p2)
}
  0x12   :  { %s4560_s20 = scalar_lea.vmem %s47_s28, 8192  ;;  %p4565_p4 = scmp.lt.s32.totalorder %s47_s28, %s47_s28 }
  0x13   :  { %p4561_p3 = scmp.ne.s32.totalorder %s47_s28, %s4560_s20  ;;  %p4566_p5 = scmp.lt.s32.totalorder %s4560_s20, %s4560_s20 }
  0x15   :  { %p4567_p6 = por %p4566_p5, %p4565_p4 }
  0x17   :  { %p4568_p7 = pnand %p4567_p6, %p4561_p3 }
  0x19   :  { %4571 = shalt.err (!%p4568_p7)
}
  0x1a   :  { %s4878_s21 = smov 64   ;;  %s4879_s22 = smov 4  }
  0x1b   :  { %52 = dma.hbm_to_vmem [thread:$0]  %s7532_s1, 8192, %s47_s28, [#allocation7], %s4878_s21, %s4878_s21, %s4879_s22  }
  0x1c   :  { %s4572_s27 = scalar_lea.hbm %s7534_s3, 128 }
  0x1d   :  { %p4573_p8 = scmp.ne.s32.totalorder %s7534_s3, %s4572_s27  ;;  %p4576_p9 = scmp.lt.u32.totalorder %s4572_s27, %s7534_s3 }
  0x1f   :  { %p4578_p10 = pnand %p4576_p9, %p4573_p8 }
  0x21   :  { %4581 = shalt.err (!%p4578_p10)
}
  0x22   :  { %s4582_s10 = scalar_lea.vmem %s72_s30, 128  ;;  %p4587_p12 = scmp.lt.s32.totalorder %s72_s30, %s72_s30 }
  0x23   :  { %p4583_p11 = scmp.ne.s32.totalorder %s72_s30, %s4582_s10  ;;  %p4588_p13 = scmp.lt.s32.totalorder %s4582_s10, %s4582_s10 }
  0x25   :  { %p4589_p0 = por %p4588_p13, %p4587_p12 }
  0x27   :  { %p4590_p1 = pnand %p4589_p0, %p4583_p11 }
  0x29   :  { %4593 = shalt.err (!%p4590_p1)
}
  0x2a   :  { %74 = dma.hbm_to_vmem [thread:$0]  %s7534_s3, 128, %s72_s30, [#allocation10]  }
  0x2b   :  { %s4880_s17 = smov [#allocation12]   ;;  %s4881_s19 = smov [#allocation15]  }
  0x2c   :  { %s91_s18 = sshll.u32 %s4880_s17, 4  ;;  %s113_s20 = sshll.u32 %s4881_s19, 4  ;;  %s92_s18 = int_to_ptr.vmem [resolvable:$true] %s91_s18  ;;  %s114_s20 = int_to_ptr.vmem [resolvable:$true] %s113_s20 }
  0x2d   :  { %s4594_s25 = scalar_lea.hbm %s7536_s5, 128 }
  0x2e   :  { %p4595_p2 = scmp.ne.s32.totalorder %s7536_s5, %s4594_s25  ;;  %p4598_p3 = scmp.lt.u32.totalorder %s4594_s25, %s7536_s5 }
  0x30   :  { %p4600_p4 = pnand %p4598_p3, %p4595_p2 }
  0x32   :  { %4603 = shalt.err (!%p4600_p4)
}
  0x33   :  { %s4604_s3 = scalar_lea.vmem %s92_s18, 128  ;;  %p4609_p6 = scmp.lt.s32.totalorder %s92_s18, %s92_s18 }
  0x34   :  { %p4605_p5 = scmp.ne.s32.totalorder %s92_s18, %s4604_s3  ;;  %p4610_p7 = scmp.lt.s32.totalorder %s4604_s3, %s4604_s3 }
  0x36   :  { %p4611_p8 = por %p4610_p7, %p4609_p6 }
  0x38   :  { %p4612_p9 = pnand %p4611_p8, %p4605_p5 }
  0x3a   :  { %4615 = shalt.err (!%p4612_p9)
}
  0x3b   :  { %94 = dma.hbm_to_vmem [thread:$0]  %s7536_s5, 128, %s92_s18, [#allocation13]  }
  0x3c   :  { %s4616_s1 = scalar_lea.hbm %s7538_s7, 16 }
  0x3d   :  { %p4617_p10 = scmp.ne.s32.totalorder %s7538_s7, %s4616_s1  ;;  %p4620_p11 = scmp.lt.u32.totalorder %s4616_s1, %s7538_s7 }
  0x3f   :  { %p4622_p12 = pnand %p4620_p11, %p4617_p10 }
  0x41   :  { %4625 = shalt.err (!%p4622_p12)
}
  0x42   :  { %s4626_s24 = scalar_lea.vmem %s114_s20, 16  ;;  %s4630_s25 = scalar_lea.vmem %s114_s20, 32 }
  0x43   :  { %p4627_p13 = scmp.ne.s32.totalorder %s114_s20, %s4626_s24  ;;  %p4631_p0 = scmp.lt.s32.totalorder %s114_s20, %s114_s20 }
  0x44   :  { %p4632_p1 = scmp.lt.s32.totalorder %s4630_s25, %s4626_s24 }
  0x46   :  { %p4633_p2 = por %p4632_p1, %p4631_p0 }
  0x48   :  { %p4634_p3 = pnand %p4633_p2, %p4627_p13 }
  0x4a   :  { %4637 = shalt.err (!%p4634_p3)
}
  0x4b   :  { %116 = dma.hbm_to_vmem [thread:$0]  %s7538_s7, 16, %s114_s20, [#allocation16]  }
  0x4c   :  { %s4882_s26 = smov [#allocation18]   ;;  %s4883_s29 = smov [#allocation3]  }
  0x4d   :  { %s133_s27 = sshll.u32 %s4882_s26, 4  ;;  %s34_s14 = sshll.u32 %s4883_s29, 4  ;;  %s134_s27 = int_to_ptr.vmem [resolvable:$true] %s133_s27  ;;  %s5024_s14 = int_to_ptr.vmem [resolvable:$true] %s34_s14 }
  0x4e   :  { %s4638_s15 = scalar_lea.hbm %s7540_s9, 16 }
  0x4f   :  { %p4639_p4 = scmp.ne.s32.totalorder %s7540_s9, %s4638_s15  ;;  %p4642_p5 = scmp.lt.u32.totalorder %s4638_s15, %s7540_s9 }
  0x51   :  { %p4644_p6 = pnand %p4642_p5, %p4639_p4 }
  0x53   :  { %4647 = shalt.err (!%p4644_p6)
}
  0x54   :  { %s4648_s7 = scalar_lea.vmem %s134_s27, 16  ;;  %s4652_s20 = scalar_lea.vmem %s134_s27, 32 }
  0x55   :  { %p4649_p7 = scmp.ne.s32.totalorder %s134_s27, %s4648_s7  ;;  %p4653_p8 = scmp.lt.s32.totalorder %s134_s27, %s134_s27 }
  0x56   :  { %p4654_p9 = scmp.lt.s32.totalorder %s4652_s20, %s4648_s7 }
  0x58   :  { %p4655_p10 = por %p4654_p9, %p4653_p8 }
  0x5a   :  { %p4656_p11 = pnand %p4655_p10, %p4649_p7 }
  0x5c   :  { %4659 = shalt.err (!%p4656_p11)
}
  0x5d   :  { %136 = dma.hbm_to_vmem [thread:$0]  %s7540_s9, 16, %s134_s27, [#allocation19]  }
  0x5e   :  { %s4660_s25 = scalar_lea.hbm %s7531_s0, 8192 }
  0x5f   :  { %p4661_p12 = scmp.ne.s32.totalorder %s7531_s0, %s4660_s25  ;;  %p4664_p13 = scmp.lt.u32.totalorder %s4660_s25, %s7531_s0 }
  0x61   :  { %p4666_p0 = pnand %p4664_p13, %p4661_p12 }
  0x63   :  { %4669 = shalt.err (!%p4666_p0)
}
  0x64   :  { %s4670_s3 = scalar_lea.vmem %s5024_s14, 8192  ;;  %p4675_p2 = scmp.lt.s32.totalorder %s5024_s14, %s5024_s14 }
  0x65   :  { %p4671_p1 = scmp.ne.s32.totalorder %s5024_s14, %s4670_s3  ;;  %p4676_p3 = scmp.lt.s32.totalorder %s4670_s3, %s4670_s3 }
  0x67   :  { %p4677_p4 = por %p4676_p3, %p4675_p2 }
  0x69   :  { %p4678_p5 = pnand %p4677_p4, %p4671_p1 }
  0x6b   :  { %4681 = shalt.err (!%p4678_p5)
}
  0x6c   :  { %40 = dma.hbm_to_vmem [thread:$0]  %s7531_s0, 8192, %s5024_s14, [#allocation4], %s4878_s21, %s4878_s21, %s4879_s22  }
  0x6d   :  { %s4884_s30 = smov [#allocation8]   ;;  %s4682_s1 = scalar_lea.hbm %s7533_s2, 896 }
  0x6e   :  { %s58_s15 = sshll.u32 %s4884_s30, 4  ;;  %p4683_p6 = scmp.ne.s32.totalorder %s7533_s2, %s4682_s1  ;;  %s59_s15 = int_to_ptr.vmem [resolvable:$true] %s58_s15 }
  0x6f   :  { %p4686_p7 = scmp.lt.u32.totalorder %s4682_s1, %s7533_s2 }
  0x71   :  { %p4688_p8 = pnand %p4686_p7, %p4683_p6 }
  0x73   :  { %4691 = shalt.err (!%p4688_p8)
}
  0x74   :  { %s4692_s19 = scalar_lea.vmem %s59_s15, 896  ;;  %p4697_p10 = scmp.lt.s32.totalorder %s59_s15, %s59_s15 }
  0x75   :  { %p4693_p9 = scmp.ne.s32.totalorder %s59_s15, %s4692_s19  ;;  %p4698_p11 = scmp.lt.s32.totalorder %s4692_s19, %s4692_s19 }
  0x77   :  { %p4699_p12 = por %p4698_p11, %p4697_p10 }
  0x79   :  { %p4700_p13 = pnand %p4699_p12, %p4693_p9 }
  0x7b   :  { %4703 = shalt.err (!%p4700_p13)
}
  0x7c   :  { %s4885_s0 = smov 128   ;;  %s4886_s14 = smov 8  }
  0x7d   :  { %64 = dma.hbm_to_vmem [thread:$0]  %s7533_s2, 896, %s59_s15, [#allocation7], %s4885_s0, %s4885_s0, %s4886_s14  }
  0x7e   :  { %s4887_s25 = smov [#allocation11]   ;;  %s4888_s18 = smov [#allocation14]  }
  0x7f   :  { %s81_s5 = sshll.u32 %s4887_s25, 4  ;;  %s100_s26 = sshll.u32 %s4888_s18, 4  ;;  %s82_s5 = int_to_ptr.vmem [resolvable:$true] %s81_s5  ;;  %s101_s26 = int_to_ptr.vmem [resolvable:$true] %s100_s26 }
  0x80   :  { %s4704_s9 = scalar_lea.hbm %s7535_s4, 128 }
  0x81   :  { %p4705_p0 = scmp.ne.s32.totalorder %s7535_s4, %s4704_s9  ;;  %p4708_p1 = scmp.lt.u32.totalorder %s4704_s9, %s7535_s4 }
  0x83   :  { %p4710_p2 = pnand %p4708_p1, %p4705_p0 }
  0x85   :  { %4713 = shalt.err (!%p4710_p2)
}
  0x86   :  { %s4714_s2 = scalar_lea.vmem %s82_s5, 128  ;;  %p4719_p4 = scmp.lt.s32.totalorder %s82_s5, %s82_s5 }
  0x87   :  { %p4715_p3 = scmp.ne.s32.totalorder %s82_s5, %s4714_s2  ;;  %p4720_p5 = scmp.lt.s32.totalorder %s4714_s2, %s4714_s2 }
  0x89   :  { %p4721_p6 = por %p4720_p5, %p4719_p4 }
  0x8b   :  { %p4722_p7 = pnand %p4721_p6, %p4715_p3 }
  0x8d   :  { %4725 = shalt.err (!%p4722_p7)
}
  0x8e   :  { %84 = dma.hbm_to_vmem [thread:$0]  %s7535_s4, 128, %s82_s5, [#allocation10]  }
  0x8f   :  { %s4726_s20 = scalar_lea.hbm %s7537_s6, 512 }
  0x90   :  { %p4727_p8 = scmp.ne.s32.totalorder %s7537_s6, %s4726_s20  ;;  %p4730_p9 = scmp.lt.u32.totalorder %s4726_s20, %s7537_s6 }
  0x92   :  { %p4732_p10 = pnand %p4730_p9, %p4727_p8 }
  0x94   :  { %4735 = shalt.err (!%p4732_p10)
}
  0x95   :  { %s4736_s25 = scalar_lea.vmem %s101_s26, 512  ;;  %p4741_p12 = scmp.lt.s32.totalorder %s101_s26, %s101_s26 }
  0x96   :  { %p4737_p11 = scmp.ne.s32.totalorder %s101_s26, %s4736_s25  ;;  %p4742_p13 = scmp.lt.s32.totalorder %s4736_s25, %s4736_s25 }
  0x98   :  { %p4743_p0 = por %p4742_p13, %p4741_p12 }
  0x9a   :  { %p4744_p1 = pnand %p4743_p0, %p4737_p11 }
  0x9c   :  { %4747 = shalt.err (!%p4744_p1)
}
  0x9d   :  { %106 = dma.hbm_to_vmem [thread:$0]  %s7537_s6, 512, %s101_s26, [#allocation13], %s4885_s0, %s4885_s0, %s4886_s14  }
  0x9e   :  { %s4889_s18 = smov [#allocation17]   ;;  %s4890_s3 = smov [#allocation20]  }
  0x9f   :  { %s123_s29 = sshll.u32 %s4889_s18, 4  ;;  %s144_s9 = sshll.u32 %s4890_s3, 4  ;;  %s124_s29 = int_to_ptr.vmem [resolvable:$true] %s123_s29  ;;  %s145_s9 = int_to_ptr.vmem [resolvable:$true] %s144_s9 }
  0xa0   :  { %s4748_s16 = scalar_lea.hbm %s7539_s8, 16 }
  0xa1   :  { %p4749_p2 = scmp.ne.s32.totalorder %s7539_s8, %s4748_s16  ;;  %p4752_p3 = scmp.lt.u32.totalorder %s4748_s16, %s7539_s8 }
  0xa3   :  { %p4754_p4 = pnand %p4752_p3, %p4749_p2 }
  0xa5   :  { %4757 = shalt.err (!%p4754_p4)
}
  0xa6   :  { %s4758_s6 = scalar_lea.vmem %s124_s29, 16  ;;  %s4762_s26 = scalar_lea.vmem %s124_s29, 32 }
  0xa7   :  { %p4759_p5 = scmp.ne.s32.totalorder %s124_s29, %s4758_s6  ;;  %p4763_p6 = scmp.lt.s32.totalorder %s124_s29, %s124_s29 }
  0xa8   :  { %p4764_p7 = scmp.lt.s32.totalorder %s4762_s26, %s4758_s6 }
  0xaa   :  { %p4765_p8 = por %p4764_p7, %p4763_p6 }
  0xac   :  { %p4766_p9 = pnand %p4765_p8, %p4759_p5 }
  0xae   :  { %4769 = shalt.err (!%p4766_p9)
}
  0xaf   :  { %126 = dma.hbm_to_vmem [thread:$0]  %s7539_s8, 16, %s124_s29, [#allocation16]  }
  0xb0   :  { %s4770_s19 = scalar_lea.hbm %s7542_s11, 256 }
  0xb1   :  { %p4771_p10 = scmp.ne.s32.totalorder %s7542_s11, %s4770_s19  ;;  %p4774_p11 = scmp.lt.u32.totalorder %s4770_s19, %s7542_s11 }
  0xb3   :  { %p4776_p12 = pnand %p4774_p11, %p4771_p10 }
  0xb5   :  { %4779 = shalt.err (!%p4776_p12)
}
  0xb6   :  { %s4780_s5 = scalar_lea.vmem %s145_s9, 256  ;;  %p4785_p0 = scmp.lt.s32.totalorder %s145_s9, %s145_s9 }
  0xb7   :  { %p4781_p13 = scmp.ne.s32.totalorder %s145_s9, %s4780_s5  ;;  %p4786_p1 = scmp.lt.s32.totalorder %s4780_s5, %s4780_s5 }
  0xb9   :  { %p4787_p2 = por %p4786_p1, %p4785_p0 }
  0xbb   :  { %p4788_p3 = pnand %p4787_p2, %p4781_p13 }
  0xbd   :  { %4791 = shalt.err (!%p4788_p3)
}
  0xbe   :  { %150 = dma.hbm_to_vmem [thread:$0]  %s7542_s11, 256, %s145_s9, [#allocation19], %s4878_s21, %s4878_s21, %s4879_s22  }
  0xbf   :  { %4848 = dma.done.wait [#allocation4], 8192  }
  0xc0   :  { %4849 = vsyncadd [#allocation4], 4294959104 }
  0xc1   :  { %4850 = dma.done.wait [#allocation7], 9088  }
  0xc2   :  { %4851 = vsyncadd [#allocation7], 4294958208 }
  0xc3   :  { %4852 = dma.done.wait [#allocation10], 256  }
  0xc4   :  { %4853 = vsyncadd [#allocation10], 4294967040 }
  0xc5   :  { %4854 = dma.done.wait [#allocation13], 640  }
  0xc6   :  { %4855 = vsyncadd [#allocation13], 4294966656 }
  0xc7   :  { %4856 = dma.done.wait [#allocation16], 32  }
  0xc8   :  { %4857 = vsyncadd [#allocation16], 4294967264 }
  0xc9   :  { %4858 = dma.done.wait [#allocation19], 272  }
  0xca   :  { %4859 = vsyncadd [#allocation19], 4294967024  ;;  %v7545_v1 = vlaneseq  ;;  %v188_v3 = vld [vmem:[#allocation11] sm:$0xff]   ;;  %v189_v4 = vld [vmem:[#allocation12] sm:$0xff]   ;;  %s5135_s11 = smov 0  }
  0xcc   :  { %v5128_v2 = vand.u32 127, %v7545_v1 }
  0xce   :  { %7589 = vst [vmem:[#allocation32_spill] sm:$0xff] %v5128_v2 }
  0xcf LB: > { %7591 = vst [vmem:[#allocation33_spill] sm:$0xff] %v4866_v4  ;;  %7592 = vst [vmem:[#allocation34_spill] sm:$0xff] %v4870_v3  ;;  %v4524_v5 = vld [vmem:[#allocation14 + $0x4] ss:$8 sps:$4 sm:$0xff]   ;;  %v4526_v6 = vld [vmem:[#allocation14] ss:$8 sps:$4 sm:$0xff]   ;;  %v198_v11 = vpack.c.bf16 %v4870_v3, %v4870_v3  ;;  %v7593_v1 = vlaneseq  ;;  %v4866_v4 = vphi %v189_v4, %v3749_v4   ;;  %s4874_s11 = sphi %s5135_s11, %s195_s11   ;;  %v4870_v3 = vphi %v188_v3, %v3745_v3  }
  0xd0   : > { %v7546_v7 = vmov 0   ;;  %227 = vmatprep.subr.bf16.mxu0 %v4524_v5  ;;  %v4527_v8 = vld [vmem:[#allocation14 + $0x14] ss:$8 sps:$4 sm:$0xff]   ;;  %v4529_v9 = vld [vmem:[#allocation14 + $0x10] ss:$8 sps:$4 sm:$0xff]   ;;  %vm7563_vm1 = vcmask 261120  }
  0xd1   : > { %259 = vmatprep.mubr.bf16.mxu0 %v7546_v7  ;;  %4522 = vset.pattern.permute.xlu1 %v7546_v7  ;;  %v3815_v10 = vld [vmem:[#allocation2] ss:$0 sm:$0xff]  ;;  %v4892_v12 = vmov 1966171168   ;;  %v5153_v15 = vshrl.u32 %v7593_v1, 7  ;;  %v4338_v25 = vld [vmem:[#allocation6 + $0x10] sm:$0xff]  }
  0xd2   : > { %4523 = vset.pattern.permute.xlu0 %v7546_v7  ;;  %228 = vmatpush1.bf16.msra.mxu0 %v4526_v6  ;;  %v551_v13 = vunpack.c.l.s4 %v4892_v12  ;;  %v3811_v16 = vld [vmem:[#allocation15] ss:$0 sm:$0xff]  ;;  %v3826_v26 = vld [vmem:[#allocation6] sm:$0xff]   ;;  %v3835_v30 = vunpack.c.l.bf16 %v4338_v25  ;;  %v4337_v33 = vld [vmem:[#allocation6 + $0x8] sm:$0xff]   ;;  %v3836_v36 = vunpack.c.h.bf16 %v4338_v25  ;;  %vm1690_vm2 = vcmask 130112   ;;  %s4893_s29 = smov 32  }
  0xd3   : > { %1420 = vperm.xlu1 %4522, %v3815_v10   ;;  %229 = vmatprep.subr.bf16.mxu0 %v4527_v8  ;;  %7594 = vst [vmem:[#allocation35_spill] sm:$0xff] %v5153_v15  ;;  %v5167_v27 = vsub.s32 0, %v5153_v15  ;;  %v3827_v31 = vunpack.c.l.bf16 %v3826_v26  ;;  %v5176_v32 = vld [vmem:[#allocation6 + $0x20] sm:$0xff]   ;;  %v3828_v37 = vunpack.c.h.bf16 %v3826_v26  ;;  %v5184_v38 = vld [vmem:[#allocation6 + $0x28] sm:$0xff]   ;;  %v3831_v41 = vunpack.c.l.bf16 %v4337_v33  ;;  %v4342_v44 = vld [vmem:[#allocation6 + $0x30] sm:$0xff]   ;;  %s4894_s3 = smov 64  }
  0xd4   : > { %v552_v14 = vunpack.c.0.s8 %v551_v13  ;;  %v3843_v40 = vunpack.c.l.bf16 %v5176_v32  ;;  %v4339_v45 = vld [vmem:[#allocation6 + $0x18] sm:$0xff]   ;;  %v5192_v46 = vld [vmem:[#allocation18] ss:$0 sm:$0xff]  ;;  %v3848_v47 = vunpack.c.h.bf16 %v5184_v38  ;;  %v3832_v48 = vunpack.c.h.bf16 %v4337_v33  ;;  %s4897_s9 = smov 96   ;;  %s3816_s27 = sshll.u32 %s4874_s11, 3 }
  0xd5   : > { %v7590_v2 = vld [vmem:[#allocation32_spill] sm:$0xff]  ;;  %7597 = vst [vmem:[#allocation38_spill] sm:$0xff] %v5167_v27  ;;  %v3851_v55 = vunpack.c.l.bf16 %v4342_v44  ;;  %v3839_v56 = vunpack.c.l.bf16 %v4339_v45  ;;  %v3852_v10 = vunpack.c.h.bf16 %v4342_v44  ;;  %vm1697_vm3 = vcmask 195712   ;;  %s3605_s30 = scalar_lea.vmem [#allocation8], %s3816_s27  ;;  %s3741_s16 = scalar_lea.vmem [#allocation22], %s3816_s27 }
  0xd6   : > { %230 = vmatpush1.bf16.msra.mxu0 %v4529_v9  ;;  %v5156_v17 = vsub.s32 %v552_v14, %v5153_v15  ;;  %vm1704_vm4 = vcmask 261312   ;;  %vm7548_vm5 = vcmask 326912   ;;  %vm1718_vm6 = vcmask 392512   ;;  %s3822_s10 = sshll.u32 %s4874_s11, 2 }
  0xd7   : > { %vm1725_vm7 = vcmask 458112   ;;  %vm1732_vm8 = vcmask 523712   ;;  %vm1739_vm9 = vcmask 589312   ;;  %vm1746_vm10 = vcmask 654912   ;;  %s3731_s2 = scalar_lea.vmem [#allocation21], %s3822_s10 }
  0xd8   : > { %vm1753_vm11 = vcmask 720512   ;;  %vm1760_vm12 = vcmask 786112   ;;  %vm1767_vm13 = vcmask 851712   ;;  %vm1774_vm14 = vcmask 917312  }
  0xd9   : > { %3810 = vmatmul.mubr.msk.bf16.vlgmr.msra.gmra.mrb[0].mxu0 %vm7563_vm1, %v198_v11  ;;  %v3840_v11 = vunpack.c.h.bf16 %v4339_v45  ;;  %v3847_v45 = vunpack.c.l.bf16 %v5184_v38  ;;  %vm1781_vm15 = vcmask 982912   ;;  %vm1788_vm0 = vcmask 1048512  }
 0x1ac   : > { %v5158_v18 = vpop.f32.mrb[0].mxu0 }
 0x1ad   : > { %7595 = vst [vmem:[#allocation36_spill] sm:$0xff] %v5158_v18  ;;  %v275_v19 = vadd.f32 %v3811_v16, %v5158_v18  ;;  %v5161_v20 = vpop.f32.mrb[1].mxu0 }
 0x1ae   : > { %7596 = vst [vmem:[#allocation37_spill] sm:$0xff] %v5161_v20  ;;  %v265_v21 = vpop.f32.mrb[2].mxu0 }
 0x1af   : > { %v549_v22 = vcombine.high %v275_v19, %v275_v19  ;;  %v5164_v23 = vrot.slane %v275_v19, %v5156_v17  ;;  %v266_v24 = vpop.f32.mrb[3].mxu0  ;;  %v4343_v19 = vld [vmem:[#allocation6 + $0x38] sm:$0xff]  }
 0x1b0   : > { %v3856_v44 = vunpack.c.h.bf16 %v4343_v19 }
 0x1b1   : > { %v5170_v28 = vrot.slane %v549_v22, %v5156_v17  ;;  %v5174_v29 = vrot.slane %v5164_v23, %v5156_v17  ;;  %v564_v26 = vcombine.high %v5164_v23, %v5164_v23 }
 0x1b3   : > { %v565_v34 = vcombine.high %v5170_v28, %v5170_v28  ;;  %v5182_v35 = vrot.slane %v5174_v29, %v5167_v27  ;;  %v5223_v23 = vrot.slane %v564_v26, %v5156_v17 }
 0x1b5   : > { %v5187_v39 = vrot.slane %v565_v34, %v5156_v17  ;;  %v642_v42 = vadd.f32 %v3835_v30, %v5182_v35  ;;  %v638_v43 = vadd.f32 %v3827_v31, %v5182_v35  ;;  %v643_v51 = vadd.f32 %v3836_v36, %v5182_v35 }
 0x1b6   : > { %v639_v52 = vadd.f32 %v3828_v37, %v5182_v35  ;;  %v646_v53 = vadd.f32 %v3843_v40, %v5182_v35  ;;  %v640_v54 = vadd.f32 %v3831_v41, %v5182_v35  ;;  %v649_v63 = vadd.f32 %v3848_v47, %v5182_v35 }
 0x1b7   : > { %v770_v49 = vmax.f32 %v642_v42, 0.0  ;;  %v766_v50 = vmax.f32 %v638_v43, 0.0  ;;  %v771_v59 = vmax.f32 %v643_v51, 0.0  ;;  %v641_v0 = vadd.f32 %v3832_v48, %v5182_v35  ;;  %v5232_v51 = vld [vmem:[#allocation6 + $0x80] sm:$0xff]  }
 0x1b8   : > { %v767_v60 = vmax.f32 %v639_v52, 0.0  ;;  %v774_v61 = vmax.f32 %v646_v53, 0.0  ;;  %v768_v62 = vmax.f32 %v640_v54, 0.0  ;;  %v777_v14 = vmax.f32 %v649_v63, 0.0  ;;  %v4344_v52 = vld [vmem:[#allocation6 + $0x40] sm:$0xff]   ;;  %v5246_v63 = vld [vmem:[#allocation6 + $0x88] sm:$0xff]  }
 0x1b9   : > { %v905_v57 = vmul.f32 %v5192_v46, %v770_v49  ;;  %v901_v58 = vmul.f32 %v5192_v46, %v766_v50  ;;  %v906_v8 = vmul.f32 %v5192_v46, %v771_v59  ;;  %v769_v16 = vmax.f32 %v641_v0, 0.0 }
 0x1ba   : > { %v902_v9 = vmul.f32 %v5192_v46, %v767_v60  ;;  %v909_v12 = vmul.f32 %v5192_v46, %v774_v61  ;;  %v903_v13 = vmul.f32 %v5192_v46, %v768_v62  ;;  %v650_v24 = vadd.f32 %v3851_v55, %v5182_v35 }
 0x1bb   : > { %v1041_v5 = vsel %vm7563_vm1, %v905_v57, 0.0  ;;  %v1029_v6 = vsel %vm7563_vm1, %v901_v58, 0.0  ;;  %v1044_v21 = vsel %vm7563_vm1, %v906_v8, 0.0  ;;  %v644_v25 = vadd.f32 %v3839_v56, %v5182_v35 }
 0x1bc   : > { %1042 = vadd.xlane.f32.xlu1 %v1041_v5  ;;  %1030 = vadd.xlane.f32.xlu0 %v1029_v6  ;;  %v1032_v22 = vsel %vm7563_vm1, %v902_v9, 0.0  ;;  %v3855_v30 = vunpack.c.l.bf16 %v4343_v19  ;;  %v3844_v31 = vunpack.c.h.bf16 %v5176_v32  ;;  %v1053_v33 = vsel %vm7563_vm1, %v909_v12, 0.0 }
 0x1bd   : > { %v1035_v34 = vsel %vm7563_vm1, %v903_v13, 0.0  ;;  %v912_v36 = vmul.f32 %v5192_v46, %v777_v14  ;;  %v904_v37 = vmul.f32 %v5192_v46, %v769_v16  ;;  %v778_v40 = vmax.f32 %v650_v24, 0.0  ;;  %v4346_v14 = vld [vmem:[#allocation6 + $0x50] sm:$0xff]   ;;  %v4345_v16 = vld [vmem:[#allocation6 + $0x48] sm:$0xff]  }
 0x1be   : > { %v772_v41 = vmax.f32 %v644_v25, 0.0  ;;  %v651_v42 = vadd.f32 %v3852_v10, %v5182_v35  ;;  %v645_v43 = vadd.f32 %v3840_v11, %v5182_v35  ;;  %v594_v32 = vcombine.high %v5174_v29, %v5174_v29 }
 0x1bf   : > { %v1062_v47 = vsel %vm7563_vm1, %v912_v36, 0.0  ;;  %v1038_v48 = vsel %vm7563_vm1, %v904_v37, 0.0  ;;  %v652_v49 = vadd.f32 %v3855_v30, %v5182_v35  ;;  %v647_v50 = vadd.f32 %v3844_v31, %v5182_v35  ;;  %v5267_v37 = vld [vmem:[#allocation6 + $0x100] sm:$0xff]  }
 0x1c0   : > { %1045 = vadd.xlane.f32.xlu1 %v1044_v21  ;;  %1033 = vadd.xlane.f32.xlu0 %v1032_v22  ;;  %v913_v53 = vmul.f32 %v5192_v46, %v778_v40  ;;  %v907_v54 = vmul.f32 %v5192_v46, %v772_v41  ;;  %v779_v55 = vmax.f32 %v651_v42, 0.0  ;;  %v773_v29 = vmax.f32 %v645_v43, 0.0 }
 0x1c1   : > { %v5238_v38 = vrot.slane %v5223_v23, %v5167_v27  ;;  %v5241_v56 = vrot.slane %v594_v32, %v5167_v27  ;;  %v3891_v57 = vunpack.c.l.bf16 %v5232_v51  ;;  %v3859_v58 = vunpack.c.l.bf16 %v4344_v52 }
 0x1c2   : > { %v780_v59 = vmax.f32 %v652_v49, 0.0  ;;  %v775_v60 = vmax.f32 %v647_v50, 0.0  ;;  %v653_v61 = vadd.f32 %v3856_v44, %v5182_v35  ;;  %v648_v62 = vadd.f32 %v3847_v45, %v5182_v35 }
 0x1c3   : > { %v1065_v0 = vsel %vm7563_vm1, %v913_v53, 0.0  ;;  %v1047_v5 = vsel %vm7563_vm1, %v907_v54, 0.0  ;;  %v914_v6 = vmul.f32 %v5192_v46, %v779_v55  ;;  %v908_v8 = vmul.f32 %v5192_v46, %v773_v29 }
 0x1c4   : > { %1054 = vadd.xlane.f32.xlu1 %v1053_v33  ;;  %1036 = vadd.xlane.f32.xlu0 %v1035_v34  ;;  %v3895_v9 = vunpack.c.l.bf16 %v5246_v63  ;;  %v3860_v10 = vunpack.c.h.bf16 %v4344_v52  ;;  %v915_v11 = vmul.f32 %v5192_v46, %v780_v59  ;;  %v910_v12 = vmul.f32 %v5192_v46, %v775_v60  ;;  %v4354_v59 = vld [vmem:[#allocation6 + $0x90] sm:$0xff]  }
 0x1c5   : > { %v781_v35 = vmax.f32 %v653_v61, 0.0  ;;  %v776_v13 = vmax.f32 %v648_v62, 0.0  ;;  %v1068_v19 = vsel %vm7563_vm1, %v914_v6, 0.0  ;;  %v1050_v21 = vsel %vm7563_vm1, %v908_v8, 0.0 }
 0x1c6   : > { %v670_v22 = vadd.f32 %v3891_v57, %v5241_v56  ;;  %v654_v24 = vadd.f32 %v3859_v58, %v5238_v38  ;;  %v5261_v25 = vrot.slane %v5170_v28, %v5156_v17  ;;  %v3867_v26 = vunpack.c.l.bf16 %v4346_v14 }
 0x1c7   : > { %v3863_v30 = vunpack.c.l.bf16 %v4345_v16  ;;  %v1071_v31 = vsel %vm7563_vm1, %v915_v11, 0.0  ;;  %v1056_v33 = vsel %vm7563_vm1, %v910_v12, 0.0  ;;  %v916_v34 = vmul.f32 %v5192_v46, %v781_v35  ;;  %v4369_v12 = vld [vmem:[#allocation6 + $0x108] sm:$0xff]  }
 0x1c8   : > { %1063 = vadd.xlane.f32.xlu1 %v1062_v47  ;;  %1039 = vadd.xlane.f32.xlu0 %v1038_v48  ;;  %v911_v36 = vmul.f32 %v5192_v46, %v776_v13  ;;  %v798_v40 = vmax.f32 %v670_v22, 0.0  ;;  %v782_v41 = vmax.f32 %v654_v24, 0.0  ;;  %v672_v42 = vadd.f32 %v3895_v9, %v5241_v56 }
 0x1c9   : > { %v655_v43 = vadd.f32 %v3860_v10, %v5238_v38  ;;  %v5273_v17 = vrot.slane %v5261_v25, %v5167_v27  ;;  %v3892_v28 = vunpack.c.h.bf16 %v5232_v51  ;;  %v3956_v32 = vunpack.c.h.bf16 %v5267_v37 }
 0x1ca   : > { %v1074_v44 = vsel %vm7563_vm1, %v916_v34, 0.0  ;;  %v1059_v45 = vsel %vm7563_vm1, %v911_v36, 0.0  ;;  %v658_v47 = vadd.f32 %v3867_v26, %v5238_v38  ;;  %v656_v48 = vadd.f32 %v3863_v30, %v5238_v38  ;;  %v5301_v30 = vld [vmem:[#allocation6 + $0x98] sm:$0xff]  }
 0x1cb   : > { %v933_v49 = vmul.f32 %v5192_v46, %v798_v40  ;;  %v917_v50 = vmul.f32 %v5192_v46, %v782_v41  ;;  %v800_v52 = vmax.f32 %v672_v42, 0.0  ;;  %v783_v53 = vmax.f32 %v655_v43, 0.0 }
 0x1cc   : > { %1066 = vadd.xlane.f32.xlu1 %v1065_v0  ;;  %1048 = vadd.xlane.f32.xlu0 %v1047_v5  ;;  %v3864_v54 = vunpack.c.h.bf16 %v4345_v16  ;;  %v3868_v51 = vunpack.c.h.bf16 %v4346_v14  ;;  %v786_v55 = vmax.f32 %v658_v47, 0.0  ;;  %v784_v29 = vmax.f32 %v656_v48, 0.0 }
 0x1cd   : > { %v671_v57 = vadd.f32 %v3892_v28, %v5241_v56  ;;  %v703_v58 = vadd.f32 %v3956_v32, %v5273_v17  ;;  %v1125_v60 = vsel %vm7563_vm1, %v933_v49, 0.0  ;;  %v1077_v61 = vsel %vm7563_vm1, %v917_v50, 0.0  ;;  %v5310_v32 = vld [vmem:[#allocation6 + $0x110] sm:$0xff]  }
 0x1ce   : > { %v935_v62 = vmul.f32 %v5192_v46, %v800_v52  ;;  %v918_v0 = vmul.f32 %v5192_v46, %v783_v53  ;;  %v3896_v5 = vunpack.c.h.bf16 %v5246_v63  ;;  %v3900_v6 = vunpack.c.h.bf16 %v4354_v59 }
 0x1cf   : > { %v921_v8 = vmul.f32 %v5192_v46, %v786_v55  ;;  %v919_v9 = vmul.f32 %v5192_v46, %v784_v29  ;;  %v799_v10 = vmax.f32 %v671_v57, 0.0  ;;  %v831_v11 = vmax.f32 %v703_v58, 0.0  ;;  %v4348_v55 = vld [vmem:[#allocation6 + $0x60] sm:$0xff]   ;;  %v4347_v29 = vld [vmem:[#allocation6 + $0x58] sm:$0xff]  }
 0x1d0   : > { %1069 = vadd.xlane.f32.xlu1 %v1068_v19  ;;  %1051 = vadd.xlane.f32.xlu0 %v1050_v21  ;;  %v1131_v35 = vsel %vm7563_vm1, %v935_v62, 0.0  ;;  %v1080_v13 = vsel %vm7563_vm1, %v918_v0, 0.0  ;;  %v657_v14 = vadd.f32 %v3864_v54, %v5238_v38  ;;  %v659_v16 = vadd.f32 %v3868_v51, %v5238_v38 }
 0x1d1   : > { %v3960_v19 = vunpack.c.h.bf16 %v4369_v12  ;;  %v3955_v63 = vunpack.c.l.bf16 %v5267_v37  ;;  %v1089_v21 = vsel %vm7563_vm1, %v921_v8, 0.0  ;;  %v1083_v22 = vsel %vm7563_vm1, %v919_v9, 0.0 }
 0x1d2   : > { %v934_v24 = vmul.f32 %v5192_v46, %v799_v10  ;;  %v966_v26 = vmul.f32 %v5192_v46, %v831_v11  ;;  %v673_v34 = vadd.f32 %v3896_v5, %v5241_v56  ;;  %v675_v36 = vadd.f32 %v3900_v6, %v5241_v56 }
 0x1d3   : > { %v3903_v37 = vunpack.c.l.bf16 %v5301_v30  ;;  %v3899_v40 = vunpack.c.l.bf16 %v4354_v59  ;;  %v705_v43 = vadd.f32 %v3960_v19, %v5273_v17  ;;  %v702_v28 = vadd.f32 %v3955_v63, %v5273_v17 }
 0x1d4   : > { %1072 = vadd.xlane.f32.xlu1 %v1071_v31  ;;  %1057 = vadd.xlane.f32.xlu0 %v1056_v33  ;;  %v785_v31 = vmax.f32 %v657_v14, 0.0  ;;  %v787_v33 = vmax.f32 %v659_v16, 0.0  ;;  %v1128_v41 = vsel %vm7563_vm1, %v934_v24, 0.0  ;;  %v1224_v42 = vsel %vm7563_vm1, %v966_v26, 0.0 }
 0x1d5   : > { %v801_v47 = vmax.f32 %v673_v34, 0.0  ;;  %v803_v48 = vmax.f32 %v675_v36, 0.0  ;;  %v3963_v49 = vunpack.c.l.bf16 %v5310_v32  ;;  %v3959_v50 = vunpack.c.l.bf16 %v4369_v12 }
 0x1d6   : > { %v833_v52 = vmax.f32 %v705_v43, 0.0  ;;  %v830_v53 = vmax.f32 %v702_v28, 0.0  ;;  %v676_v54 = vadd.f32 %v3903_v37, %v5241_v56  ;;  %v674_v51 = vadd.f32 %v3899_v40, %v5241_v56 }
 0x1d7   : > { %v936_v59 = vmul.f32 %v5192_v46, %v801_v47  ;;  %v3871_v62 = vunpack.c.l.bf16 %v4347_v29  ;;  %v706_v11 = vadd.f32 %v3963_v49, %v5273_v17  ;;  %v704_v12 = vadd.f32 %v3959_v50, %v5273_v17 }
 0x1d8   : > { %1075 = vadd.xlane.f32.xlu1 %v1074_v44  ;;  %1060 = vadd.xlane.f32.xlu0 %v1059_v45  ;;  %v920_v44 = vmul.f32 %v5192_v46, %v785_v31  ;;  %v922_v45 = vmul.f32 %v5192_v46, %v787_v33  ;;  %v968_v0 = vmul.f32 %v5192_v46, %v833_v52  ;;  %v804_v6 = vmax.f32 %v676_v54, 0.0 }
 0x1d9   : > { %v965_v5 = vmul.f32 %v5192_v46, %v830_v53  ;;  %v802_v8 = vmax.f32 %v674_v51, 0.0  ;;  %v1134_v9 = vsel %vm7563_vm1, %v936_v59, 0.0  ;;  %v832_v24 = vmax.f32 %v704_v12, 0.0  ;;  %v4371_v53 = vld [vmem:[#allocation6 + $0x118] sm:$0xff]  }
 0x1da   : > { %v1086_v57 = vsel %vm7563_vm1, %v920_v44, 0.0  ;;  %v1092_v58 = vsel %vm7563_vm1, %v922_v45, 0.0  ;;  %v1230_v14 = vsel %vm7563_vm1, %v968_v0, 0.0  ;;  %v939_v19 = vmul.f32 %v5192_v46, %v804_v6 }
 0x1db   : > { %v1221_v16 = vsel %vm7563_vm1, %v965_v5, 0.0  ;;  %v937_v63 = vmul.f32 %v5192_v46, %v802_v8  ;;  %v660_v31 = vadd.f32 %v3871_v62, %v5238_v38  ;;  %v3904_v34 = vunpack.c.h.bf16 %v5301_v30  ;;  %v4357_v62 = vld [vmem:[#allocation6 + $0xa8] sm:$0xff]  }
 0x1dc   : > { %1126 = vadd.xlane.f32.xlu0 %v1125_v60  ;;  %1078 = vadd.xlane.f32.xlu1 %v1077_v61  ;;  %v938_v60 = vmul.f32 %v5192_v46, %v803_v48  ;;  %v3875_v61 = vunpack.c.l.bf16 %v4348_v55  ;;  %v1143_v36 = vsel %vm7563_vm1, %v939_v19, 0.0  ;;  %v967_v28 = vmul.f32 %v5192_v46, %v832_v24 }
 0x1dd   : > { %v1137_v37 = vsel %vm7563_vm1, %v937_v63, 0.0  ;;  %v788_v45 = vmax.f32 %v660_v31, 0.0  ;;  %v3964_v47 = vunpack.c.h.bf16 %v5310_v32  ;;  %v677_v52 = vadd.f32 %v3904_v34, %v5241_v56 }
 0x1de   : > { %v1140_v10 = vsel %vm7563_vm1, %v938_v60, 0.0  ;;  %v662_v26 = vadd.f32 %v3875_v61, %v5238_v38  ;;  %v1227_v51 = vsel %vm7563_vm1, %v967_v28, 0.0 }
 0x1df   : > { %v805_v61 = vmax.f32 %v677_v52, 0.0  ;;  %v707_v8 = vadd.f32 %v3964_v47, %v5273_v17 }
 0x1e0   : > { %1132 = vadd.xlane.f32.xlu0 %v1131_v35  ;;  %1081 = vadd.xlane.f32.xlu1 %v1080_v13  ;;  %v3876_v35 = vunpack.c.h.bf16 %v4348_v55  ;;  %v3872_v13 = vunpack.c.h.bf16 %v4347_v29  ;;  %v790_v44 = vmax.f32 %v662_v26, 0.0  ;;  %v923_v29 = vmul.f32 %v5192_v46, %v788_v45 }
 0x1e1   : > { %v835_v19 = vmax.f32 %v707_v8, 0.0 }
 0x1e2   : > { %v663_v40 = vadd.f32 %v3876_v35, %v5238_v38  ;;  %v925_v55 = vmul.f32 %v5192_v46, %v790_v44  ;;  %v1095_v5 = vsel %vm7563_vm1, %v923_v29, 0.0 }
 0x1e4   : > { %1090 = vadd.xlane.f32.xlu0 %v1089_v21  ;;  %1084 = vadd.xlane.f32.xlu1 %v1083_v22  ;;  %v4356_v21 = vld [vmem:[#allocation6 + $0xa0] sm:$0xff]   ;;  %v834_v22 = vmax.f32 %v706_v11, 0.0  ;;  %v791_v48 = vmax.f32 %v663_v40, 0.0  ;;  %v1101_v0 = vsel %vm7563_vm1, %v925_v55, 0.0  ;;  %v970_v40 = vmul.f32 %v5192_v46, %v835_v19 }
 0x1e5   : > { %v3907_v33 = vunpack.c.l.bf16 %v4356_v21 }
 0x1e6   : > { %v969_v43 = vmul.f32 %v5192_v46, %v834_v22  ;;  %v926_v32 = vmul.f32 %v5192_v46, %v791_v48 }
 0x1e7   : > { %v678_v50 = vadd.f32 %v3907_v33, %v5241_v56 }
 0x1e8   : > { %1129 = vadd.xlane.f32.xlu1 %v1128_v41  ;;  %1225 = vadd.xlane.f32.xlu0 %v1224_v42  ;;  %v661_v41 = vadd.f32 %v3872_v13, %v5238_v38  ;;  %v5338_v42 = vld [vmem:[#allocation6 + $0x68] sm:$0xff]   ;;  %v1233_v54 = vsel %vm7563_vm1, %v969_v43, 0.0  ;;  %v1104_v11 = vsel %vm7563_vm1, %v926_v32, 0.0  ;;  %v940_v13 = vmul.f32 %v5192_v46, %v805_v61  ;;  %v4358_v32 = vld [vmem:[#allocation6 + $0xb0] sm:$0xff]  }
 0x1e9   : > { %v3879_v30 = vunpack.c.l.bf16 %v5338_v42  ;;  %v806_v60 = vmax.f32 %v678_v50, 0.0  ;;  %v3880_v22 = vunpack.c.h.bf16 %v5338_v42  ;;  %v3912_v42 = vunpack.c.h.bf16 %v4357_v62 }
 0x1ea   : > { %v789_v49 = vmax.f32 %v661_v41, 0.0  ;;  %v1146_v31 = vsel %vm7563_vm1, %v940_v13, 0.0 }
 0x1eb   : > { %v664_v6 = vadd.f32 %v3879_v30, %v5238_v38  ;;  %v941_v35 = vmul.f32 %v5192_v46, %v806_v60  ;;  %v665_v30 = vadd.f32 %v3880_v22, %v5238_v38 }
 0x1ec   : > { %1087 = vadd.xlane.f32.xlu1 %v1086_v57  ;;  %1093 = vadd.xlane.f32.xlu0 %v1092_v58  ;;  %v3908_v57 = vunpack.c.h.bf16 %v4356_v21  ;;  %v3967_v58 = vunpack.c.l.bf16 %v4371_v53  ;;  %v924_v59 = vmul.f32 %v5192_v46, %v789_v49  ;;  %v1236_v49 = vsel %vm7563_vm1, %v970_v40, 0.0 }
 0x1ed   : > { %v1149_v26 = vsel %vm7563_vm1, %v941_v35, 0.0  ;;  %v793_v29 = vmax.f32 %v665_v30, 0.0 }
 0x1ee   : > { %v1098_v12 = vsel %vm7563_vm1, %v924_v59, 0.0  ;;  %v679_v63 = vadd.f32 %v3908_v57, %v5241_v56  ;;  %v708_v21 = vadd.f32 %v3967_v58, %v5273_v17  ;;  %v4351_v58 = vld [vmem:[#allocation6 + $0x78] sm:$0xff]  }
 0x1ef   : > { %v3888_v19 = vunpack.c.h.bf16 %v4351_v58 }
 0x1f0   : > { %1135 = vadd.xlane.f32.xlu1 %v1134_v9  ;;  %1141 = vadd.xlane.f32.xlu0 %v1140_v10  ;;  %v3968_v9 = vunpack.c.h.bf16 %v4371_v53  ;;  %v3911_v10 = vunpack.c.l.bf16 %v4357_v62  ;;  %v807_v41 = vmax.f32 %v679_v63, 0.0  ;;  %v836_v43 = vmax.f32 %v708_v21, 0.0 }
 0x1f1   : > { %v681_v62 = vadd.f32 %v3912_v42, %v5241_v56  ;;  %v669_v42 = vadd.f32 %v3888_v19, %v5238_v38 }
 0x1f2   : > { %v709_v33 = vadd.f32 %v3968_v9, %v5273_v17  ;;  %v680_v34 = vadd.f32 %v3911_v10, %v5241_v56  ;;  %v942_v50 = vmul.f32 %v5192_v46, %v807_v41  ;;  %v971_v52 = vmul.f32 %v5192_v46, %v836_v43 }
 0x1f3   : > { %v928_v9 = vmul.f32 %v5192_v46, %v793_v29  ;;  %v809_v35 = vmax.f32 %v681_v62, 0.0  ;;  %v3916_v41 = vunpack.c.h.bf16 %v4358_v32 }
 0x1f4   : > { %1231 = vadd.xlane.f32.xlu0 %v1230_v14  ;;  %1222 = vadd.xlane.f32.xlu1 %v1221_v16  ;;  %v4372_v14 = vld [vmem:[#allocation6 + $0x120] sm:$0xff]   ;;  %v792_v16 = vmax.f32 %v664_v6, 0.0  ;;  %v837_v44 = vmax.f32 %v709_v33, 0.0  ;;  %v808_v45 = vmax.f32 %v680_v34, 0.0  ;;  %v1152_v59 = vsel %vm7563_vm1, %v942_v50, 0.0 }
 0x1f5   : > { %v3971_v24 = vunpack.c.l.bf16 %v4372_v14  ;;  %v1239_v60 = vsel %vm7563_vm1, %v971_v52, 0.0  ;;  %v1110_v21 = vsel %vm7563_vm1, %v928_v9, 0.0  ;;  %v944_v34 = vmul.f32 %v5192_v46, %v809_v35 }
 0x1f6   : > { %v943_v55 = vmul.f32 %v5192_v46, %v808_v45  ;;  %v4361_v45 = vld [vmem:[#allocation6 + $0xc8] sm:$0xff]   ;;  %v595_v35 = vcombine.high %v5261_v25, %v5261_v25 }
 0x1f7   : > { %v710_v47 = vadd.f32 %v3971_v24, %v5273_v17  ;;  %v3927_v50 = vunpack.c.l.bf16 %v4361_v45 }
 0x1f8   : > { %1144 = vadd.xlane.f32.xlu0 %v1143_v36  ;;  %1138 = vadd.xlane.f32.xlu1 %v1137_v37  ;;  %v4350_v36 = vld [vmem:[#allocation6 + $0x70] sm:$0xff]   ;;  %v927_v37 = vmul.f32 %v5192_v46, %v792_v16  ;;  %v1155_v8 = vsel %vm7563_vm1, %v943_v55, 0.0  ;;  %v596_v16 = vcombine.high %v5223_v23, %v5223_v23  ;;  %v4359_v55 = vld [vmem:[#allocation6 + $0xb8] sm:$0xff]  }
 0x1f9   : > { %v3883_v28 = vunpack.c.l.bf16 %v4350_v36  ;;  %v3884_v53 = vunpack.c.h.bf16 %v4350_v36  ;;  %v838_v57 = vmax.f32 %v710_v47, 0.0  ;;  %v1158_v47 = vsel %vm7563_vm1, %v944_v34, 0.0 }
 0x1fa   : > { %v1107_v48 = vsel %vm7563_vm1, %v927_v37, 0.0  ;;  %v5398_v23 = vrot.slane %v596_v16, %v5167_v27 }
 0x1fb   : > { %v666_v61 = vadd.f32 %v3883_v28, %v5238_v38  ;;  %v973_v10 = vmul.f32 %v5192_v46, %v838_v57  ;;  %v667_v13 = vadd.f32 %v3884_v53, %v5238_v38 }
 0x1fc   : > { %1234 = vadd.xlane.f32.xlu0 %v1233_v54  ;;  %1228 = vadd.xlane.f32.xlu1 %v1227_v51  ;;  %v3972_v54 = vunpack.c.h.bf16 %v4372_v14  ;;  %v972_v51 = vmul.f32 %v5192_v46, %v837_v44 }
 0x1fd   : > { %v1245_v22 = vsel %vm7563_vm1, %v973_v10, 0.0  ;;  %v795_v36 = vmax.f32 %v667_v13, 0.0  ;;  %v5427_v13 = vrot.slane %v5187_v39, %v5167_v27 }
 0x1fe   : > { %v1242_v6 = vsel %vm7563_vm1, %v972_v51, 0.0  ;;  %v711_v14 = vadd.f32 %v3972_v54, %v5273_v17 }
 0x200   : > { %1102 = vadd.xlane.f32.xlu0 %v1101_v0  ;;  %1096 = vadd.xlane.f32.xlu1 %v1095_v5  ;;  %v3887_v0 = vunpack.c.l.bf16 %v4351_v58  ;;  %v3915_v5 = vunpack.c.l.bf16 %v4358_v32  ;;  %v839_v37 = vmax.f32 %v711_v14, 0.0  ;;  %v683_v32 = vadd.f32 %v3916_v41, %v5241_v56 }
 0x202   : > { %v668_v24 = vadd.f32 %v3887_v0, %v5238_v38  ;;  %v797_v38 = vmax.f32 %v669_v42, 0.0  ;;  %v811_v10 = vmax.f32 %v683_v32, 0.0 }
 0x204   : > { %1105 = vadd.xlane.f32.xlu0 %v1104_v11  ;;  %1099 = vadd.xlane.f32.xlu1 %v1098_v12  ;;  %v4373_v11 = vld [vmem:[#allocation6 + $0x128] sm:$0xff]   ;;  %v794_v12 = vmax.f32 %v666_v61, 0.0  ;;  %v796_v43 = vmax.f32 %v668_v24, 0.0  ;;  %v932_v0 = vmul.f32 %v5192_v46, %v797_v38  ;;  %v5435_v24 = vld [vmem:[#allocation6 + $0x180] sm:$0xff]  }
 0x205   : > { %v3975_v63 = vunpack.c.l.bf16 %v4373_v11  ;;  %v3976_v52 = vunpack.c.h.bf16 %v4373_v11  ;;  %v688_v11 = vadd.f32 %v3927_v50, %v5398_v23 }
 0x206   : > { %v929_v33 = vmul.f32 %v5192_v46, %v794_v12  ;;  %v931_v53 = vmul.f32 %v5192_v46, %v796_v43  ;;  %v1122_v19 = vsel %vm7563_vm1, %v932_v0, 0.0 }
 0x207   : > { %v712_v44 = vadd.f32 %v3975_v63, %v5273_v17  ;;  %v713_v12 = vadd.f32 %v3976_v52, %v5273_v17 }
 0x208   : > { %1150 = vadd.xlane.f32.xlu0 %v1149_v26  ;;  %1147 = vadd.xlane.f32.xlu1 %v1146_v31  ;;  %v682_v26 = vadd.f32 %v3915_v5, %v5241_v56  ;;  %v5393_v31 = vld [vmem:[#allocation6 + $0xc0] sm:$0xff]   ;;  %v1113_v30 = vsel %vm7563_vm1, %v929_v33, 0.0  ;;  %v1119_v61 = vsel %vm7563_vm1, %v931_v53, 0.0  ;;  %v816_v33 = vmax.f32 %v688_v11, 0.0 }
 0x209   : > { %v3924_v40 = vunpack.c.h.bf16 %v5393_v31  ;;  %v840_v51 = vmax.f32 %v712_v44, 0.0  ;;  %v841_v34 = vmax.f32 %v713_v12, 0.0  ;;  %v5445_v44 = vld [vmem:[#allocation6 + $0x188] sm:$0xff]   ;;  %v3923_v32 = vunpack.c.l.bf16 %v5393_v31 }
 0x20a   : > { %v810_v28 = vmax.f32 %v682_v26, 0.0  ;;  %v946_v26 = vmul.f32 %v5192_v46, %v811_v10  ;;  %v4023_v50 = vunpack.c.l.bf16 %v5445_v44 }
 0x20b   : > { %v687_v58 = vadd.f32 %v3924_v40, %v5398_v23  ;;  %v975_v5 = vmul.f32 %v5192_v46, %v840_v51  ;;  %v4019_v40 = vunpack.c.l.bf16 %v5435_v24  ;;  %v5455_v51 = vld [vmem:[#allocation6 + $0xd8] sm:$0xff]  }
 0x20c   : > { %1108 = vadd.xlane.f32.xlu0 %v1107_v48  ;;  %1237 = vadd.xlane.f32.xlu1 %v1236_v49  ;;  %v930_v48 = vmul.f32 %v5192_v46, %v795_v36  ;;  %v974_v49 = vmul.f32 %v5192_v46, %v839_v37  ;;  %v945_v54 = vmul.f32 %v5192_v46, %v810_v28  ;;  %v3920_v37 = vunpack.c.h.bf16 %v4359_v55 }
 0x20d   : > { %v815_v9 = vmax.f32 %v687_v58, 0.0  ;;  %v1251_v63 = vsel %vm7563_vm1, %v975_v5, 0.0  ;;  %v5440_v36 = vrot.slane %v595_v35, %v5167_v27 }
 0x20e   : > { %v1116_v29 = vsel %vm7563_vm1, %v930_v48, 0.0  ;;  %v1248_v57 = vsel %vm7563_vm1, %v974_v49, 0.0  ;;  %v1161_v62 = vsel %vm7563_vm1, %v945_v54, 0.0  ;;  %v976_v48 = vmul.f32 %v5192_v46, %v841_v34 }
 0x20f   : > { %v950_v25 = vmul.f32 %v5192_v46, %v815_v9  ;;  %v734_v58 = vadd.f32 %v4019_v40, %v5440_v36  ;;  %v5473_v9 = vld [vmem:[#allocation6 + $0x190] sm:$0xff]   ;;  %v736_v12 = vadd.f32 %v4023_v50, %v5440_v36 }
 0x210   : > { %1153 = vadd.xlane.f32.xlu0 %v1152_v59  ;;  %1240 = vadd.xlane.f32.xlu1 %v1239_v60  ;;  %v3928_v59 = vunpack.c.h.bf16 %v4361_v45  ;;  %v3919_v60 = vunpack.c.l.bf16 %v4359_v55 }
 0x211   : > { %v1176_v45 = vsel %vm7563_vm1, %v950_v25, 0.0  ;;  %v862_v31 = vmax.f32 %v734_v58, 0.0  ;;  %v4027_v25 = vunpack.c.l.bf16 %v5473_v9 }
 0x214   : > { %1243 = vadd.xlane.f32.xlu0 %v1242_v6  ;;  %1156 = vadd.xlane.f32.xlu1 %v1155_v8  ;;  %v5417_v6 = vld [vmem:[#allocation6 + $0x130] sm:$0xff]   ;;  %v5419_v8 = vld [vmem:[#allocation6 + $0x140] sm:$0xff]  }
 0x215   : > { %v3979_v14 = vunpack.c.l.bf16 %v5417_v6  ;;  %v3987_v16 = vunpack.c.l.bf16 %v5419_v8  ;;  %v3980_v49 = vunpack.c.h.bf16 %v5417_v6  ;;  %v5471_v6 = vld [vmem:[#allocation6 + $0x148] sm:$0xff]   ;;  %v3988_v35 = vunpack.c.h.bf16 %v5419_v8 }
 0x217   : > { %v714_v28 = vadd.f32 %v3979_v14, %v5273_v17  ;;  %v718_v42 = vadd.f32 %v3987_v16, %v5427_v13  ;;  %v715_v11 = vadd.f32 %v3980_v49, %v5273_v17  ;;  %v4024_v49 = vunpack.c.h.bf16 %v5445_v44 }
 0x218   : > { %1111 = vadd.xlane.f32.xlu0 %v1110_v21  ;;  %1246 = vadd.xlane.f32.xlu1 %v1245_v22  ;;  %v689_v21 = vadd.f32 %v3928_v59, %v5398_v23  ;;  %v684_v22 = vadd.f32 %v3919_v60, %v5241_v56  ;;  %v3935_v59 = vunpack.c.l.bf16 %v5455_v51  ;;  %v5463_v60 = vld [vmem:[#allocation6 + $0x150] sm:$0xff]  }
 0x219   : > { %v842_v54 = vmax.f32 %v714_v28, 0.0  ;;  %v846_v38 = vmax.f32 %v718_v42, 0.0  ;;  %v3995_v14 = vunpack.c.l.bf16 %v5463_v60  ;;  %v843_v28 = vmax.f32 %v715_v11, 0.0 }
 0x21a   : > { %v817_v41 = vmax.f32 %v689_v21, 0.0  ;;  %v812_v43 = vmax.f32 %v684_v22, 0.0  ;;  %v3996_v21 = vunpack.c.h.bf16 %v5463_v60  ;;  %v4020_v22 = vunpack.c.h.bf16 %v5435_v24 }
 0x21b   : > { %v977_v5 = vmul.f32 %v5192_v46, %v842_v54  ;;  %v692_v40 = vadd.f32 %v3935_v59, %v5398_v23  ;;  %v864_v42 = vmax.f32 %v736_v12, 0.0  ;;  %v5503_v54 = vld [vmem:[#allocation6 + $0x198] sm:$0xff]   ;;  %v722_v58 = vadd.f32 %v3995_v14, %v5427_v13  ;;  %v5543_v14 = vld [vmem:[#allocation6 + $0x1c0] sm:$0xff]  }
 0x21c   : > { %1114 = vadd.xlane.f32.xlu0 %v1113_v30  ;;  %1159 = vadd.xlane.f32.xlu1 %v1158_v47  ;;  %v1164_v30 = vsel %vm7563_vm1, %v946_v26, 0.0  ;;  %v951_v47 = vmul.f32 %v5192_v46, %v816_v33  ;;  %v952_v52 = vmul.f32 %v5192_v46, %v817_v41  ;;  %v947_v53 = vmul.f32 %v5192_v46, %v812_v43  ;;  %v5485_v26 = vld [vmem:[#allocation6 + $0xe0] sm:$0xff]   ;;  %v5487_v33 = vld [vmem:[#allocation6 + $0x158] sm:$0xff]  }
 0x21d   : > { %v1257_v8 = vsel %vm7563_vm1, %v977_v5, 0.0  ;;  %v997_v43 = vmul.f32 %v5192_v46, %v862_v31  ;;  %v3940_v50 = vunpack.c.h.bf16 %v5485_v26  ;;  %v999_v5 = vmul.f32 %v5192_v46, %v864_v42  ;;  %v5532_v42 = vld [vmem:[#allocation6 + $0x168] sm:$0xff]  }
 0x21e   : > { %v1179_v55 = vsel %vm7563_vm1, %v951_v47, 0.0  ;;  %v1167_v0 = vsel %vm7563_vm1, %v947_v53, 0.0  ;;  %v3992_v47 = vunpack.c.h.bf16 %v5471_v6  ;;  %v4000_v53 = vunpack.c.h.bf16 %v5487_v33 }
 0x21f   : > { %v4032_v31 = vunpack.c.h.bf16 %v5503_v54  ;;  %v850_v1 = vmax.f32 %v722_v58, 0.0  ;;  %v1741_v11 = vadd.s32 4294967224, %v7590_v2 }
 0x220   : > { %1117 = vadd.xlane.f32.xlu0 %v1116_v29  ;;  %1249 = vadd.xlane.f32.xlu1 %v1248_v57  ;;  %v1254_v29 = vsel %vm7563_vm1, %v976_v48, 0.0  ;;  %v685_v57 = vadd.f32 %v3920_v37, %v5241_v56  ;;  %v981_v56 = vmul.f32 %v5192_v46, %v846_v38  ;;  %v686_v37 = vadd.f32 %v3923_v32, %v5398_v23  ;;  %v5505_v38 = vld [vmem:[#allocation6 + $0xe8] sm:$0xff]   ;;  %v5511_v32 = vld [vmem:[#allocation6 + $0x1a0] sm:$0xff]  }
 0x221   : > { %v3999_v48 = vunpack.c.l.bf16 %v5487_v33 }
 0x222   : > { %v813_v10 = vmax.f32 %v685_v57, 0.0  ;;  %v1269_v34 = vsel %vm7563_vm1, %v981_v56, 0.0  ;;  %v719_v57 = vadd.f32 %v3988_v35, %v5427_v13  ;;  %v4031_v56 = vunpack.c.l.bf16 %v5503_v54 }
 0x224   : > { %1120 = vadd.xlane.f32.xlu0 %v1119_v61  ;;  %1162 = vadd.xlane.f32.xlu1 %v1161_v62  ;;  %v5465_v61 = vld [vmem:[#allocation6 + $0xd0] sm:$0xff]   ;;  %v1182_v62 = vsel %vm7563_vm1, %v952_v52, 0.0  ;;  %v948_v41 = vmul.f32 %v5192_v46, %v813_v10  ;;  %v4028_v52 = vunpack.c.h.bf16 %v5473_v9  ;;  %v3943_v10 = vunpack.c.l.bf16 %v5505_v38 }
 0x225   : > { %v3931_v16 = vunpack.c.l.bf16 %v5465_v61 }
 0x226   : > { %v1170_v59 = vsel %vm7563_vm1, %v948_v41, 0.0 }
 0x228   : > { %1123 = vadd.xlane.f32.xlu0 %v1122_v19  ;;  %1252 = vadd.xlane.f32.xlu1 %v1251_v63  ;;  %v3936_v19 = vunpack.c.h.bf16 %v5455_v51  ;;  %v3991_v63 = vunpack.c.l.bf16 %v5471_v6  ;;  %v5507_v51 = vld [vmem:[#allocation6 + $0x160] sm:$0xff]   ;;  %v1762_v6 = vadd.s32 4294967200, %v7590_v2 }
 0x22a   : > { %v693_v7 = vadd.f32 %v3936_v19, %v5398_v23 }
 0x22c   : > { %1177 = vadd.xlane.f32.xlu0 %v1176_v45  ;;  %1165 = vadd.xlane.f32.xlu1 %v1164_v30  ;;  %v3932_v45 = vunpack.c.h.bf16 %v5465_v61  ;;  %v3939_v30 = vunpack.c.l.bf16 %v5485_v26  ;;  %v821_v58 = vmax.f32 %v693_v7, 0.0 }
 0x22e   : > { %v691_v24 = vadd.f32 %v3932_v45, %v5398_v23  ;;  %v694_v45 = vadd.f32 %v3939_v30, %v5398_v23 }
 0x230   : > { %1180 = vadd.xlane.f32.xlu0 %v1179_v55  ;;  %1255 = vadd.xlane.f32.xlu1 %v1254_v29  ;;  %v814_v55 = vmax.f32 %v686_v37, 0.0  ;;  %v820_v29 = vmax.f32 %v692_v40, 0.0  ;;  %v5527_v37 = vld [vmem:[#allocation6 + $0xf0] sm:$0xff]   ;;  %v819_v35 = vmax.f32 %v691_v24, 0.0  ;;  %v822_v12 = vmax.f32 %v694_v45, 0.0 }
 0x232   : > { %v949_v40 = vmul.f32 %v5192_v46, %v814_v55  ;;  %v955_v41 = vmul.f32 %v5192_v46, %v820_v29  ;;  %v720_v55 = vadd.f32 %v3991_v63, %v5427_v13  ;;  %v723_v63 = vadd.f32 %v3996_v21, %v5427_v13 }
 0x233   : > { %v5565_v21 = vsub.s32 %v7590_v2, %v5153_v15 }
 0x234   : > { %1183 = vadd.xlane.f32.xlu0 %v1182_v62  ;;  %1168 = vadd.xlane.f32.xlu1 %v1167_v0  ;;  %v1317_v62 = vsel %vm7563_vm1, %v997_v43, 0.0  ;;  %v978_v0 = vmul.f32 %v5192_v46, %v843_v28  ;;  %v847_v43 = vmax.f32 %v719_v57, 0.0  ;;  %v690_v28 = vadd.f32 %v3931_v16, %v5398_v23  ;;  %v5555_v16 = vpop.permute.xlu1 %1420 }
 0x235   : > { %v1191_v57 = vsel %vm7563_vm1, %v955_v41, 0.0  ;;  %v1734_v41 = vadd.s32 4294967232, %v7590_v2 }
 0x238   : > { %1258 = vadd.xlane.f32.xlu1 %v1257_v8  ;;  %1270 = vadd.xlane.f32.xlu0 %v1269_v34  ;;  %v5525_v34 = vld [vmem:[#allocation6 + $0x1a8] sm:$0xff]   ;;  %v597_v8 = vcombine.high %v5187_v39, %v5187_v39  ;;  %v982_v39 = vmul.f32 %v5192_v46, %v847_v43  ;;  %v1713_v43 = vadd.s32 4294967256, %v7590_v2 }
 0x23a   : > { %v5559_v19 = vrot.slane %v597_v8, %v5167_v27  ;;  %v1272_v7 = vsel %vm7563_vm1, %v982_v39, 0.0 }
 0x23c   : > { %1171 = vadd.xlane.f32.xlu1 %v1170_v59  ;;  %1318 = vadd.xlane.f32.xlu0 %v1317_v62  ;;  %v1260_v59 = vsel %vm7563_vm1, %v978_v0, 0.0  ;;  %v1323_v62 = vsel %vm7563_vm1, %v999_v5, 0.0  ;;  %v1706_v5 = vadd.s32 4294967264, %v7590_v2  ;;  %v985_v0 = vmul.f32 %v5192_v46, %v850_v1  ;;  %v5573_v46 = vld [vmem:[#allocation18] ss:$0 sm:$0xff] }
 0x23d   : > { %v735_v1 = vadd.f32 %v4020_v22, %v5440_v36  ;;  %v956_v29 = vmul.f32 %v5573_v46, %v821_v58  ;;  %v5588_v22 = vsub.s32 %v1713_v43, %v5153_v15  ;;  %v5598_v58 = vsub.s32 %v1734_v41, %v5153_v15 }
 0x23e   : > { %v5581_v60 = vsub.s32 %v1706_v5, %v5153_v15  ;;  %v721_v41 = vadd.f32 %v3992_v47, %v5427_v13  ;;  %v1720_v47 = vadd.s32 4294967248, %v7590_v2  ;;  %v957_v44 = vmul.f32 %v5573_v46, %v822_v12 }
 0x23f   : > { %v863_v61 = vmax.f32 %v735_v1, 0.0 }
 0x240   : > { %1261 = vadd.xlane.f32.xlu1 %v1260_v59  ;;  %1324 = vadd.xlane.f32.xlu0 %v1323_v62  ;;  %v818_v59 = vmax.f32 %v690_v28, 0.0  ;;  %v1173_v62 = vsel %vm7563_vm1, %v949_v40, 0.0  ;;  %v848_v28 = vmax.f32 %v720_v55, 0.0  ;;  %v1685_v40 = vadd.s32 4294967288, %v7590_v2 }
 0x241   : > { %v851_v55 = vmax.f32 %v723_v63, 0.0  ;;  %v998_v24 = vmul.f32 %v5573_v46, %v863_v61  ;;  %v954_v61 = vmul.f32 %v5573_v46, %v819_v35  ;;  %v849_v45 = vmax.f32 %v721_v41, 0.0 }
 0x242   : > { %v953_v8 = vmul.f32 %v5573_v46, %v818_v59  ;;  %v983_v39 = vmul.f32 %v5573_v46, %v848_v28  ;;  %v5595_v59 = vsub.s32 %v1685_v40, %v5153_v15  ;;  %v1699_v40 = vadd.s32 4294967272, %v7590_v2 }
 0x243   : > { %v986_v43 = vmul.f32 %v5573_v46, %v851_v55  ;;  %v1320_v41 = vsel %vm7563_vm1, %v998_v24, 0.0  ;;  %v984_v12 = vmul.f32 %v5573_v46, %v849_v45  ;;  %v1727_v24 = vadd.s32 4294967240, %v7590_v2 }
 0x244   : > { %1174 = vadd.xlane.f32.xlu1 %v1173_v62  ;;  %1192 = vadd.xlane.f32.xlu0 %v1191_v57  ;;  %v738_v57 = vadd.f32 %v4027_v25, %v5440_v36  ;;  %v1281_v62 = vsel %vm7563_vm1, %v985_v0, 0.0  ;;  %v1692_v25 = vadd.s32 4294967280, %v7590_v2  ;;  %v1185_v63 = vsel %vm7563_vm1, %v953_v8, 0.0 }
 0x245   : > { %v1275_v30 = vsel %vm7563_vm1, %v983_v39, 0.0  ;;  %v1284_v39 = vsel %vm7563_vm1, %v986_v43, 0.0  ;;  %v1197_v45 = vsel %vm7563_vm1, %v957_v44, 0.0 }
 0x246   : > { %v866_v28 = vmax.f32 %v738_v57, 0.0  ;;  %v5614_v8 = vsub.s32 %v1692_v25, %v5153_v15 }
 0x248   : > { %1273 = vadd.xlane.f32.xlu1 %v1272_v7  ;;  %1282 = vadd.xlane.f32.xlu0 %v1281_v62  ;;  %v1755_v7 = vadd.s32 4294967208, %v7590_v2  ;;  %v1194_v62 = vsel %vm7563_vm1, %v956_v29, 0.0  ;;  %v724_v29 = vadd.f32 %v3999_v48, %v5427_v13  ;;  %v1001_v25 = vmul.f32 %v5573_v46, %v866_v28 }
 0x249   : > { %v5592_v0 = vpop.xlane.xlu1 %1042  ;;  %v1031_v5 = vpop.xlane.xlu0 %1030  ;;  %v5629_v48 = vsub.s32 %v1699_v40, %v5153_v15 }
 0x24a   : > { %v1423_v1 = vadd.f32 %v5555_v16, %v1031_v5  ;;  %v852_v28 = vmax.f32 %v724_v29, 0.0  ;;  %v1329_v26 = vsel %vm7563_vm1, %v1001_v25, 0.0  ;;  %v1427_v25 = vadd.f32 %v5555_v16, %v5592_v0 }
 0x24b   : > { %v725_v0 = vadd.f32 %v4000_v53, %v5427_v13 }
 0x24c   : > { %1186 = vadd.xlane.f32.xlu1 %v1185_v63  ;;  %1195 = vadd.xlane.f32.xlu0 %v1194_v62  ;;  %v5626_v63 = vsub.s32 %v1755_v7, %v5153_v15  ;;  %v737_v62 = vadd.f32 %v4024_v49, %v5440_v36  ;;  %v695_v7 = vadd.f32 %v3940_v50, %v5398_v23  ;;  %v1769_v50 = vadd.s32 4294967192, %v7590_v2 }
 0x24d   : > { %v1046_v55 = vpop.xlane.xlu1 %1045  ;;  %v1034_v57 = vpop.xlane.xlu0 %1033  ;;  %v5645_v49 = vsub.s32 %v1762_v6, %v5153_v15 }
 0x24e   : > { %v1424_v5 = vadd.f32 %v5555_v16, %v1034_v57  ;;  %v1684_v57 = vrot.slane %v1423_v1, %v5565_v21  ;;  %v5648_v1 = vsub.s32 %v1720_v47, %v5153_v15  ;;  %v865_v6 = vmax.f32 %v737_v62, 0.0 }
 0x24f   : > { %v987_v47 = vmul.f32 %v5573_v46, %v852_v28  ;;  %v739_v62 = vadd.f32 %v4028_v52, %v5440_v36  ;;  %v5677_v44 = vsub.s32 %v1769_v50, %v5153_v15 }
 0x250   : > { %v1689_v43 = vrot.slane %v1424_v5, %v5595_v59  ;;  %1276 = vadd.xlane.f32.xlu1 %v1275_v30  ;;  %1285 = vadd.xlane.f32.xlu0 %v1284_v39  ;;  %v1188_v5 = vsel %vm7563_vm1, %v954_v61, 0.0  ;;  %v1000_v9 = vmul.f32 %v5573_v46, %v865_v6 }
 0x251   : > { %v5640_v40 = vpop.xlane.xlu1 %1054  ;;  %v1037_v35 = vpop.xlane.xlu0 %1036  ;;  %v867_v6 = vmax.f32 %v739_v62, 0.0 }
 0x252   : > { %v1691_v30 = vsel %vm1690_vm2, %v1689_v43, %v1684_v57  ;;  %v1425_v29 = vadd.f32 %v5555_v16, %v1037_v35  ;;  %v823_v57 = vmax.f32 %v695_v7, 0.0  ;;  %v1776_v43 = vadd.s32 4294967184, %v7590_v2 }
 0x254   : > { %v1696_v39 = vrot.slane %v1425_v29, %v5614_v8  ;;  %1321 = vadd.xlane.f32.xlu1 %v1320_v41  ;;  %1330 = vadd.xlane.f32.xlu0 %v1329_v26  ;;  %v1428_v41 = vadd.f32 %v5555_v16, %v1046_v55  ;;  %v1278_v29 = vsel %vm7563_vm1, %v984_v12, 0.0  ;;  %v5680_v26 = vsub.s32 %v1727_v24, %v5153_v15 }
 0x255   : > { %v5662_v35 = vpop.xlane.xlu1 %1063  ;;  %v1040_v61 = vpop.xlane.xlu0 %1039  ;;  %v1287_v55 = vsel %vm7563_vm1, %v987_v47, 0.0  ;;  %v958_v33 = vmul.f32 %v5573_v46, %v823_v57  ;;  %v5687_v53 = vsub.s32 %v1776_v43, %v5153_v15  ;;  %v5693_v24 = vsub.s32 %v1741_v11, %v5153_v15 }
 0x256   : > { %v1698_v28 = vsel %vm1697_vm3, %v1696_v39, %v1691_v30  ;;  %v1426_v7 = vadd.f32 %v5555_v16, %v1040_v61  ;;  %v1710_v30 = vrot.slane %v1427_v25, %v5581_v60  ;;  %v1717_v39 = vrot.slane %v1428_v41, %v5588_v22 }
 0x257   : > { %7598 = vst [vmem:[#allocation39_spill] sm:$0xff] %v5687_v53  ;;  %v853_v43 = vmax.f32 %v725_v0, 0.0  ;;  %v1326_v25 = vsel %vm7563_vm1, %v1000_v9, 0.0  ;;  %v740_v11 = vadd.f32 %v4031_v56, %v5440_v36  ;;  %v1431_v0 = vadd.f32 %v5555_v16, %v5640_v40 }
 0x258   : > { %v1703_v52 = vrot.slane %v1426_v7, %v5629_v48  ;;  %1189 = vadd.xlane.f32.xlu1 %v1188_v5  ;;  %1198 = vadd.xlane.f32.xlu0 %v1197_v45  ;;  %v1783_v5 = vadd.s32 4294967176, %v7590_v2  ;;  %v696_v45 = vadd.f32 %v3943_v10, %v5398_v23  ;;  %v741_v7 = vadd.f32 %v4032_v31, %v5440_v36 }
 0x259   : > { %v5690_v50 = vpop.xlane.xlu1 %1066  ;;  %v1049_v12 = vpop.xlane.xlu0 %1048  ;;  %v7599_v10 = vunpack.c.l.bf16 %v5507_v51  ;;  %v988_v31 = vmul.f32 %v5573_v46, %v853_v43  ;;  %v7601_v40 = vunpack.c.h.bf16 %v5505_v38  ;;  %v1738_v38 = vrot.slane %v1431_v0, %v5598_v58 }
 0x25a   : > { %v1705_v47 = vsel %vm1704_vm4, %v1703_v52, %v1698_v28  ;;  %v1429_v57 = vadd.f32 %v5555_v16, %v1049_v12  ;;  %v1748_v28 = vadd.s32 4294967216, %v7590_v2  ;;  %v1002_v52 = vmul.f32 %v5573_v46, %v867_v6 }
 0x25b   : > { %v1712_v61 = vsel %vm7548_vm5, %v1710_v30, %v1705_v47  ;;  %v726_v30 = vadd.f32 %v7599_v10, %v5427_v13  ;;  %v1200_v6 = vsel %vm7563_vm1, %v958_v33, 0.0  ;;  %v5730_v47 = vsub.s32 %v1783_v5, %v5153_v15 }
 0x25c   : > { %v1719_v62 = vsel %vm1718_vm6, %v1717_v39, %v1712_v61  ;;  %v1724_v41 = vrot.slane %v1429_v57, %v5648_v1  ;;  %1279 = vadd.xlane.f32.xlu1 %v1278_v29  ;;  %1288 = vadd.xlane.f32.xlu0 %v1287_v55  ;;  %v7600_v29 = vunpack.c.l.bf16 %v5511_v32  ;;  %v697_v39 = vadd.f32 %v7601_v40, %v5398_v23 }
 0x25d   : > { %v1070_v56 = vpop.xlane.xlu1 %1069  ;;  %v1052_v9 = vpop.xlane.xlu0 %1051  ;;  %7602 = vst [vmem:[#allocation40_spill] sm:$0xff] %v5730_v47  ;;  %v868_v57 = vmax.f32 %v740_v11, 0.0  ;;  %v824_v61 = vmax.f32 %v696_v45, 0.0  ;;  %v869_v43 = vmax.f32 %v741_v7, 0.0  ;;  %v1332_v33 = vsel %vm7563_vm1, %v1002_v52, 0.0 }
 0x25e   : > { %v742_v55 = vadd.f32 %v7600_v29, %v5440_v36  ;;  %v1726_v12 = vsel %vm1725_vm7, %v1724_v41, %v1719_v62  ;;  %v1430_v54 = vadd.f32 %v5555_v16, %v1052_v9  ;;  %v5734_v62 = vsub.s32 %v1748_v28, %v5153_v15 }
 0x25f   : > { %v854_v5 = vmax.f32 %v726_v30, 0.0  ;;  %v1003_v40 = vmul.f32 %v5573_v46, %v868_v57  ;;  %v959_v7 = vmul.f32 %v5573_v46, %v824_v61  ;;  %v7603_v0 = vunpack.c.h.bf16 %v5511_v32 }
 0x260   : > { %v1731_v10 = vrot.slane %v1430_v54, %v5680_v26  ;;  %1327 = vadd.xlane.f32.xlu1 %v1326_v25  ;;  %1201 = vadd.xlane.f32.xlu0 %v1200_v6  ;;  %v870_v29 = vmax.f32 %v742_v55, 0.0  ;;  %v1290_v25 = vsel %vm7563_vm1, %v988_v31, 0.0  ;;  %v825_v54 = vmax.f32 %v697_v39, 0.0 }
 0x261   : > { %v1073_v41 = vpop.xlane.xlu1 %1072  ;;  %v1058_v9 = vpop.xlane.xlu0 %1057  ;;  %v743_v6 = vadd.f32 %v7603_v0, %v5440_v36  ;;  %v1004_v30 = vmul.f32 %v5573_v46, %v869_v43  ;;  %v7604_v55 = vunpack.c.h.bf16 %v5507_v51  ;;  %v1434_v31 = vadd.f32 %v5555_v16, %v5662_v35 }
 0x262   : > { %v1733_v11 = vsel %vm1732_vm8, %v1731_v10, %v1726_v12  ;;  %v1432_v45 = vadd.f32 %v5555_v16, %v1058_v9  ;;  %v989_v32 = vmul.f32 %v5573_v46, %v854_v5  ;;  %v1005_v61 = vmul.f32 %v5573_v46, %v870_v29 }
 0x263   : > { %v1740_v28 = vsel %vm1739_vm9, %v1738_v38, %v1733_v11  ;;  %v727_v12 = vadd.f32 %v7604_v55, %v5427_v13  ;;  %v1435_v10 = vadd.f32 %v5555_v16, %v5690_v50  ;;  %v960_v51 = vmul.f32 %v5573_v46, %v825_v54 }
 0x264   : > { %v1745_v52 = vrot.slane %v1432_v45, %v5693_v24  ;;  %1333 = vadd.xlane.f32.xlu1 %v1332_v33  ;;  %1291 = vadd.xlane.f32.xlu0 %v1290_v25  ;;  %v1436_v9 = vadd.f32 %v5555_v16, %v1070_v56  ;;  %v1335_v35 = vsel %vm7563_vm1, %v1003_v40, 0.0  ;;  %v1203_v33 = vsel %vm7563_vm1, %v959_v7, 0.0 }
 0x265   : > { %v1076_v39 = vpop.xlane.xlu1 %1075  ;;  %v1061_v57 = vpop.xlane.xlu0 %1060  ;;  %v871_v11 = vmax.f32 %v743_v6, 0.0  ;;  %v1437_v5 = vadd.f32 %v5555_v16, %v1073_v41  ;;  %v1338_v50 = vsel %vm7563_vm1, %v1004_v30, 0.0  ;;  %v855_v45 = vmax.f32 %v727_v12, 0.0 }
 0x266   : > { %v1747_v38 = vsel %vm1746_vm10, %v1745_v52, %v1740_v28  ;;  %v1433_v43 = vadd.f32 %v5555_v16, %v1061_v57  ;;  %v1759_v25 = vrot.slane %v1434_v31, %v5626_v63  ;;  %v1438_v54 = vadd.f32 %v5555_v16, %v1076_v39 }
 0x267   : > { %v1293_v40 = vsel %vm7563_vm1, %v989_v32, 0.0  ;;  %v1341_v7 = vsel %vm7563_vm1, %v1005_v61, 0.0  ;;  %v1766_v41 = vrot.slane %v1435_v10, %v5645_v49  ;;  %v7605_v6 = vunpack.c.l.bf16 %v5525_v34 }
 0x268   : > { %v1752_v29 = vrot.slane %v1433_v43, %v5734_v62  ;;  %1336 = vadd.xlane.f32.xlu1 %v1335_v35  ;;  %1204 = vadd.xlane.f32.xlu0 %v1203_v33  ;;  %v7606_v30 = vunpack.c.l.bf16 %v5527_v37  ;;  %v1773_v12 = vrot.slane %v1436_v9, %v5677_v44  ;;  %v7607_v39 = vunpack.c.l.bf16 %v5532_v42 }
 0x269   : > { %v1127_v28 = vpop.xlane.xlu0 %1126  ;;  %v5769_v56 = vpop.xlane.xlu1 %1078  ;;  %v744_v52 = vadd.f32 %v7605_v6, %v5440_v36  ;;  %v1780_v32 = vrot.slane %v1437_v5, %v5687_v53  ;;  %v1206_v10 = vsel %vm7563_vm1, %v960_v51, 0.0  ;;  %v1006_v33 = vmul.f32 %v5573_v46, %v871_v11  ;;  %v5795_v5 = vld [vmem:[#allocation6 + $0xf8] sm:$0xff]   ;;  %v5806_v6 = vld [vmem:[#allocation6 + $0x1e8] sm:$0xff]  }
 0x26a   : > { %v1754_v0 = vsel %vm1753_vm11, %v1752_v29, %v1747_v38  ;;  %v698_v55 = vadd.f32 %v7606_v30, %v5398_v23  ;;  %v728_v57 = vadd.f32 %v7607_v39, %v5427_v13  ;;  %v1787_v38 = vrot.slane %v1438_v54, %v5730_v47  ;;  %v5808_v11 = vld [vmem:[#allocation6 + $0x178] sm:$0xff]  }
 0x26b   : > { %v1761_v31 = vsel %vm1760_vm12, %v1759_v25, %v1754_v0  ;;  %v7608_v29 = vunpack.c.l.bf16 %v5543_v14  ;;  %v7609_v51 = vunpack.c.h.bf16 %v5527_v37  ;;  %v3952_v37 = vunpack.c.h.bf16 %v5795_v5 }
 0x26c   : > { %v1768_v61 = vsel %vm1767_vm13, %v1766_v41, %v1761_v31  ;;  %1339 = vadd.xlane.f32.xlu1 %v1338_v50  ;;  %1294 = vadd.xlane.f32.xlu0 %v1293_v40  ;;  %v5797_v41 = vld [vmem:[#allocation6 + $0x170] sm:$0xff]   ;;  %v990_v50 = vmul.f32 %v5573_v46, %v855_v45  ;;  %v7610_v40 = vunpack.c.h.bf16 %v5525_v34  ;;  %v826_v31 = vmax.f32 %v698_v55, 0.0 }
 0x26d   : > { %v1775_v43 = vsel %vm1774_vm14, %v1773_v12, %v1768_v61  ;;  %v1133_v9 = vpop.xlane.xlu0 %1132  ;;  %v1082_v35 = vpop.xlane.xlu1 %1081  ;;  %v750_v25 = vadd.f32 %v7608_v29, %v5559_v19  ;;  %v699_v54 = vadd.f32 %v7609_v51, %v5398_v23  ;;  %v872_v12 = vmax.f32 %v744_v52, 0.0 }
 0x26e   : > { %v745_v0 = vadd.f32 %v7610_v40, %v5440_v36  ;;  %v1782_v30 = vsel %vm1781_vm15, %v1780_v32, %v1775_v43  ;;  %v856_v39 = vmax.f32 %v728_v57, 0.0  ;;  %v3951_v45 = vunpack.c.l.bf16 %v5795_v5 }
 0x26f   : > { %v5812_v61 = vsel %vm1788_vm0, %v1787_v38, %v1782_v30  ;;  %v4012_v34 = vunpack.c.h.bf16 %v5797_v41  ;;  %v878_v40 = vmax.f32 %v750_v25, 0.0  ;;  %v4011_v3 = vunpack.c.l.bf16 %v5797_v41  ;;  %v5822_v38 = vld [vmem:[#allocation6 + $0x1c8] sm:$0xff]  }
 0x270   : > { %1342 = vadd.xlane.f32.xlu1 %v1341_v7  ;;  %1207 = vadd.xlane.f32.xlu0 %v1206_v10  ;;  %v4072_v52 = vunpack.c.h.bf16 %v5806_v6  ;;  %v1344_v57 = vsel %vm7563_vm1, %v1006_v33, 0.0  ;;  %v1296_v7 = vsel %vm7563_vm1, %v990_v50, 0.0  ;;  %v827_v32 = vmax.f32 %v699_v54, 0.0 }
 0x271   : > { %v1091_v29 = vpop.xlane.xlu0 %1090  ;;  %v1085_v51 = vpop.xlane.xlu1 %1084  ;;  %v873_v10 = vmax.f32 %v745_v0, 0.0  ;;  %v1007_v43 = vmul.f32 %v5573_v46, %v872_v12  ;;  %v961_v5 = vmul.f32 %v5573_v46, %v826_v31  ;;  %v991_v25 = vmul.f32 %v5573_v46, %v856_v39 }
 0x272   : > { %v7611_v41 = vunpack.c.h.bf16 %v5532_v42  ;;  %v1455_v55 = vadd.f32 %v5555_v16, %v1127_v28  ;;  %v1440_v33 = vadd.f32 %v5555_v16, %v1082_v35  ;;  %v701_v50 = vadd.f32 %v3952_v37, %v5398_v23 }
 0x273   : > { %v4052_v54 = vunpack.c.h.bf16 %v5543_v14  ;;  %v1457_v0 = vadd.f32 %v5555_v16, %v1133_v9  ;;  %v1441_v12 = vadd.f32 %v5555_v16, %v1085_v51  ;;  %v1013_v42 = vmul.f32 %v5573_v46, %v878_v40 }
 0x274   : > { %v729_v30 = vadd.f32 %v7611_v41, %v5427_v13  ;;  %1345 = vadd.xlane.f32.xlu1 %v1344_v57  ;;  %1297 = vadd.xlane.f32.xlu0 %v1296_v7  ;;  %v1439_v28 = vadd.f32 %v5555_v16, %v5769_v56  ;;  %v962_v37 = vmul.f32 %v5573_v46, %v827_v32  ;;  %v1347_v9 = vsel %vm7563_vm1, %v1007_v43, 0.0 }
 0x275   : > { %v1130_v31 = vpop.xlane.xlu1 %1129  ;;  %v5836_v39 = vpop.xlane.xlu0 %1225  ;;  %v1008_v14 = vmul.f32 %v5573_v46, %v873_v10  ;;  %v1209_v51 = vsel %vm7563_vm1, %v961_v5, 0.0  ;;  %v1299_v57 = vsel %vm7563_vm1, %v991_v25, 0.0  ;;  %v1872_v40 = vrot.slane %v1455_v55, %v5565_v21 }
 0x276   : > { %v1456_v35 = vadd.f32 %v5555_v16, %v1130_v31  ;;  %v857_v7 = vmax.f32 %v729_v30, 0.0  ;;  %v1797_v41 = vrot.slane %v1440_v33, %v5595_v59  ;;  %v829_v56 = vmax.f32 %v701_v50, 0.0 }
 0x277   : > { %v1881_v32 = vrot.slane %v1457_v0, %v5614_v8  ;;  %v1443_v10 = vadd.f32 %v5555_v16, %v1091_v29  ;;  %v1802_v43 = vrot.slane %v1441_v12, %v5614_v8  ;;  %v1365_v25 = vsel %vm7563_vm1, %v1013_v42, 0.0 }
 0x278   : > { %v1876_v4 = vrot.slane %v1456_v35, %v5595_v59  ;;  %1348 = vadd.xlane.f32.xlu1 %v1347_v9  ;;  %1210 = vadd.xlane.f32.xlu0 %v1209_v51  ;;  %v1793_v30 = vrot.slane %v1439_v28, %v5565_v21  ;;  %v700_v0 = vadd.f32 %v3951_v45, %v5398_v23  ;;  %v1350_v45 = vsel %vm7563_vm1, %v1008_v14, 0.0 }
 0x279   : > { %v1088_v31 = vpop.xlane.xlu1 %1087  ;;  %v1094_v5 = vpop.xlane.xlu0 %1093  ;;  %v731_v29 = vadd.f32 %v4012_v34, %v5427_v13  ;;  %v730_v12 = vadd.f32 %v4011_v3, %v5427_v13  ;;  %v761_v28 = vadd.f32 %v4072_v52, %v5559_v19  ;;  %v1812_v51 = vrot.slane %v1443_v10, %v5581_v60  ;;  %v5873_v34 = vld [vmem:[#allocation6 + $0x1f0] sm:$0xff]  }
 0x27a   : > { %v1877_v55 = vsel %vm1690_vm2, %v1876_v4, %v1872_v40  ;;  %v1442_v33 = vadd.f32 %v5555_v16, %v1088_v31  ;;  %v1444_v35 = vadd.f32 %v5555_v16, %v1094_v5  ;;  %v1798_v9 = vsel %vm1690_vm2, %v1797_v41, %v1793_v30  ;;  %v5881_v31 = vld [vmem:[#allocation6 + $0x1b8] sm:$0xff]  }
 0x27b   : > { %v5860_v50 = vsel %vm1697_vm3, %v1881_v32, %v1877_v55  ;;  %v1212_v4 = vsel %vm7563_vm1, %v962_v37, 0.0  ;;  %v1803_v40 = vsel %vm1697_vm3, %v1802_v43, %v1798_v9  ;;  %v992_v3 = vmul.f32 %v5573_v46, %v857_v7 }
 0x27c   : > { %v1807_v42 = vrot.slane %v1442_v33, %v5629_v48  ;;  %1300 = vadd.xlane.f32.xlu0 %v1299_v57  ;;  %1366 = vadd.xlane.f32.xlu1 %v1365_v25  ;;  %v1817_v57 = vrot.slane %v1444_v35, %v5588_v22  ;;  %v751_v37 = vadd.f32 %v4052_v54, %v5559_v19  ;;  %v7612_v52 = vunpack.c.l.bf16 %v5808_v11  ;;  %v5885_v25 = vld [vmem:[#allocation6 + $0x1d0] sm:$0xff]  }
 0x27d   : > { %v1136_v32 = vpop.xlane.xlu1 %1135  ;;  %v1142_v23 = vpop.xlane.xlu0 %1141  ;;  %v964_v14 = vmul.f32 %v5573_v46, %v829_v56  ;;  %v828_v5 = vmax.f32 %v700_v0, 0.0  ;;  %v859_v7 = vmax.f32 %v731_v29, 0.0  ;;  %v858_v54 = vmax.f32 %v730_v12, 0.0  ;;  %v5897_v12 = vld [vmem:[#allocation6 + $0x1f8] sm:$0xff]  }
 0x27e   : > { %v1808_v41 = vsel %vm1704_vm4, %v1807_v42, %v1803_v40  ;;  %v732_v10 = vadd.f32 %v7612_v52, %v5427_v13  ;;  %v889_v55 = vmax.f32 %v761_v28, 0.0  ;;  %v4075_v33 = vunpack.c.l.bf16 %v5873_v34 }
 0x27f   : > { %v1813_v43 = vsel %vm7548_vm5, %v1812_v51, %v1808_v41  ;;  %v1458_v35 = vadd.f32 %v5555_v16, %v1136_v32  ;;  %v4056_v51 = vunpack.c.h.bf16 %v5822_v38  ;;  %v4047_v56 = vunpack.c.l.bf16 %v5881_v31 }
 0x280   : > { %v5888_v30 = vsel %vm1718_vm6, %v1817_v57, %v1813_v43  ;;  %1213 = vadd.xlane.f32.xlu0 %v1212_v4  ;;  %1351 = vadd.xlane.f32.xlu1 %v1350_v45  ;;  %v1302_v29 = vsel %vm7563_vm1, %v992_v3, 0.0  ;;  %v879_v40 = vmax.f32 %v751_v37, 0.0  ;;  %v860_v41 = vmax.f32 %v732_v10, 0.0 }
 0x281   : > { %v1232_v9 = vpop.xlane.xlu0 %1231  ;;  %v1223_v42 = vpop.xlane.xlu1 %1222  ;;  %v4059_v4 = vunpack.c.l.bf16 %v5885_v25  ;;  %v1218_v28 = vsel %vm7563_vm1, %v964_v14, 0.0  ;;  %v963_v32 = vmul.f32 %v5573_v46, %v828_v5  ;;  %v994_v45 = vmul.f32 %v5573_v46, %v859_v7 }
 0x282   : > { %v7613_v57 = vunpack.c.l.bf16 %v5822_v38  ;;  %v993_v3 = vmul.f32 %v5573_v46, %v858_v54  ;;  %v1024_v37 = vmul.f32 %v5573_v46, %v889_v55  ;;  %v762_v10 = vadd.f32 %v4075_v33, %v5559_v19 }
 0x283   : > { %v4060_v43 = vunpack.c.h.bf16 %v5885_v25  ;;  %v1886_v14 = vrot.slane %v1458_v35, %v5629_v48  ;;  %v1460_v5 = vadd.f32 %v5555_v16, %v1142_v23  ;;  %v1487_v7 = vadd.f32 %v5555_v16, %v1223_v42 }
 0x284   : > { %v752_v52 = vadd.f32 %v7613_v57, %v5559_v19  ;;  %1303 = vadd.xlane.f32.xlu0 %v1302_v29  ;;  %1219 = vadd.xlane.f32.xlu1 %v1218_v28  ;;  %v4080_v38 = vunpack.c.h.bf16 %v5897_v12  ;;  %v1014_v55 = vmul.f32 %v5573_v46, %v879_v40  ;;  %v995_v33 = vmul.f32 %v5573_v46, %v860_v41 }
 0x285   : > { %v1145_v0 = vpop.xlane.xlu0 %1144  ;;  %v1139_v20 = vpop.xlane.xlu1 %1138  ;;  %v1488_v25 = vadd.f32 %v5555_v16, %v5836_v39  ;;  %v1215_v35 = vsel %vm7563_vm1, %v963_v32, 0.0  ;;  %v1308_v23 = vsel %vm7563_vm1, %v994_v45, 0.0  ;;  %v890_v57 = vmax.f32 %v762_v10, 0.0 }
 0x286   : > { %v1461_v29 = vadd.f32 %v5555_v16, %v1145_v0  ;;  %v1459_v54 = vadd.f32 %v5555_v16, %v1139_v20  ;;  %v880_v42 = vmax.f32 %v752_v52, 0.0  ;;  %v1305_v0 = vsel %vm7563_vm1, %v993_v3, 0.0 }
 0x287   : > { %v1398_v20 = vsel %vm7563_vm1, %v1024_v37, 0.0  ;;  %v1887_v40 = vsel %vm1704_vm4, %v1886_v14, %v5860_v50  ;;  %v1896_v41 = vrot.slane %v1460_v5, %v5588_v22  ;;  %v1490_v39 = vadd.f32 %v5555_v16, %v1232_v9 }
 0x288   : > { %v1891_v28 = vrot.slane %v1459_v54, %v5581_v60  ;;  %1216 = vadd.xlane.f32.xlu0 %v1215_v35  ;;  %1309 = vadd.xlane.f32.xlu1 %v1308_v23  ;;  %v2030_v32 = vrot.slane %v1487_v7, %v5565_v21  ;;  %v1901_v54 = vrot.slane %v1461_v29, %v5648_v1  ;;  %v1368_v7 = vsel %vm7563_vm1, %v1014_v55, 0.0 }
 0x289   : > { %v1235_v45 = vpop.xlane.xlu0 %1234  ;;  %v1229_v52 = vpop.xlane.xlu1 %1228  ;;  %v2034_v10 = vrot.slane %v1488_v25, %v5595_v59  ;;  %v753_v14 = vadd.f32 %v4056_v51, %v5559_v19  ;;  %v748_v9 = vadd.f32 %v4047_v56, %v5440_v36  ;;  %v1311_v29 = vsel %vm7563_vm1, %v995_v33, 0.0 }
 0x28a   : > { %v1892_v35 = vsel %vm7548_vm5, %v1891_v28, %v1887_v40  ;;  %v1491_v3 = vadd.f32 %v5555_v16, %v1235_v45  ;;  %v1489_v37 = vadd.f32 %v5555_v16, %v1229_v52  ;;  %v2044_v28 = vrot.slane %v1490_v39, %v5629_v48  ;;  %v4395_v45 = vld [vmem:[#allocation6 + $0x1d8] sm:$0xff]  }
 0x28b   : > { %v1897_v50 = vsel %vm1718_vm6, %v1896_v41, %v1892_v35  ;;  %v2035_v25 = vsel %vm1690_vm2, %v2034_v10, %v2030_v32  ;;  %v1015_v51 = vmul.f32 %v5573_v46, %v880_v42  ;;  %v754_v56 = vadd.f32 %v4059_v4, %v5559_v19 }
 0x28c   : > { %v2039_v5 = vrot.slane %v1489_v37, %v5614_v8  ;;  %1306 = vadd.xlane.f32.xlu0 %v1305_v0  ;;  %1399 = vadd.xlane.f32.xlu1 %v1398_v20  ;;  %v5941_v23 = vsel %vm1725_vm7, %v1901_v54, %v1897_v50  ;;  %v2049_v0 = vrot.slane %v1491_v3, %v5581_v60  ;;  %v881_v39 = vmax.f32 %v753_v14, 0.0 }
 0x28d   : > { %v1103_v40 = vpop.xlane.xlu0 %1102  ;;  %v1097_v41 = vpop.xlane.xlu1 %1096  ;;  %v1025_v33 = vmul.f32 %v5573_v46, %v890_v57  ;;  %v876_v54 = vmax.f32 %v748_v9, 0.0  ;;  %v7614_v32 = vunpack.c.h.bf16 %v5881_v31  ;;  %v755_v42 = vadd.f32 %v4060_v43, %v5559_v19 }
 0x28e   : > { %v2040_v20 = vsel %vm1697_vm3, %v2039_v5, %v2035_v25  ;;  %v1445_v55 = vadd.f32 %v5555_v16, %v1097_v41  ;;  %v765_v3 = vadd.f32 %v4080_v38, %v5559_v19  ;;  %v1447_v57 = vadd.f32 %v5555_v16, %v1103_v40 }
 0x28f   : > { %v2045_v52 = vsel %vm1704_vm4, %v2044_v28, %v2040_v20  ;;  %v749_v35 = vadd.f32 %v7614_v32, %v5440_v36  ;;  %v882_v14 = vmax.f32 %v754_v56, 0.0  ;;  %v4063_v9 = vunpack.c.l.bf16 %v4395_v45 }
 0x290   : > { %1369 = vadd.xlane.f32.xlu0 %v1368_v7  ;;  %1312 = vadd.xlane.f32.xlu1 %v1311_v29  ;;  %v5956_v4 = vsel %vm7548_vm5, %v2049_v0, %v2045_v52  ;;  %v1822_v37 = vrot.slane %v1445_v55, %v5648_v1  ;;  %v1371_v7 = vsel %vm7563_vm1, %v1015_v51, 0.0  ;;  %v1401_v29 = vsel %vm7563_vm1, %v1025_v33, 0.0 }
 0x291   : > { %v1106_v10 = vpop.xlane.xlu0 %1105  ;;  %v1100_v50 = vpop.xlane.xlu1 %1099  ;;  %v1016_v43 = vmul.f32 %v5573_v46, %v881_v39  ;;  %v1011_v38 = vmul.f32 %v5573_v46, %v876_v54  ;;  %v877_v28 = vmax.f32 %v749_v35, 0.0  ;;  %v883_v40 = vmax.f32 %v755_v42, 0.0 }
 0x292   : > { %v1448_v31 = vadd.f32 %v5555_v16, %v1106_v10  ;;  %v1446_v5 = vadd.f32 %v5555_v16, %v1100_v50  ;;  %v893_v41 = vmax.f32 %v765_v3, 0.0  ;;  %v4064_v56 = vunpack.c.h.bf16 %v4395_v45  ;;  %v4396_v45 = vld [vmem:[#allocation6 + $0x1e0] sm:$0xff]  }
 0x293   : > { %v1832_v0 = vrot.slane %v1447_v57, %v5598_v58  ;;  %v1823_v20 = vsel %vm1725_vm7, %v1822_v37, %v5888_v30  ;;  %v1017_v33 = vmul.f32 %v5573_v46, %v882_v14  ;;  %v756_v52 = vadd.f32 %v4063_v9, %v5559_v19 }
 0x294   : > { %v1827_v25 = vrot.slane %v1446_v5, %v5680_v26  ;;  %1372 = vadd.xlane.f32.xlu0 %v1371_v7  ;;  %1402 = vadd.xlane.f32.xlu1 %v1401_v29  ;;  %v1837_v39 = vrot.slane %v1448_v31, %v5693_v24  ;;  %v1374_v3 = vsel %vm7563_vm1, %v1016_v43, 0.0  ;;  %v1359_v30 = vsel %vm7563_vm1, %v1011_v38, 0.0 }
 0x295   : > { %v1151_v51 = vpop.xlane.xlu0 %1150  ;;  %v1148_v55 = vpop.xlane.xlu1 %1147  ;;  %v1012_v57 = vmul.f32 %v5573_v46, %v877_v28  ;;  %v757_v31 = vadd.f32 %v4064_v56, %v5559_v19  ;;  %v4067_v5 = vunpack.c.l.bf16 %v4396_v45  ;;  %v1018_v43 = vmul.f32 %v5573_v46, %v883_v40 }
 0x296   : > { %v1828_v54 = vsel %vm1732_vm8, %v1827_v25, %v1823_v20  ;;  %v1463_v32 = vadd.f32 %v5555_v16, %v1151_v51  ;;  %v1462_v35 = vadd.f32 %v5555_v16, %v1148_v55  ;;  %v1028_v38 = vmul.f32 %v5573_v46, %v893_v41 }
 0x297   : > { %v1833_v42 = vsel %vm1739_vm9, %v1832_v0, %v1828_v54  ;;  %v1377_v28 = vsel %vm7563_vm1, %v1017_v33, 0.0  ;;  %v1362_v25 = vsel %vm7563_vm1, %v1012_v57, 0.0  ;;  %v884_v20 = vmax.f32 %v756_v52, 0.0 }
 0x298   : > { %v1911_v37 = vrot.slane %v1463_v32, %v5598_v58  ;;  %v1906_v10 = vrot.slane %v1462_v35, %v5680_v26  ;;  %1375 = vadd.xlane.f32.xlu0 %v1374_v3  ;;  %1360 = vadd.xlane.f32.xlu1 %v1359_v30  ;;  %v1838_v50 = vsel %vm1746_vm10, %v1837_v39, %v1833_v42  ;;  %v1380_v41 = vsel %vm7563_vm1, %v1018_v43, 0.0  ;;  %v4390_v43 = vld [vmem:[#allocation6 + $0x1b0] sm:$0xff]  }
 0x299   : > { %v1109_v14 = vpop.xlane.xlu0 %1108  ;;  %v5985_v9 = vpop.xlane.xlu1 %1237  ;;  %v885_v55 = vmax.f32 %v757_v31, 0.0  ;;  %v1410_v33 = vsel %vm7563_vm1, %v1028_v38, 0.0  ;;  %v1019_v39 = vmul.f32 %v5573_v46, %v884_v20  ;;  %v758_v54 = vadd.f32 %v4067_v5, %v5559_v19 }
 0x29a   : > { %v1907_v7 = vsel %vm1732_vm8, %v1906_v10, %v5941_v23  ;;  %v1449_v29 = vadd.f32 %v5555_v16, %v1109_v14  ;;  %v4068_v52 = vunpack.c.h.bf16 %v4396_v45  ;;  %v4375_v10 = vld [vmem:[#allocation6 + $0x138] sm:$0xff]   ;;  %vm7549_vm5 = vcmask 1041409  }
 0x29b   : > { %v5996_v0 = vsel %vm1739_vm9, %v1911_v37, %v1907_v7  ;;  %v1020_v42 = vmul.f32 %v5573_v46, %v885_v55  ;;  %v1383_v3 = vsel %vm7563_vm1, %v1019_v39, 0.0  ;;  %v886_v30 = vmax.f32 %v758_v54, 0.0 }
 0x29c   : > { %v1842_v56 = vrot.slane %v1449_v29, %v5734_v62  ;;  %1378 = vadd.xlane.f32.xlu0 %v1377_v28  ;;  %1363 = vadd.xlane.f32.xlu1 %v1362_v25  ;;  %v759_v57 = vadd.f32 %v4068_v52, %v5559_v19  ;;  %v4071_v37 = vunpack.c.l.bf16 %v5806_v6  ;;  %v3983_v29 = vunpack.c.l.bf16 %v4375_v10 }
 0x29d   : > { %v5999_v51 = vpop.xlane.xlu0 %1153  ;;  %v6001_v23 = vpop.xlane.xlu1 %1240  ;;  %v1386_v45 = vsel %vm7563_vm1, %v1020_v42, 0.0  ;;  %v1021_v31 = vmul.f32 %v5573_v46, %v886_v30  ;;  %v4043_v25 = vunpack.c.l.bf16 %v4390_v43  ;;  %v3984_v52 = vunpack.c.h.bf16 %v4375_v10 }
 0x29e   : > { %v1843_v40 = vsel %vm1753_vm11, %v1842_v56, %v1838_v50  ;;  %v887_v5 = vmax.f32 %v759_v57, 0.0  ;;  %v760_v7 = vadd.f32 %v4071_v37, %v5559_v19 }
 0x29f   : > { %v1389_v6 = vsel %vm7563_vm1, %v1021_v31, 0.0  ;;  %v746_v54 = vadd.f32 %v4043_v25, %v5440_v36 }
 0x2a0   : > { %1381 = vadd.xlane.f32.xlu0 %v1380_v41  ;;  %1411 = vadd.xlane.f32.xlu1 %v1410_v33  ;;  %v1022_v20 = vmul.f32 %v5573_v46, %v887_v5  ;;  %v888_v56 = vmax.f32 %v760_v7, 0.0  ;;  %v716_v41 = vadd.f32 %v3983_v29, %v5273_v17  ;;  %v4044_v29 = vunpack.c.h.bf16 %v4390_v43 }
 0x2a1   : > { %v6008_v32 = vpop.xlane.xlu0 %1243  ;;  %v6010_v35 = vpop.xlane.xlu1 %1156 }
 0x2a2   : > { %v1023_v30 = vmul.f32 %v5573_v46, %v888_v56  ;;  %v844_v57 = vmax.f32 %v716_v41, 0.0  ;;  %v747_v43 = vadd.f32 %v4044_v29, %v5440_v36 }
 0x2a4   : > { %1384 = vadd.xlane.f32.xlu0 %v1383_v3  ;;  %v1392_v3 = vsel %vm7563_vm1, %v1022_v20, 0.0  ;;  %v979_v25 = vmul.f32 %v5573_v46, %v844_v57 }
 0x2a5   : > { %v1112_v50 = vpop.xlane.xlu0 %1111  ;;  %v6016_v14 = vpop.xlane.xlu1 %1246 }
 0x2a6   : > { %v1450_v39 = vadd.f32 %v5555_v16, %v1112_v50  ;;  %v717_v50 = vadd.f32 %v3984_v52, %v5273_v17  ;;  %v4016_v52 = vunpack.c.h.bf16 %v5808_v11  ;;  %v1263_v46 = vsel %vm7563_vm1, %v979_v25, 0.0 }
 0x2a8   : > { %1387 = vadd.xlane.f32.xlu0 %v1386_v45  ;;  %v1847_v5 = vrot.slane %v1450_v39, %v5626_v63 }
 0x2a9   : > { %v1115_v38 = vpop.xlane.xlu0 %1114  ;;  %v6021_v28 = vpop.xlane.xlu1 %1159 }
 0x2aa   : > { %v1451_v42 = vadd.f32 %v5555_v16, %v1115_v38  ;;  %v1395_v38 = vsel %vm7563_vm1, %v1023_v30, 0.0  ;;  %v1848_v39 = vsel %vm1760_vm12, %v1847_v5, %v1843_v40  ;;  %v845_v30 = vmax.f32 %v717_v50, 0.0 }
 0x2ab   : > { %v875_v5 = vmax.f32 %v747_v43, 0.0 }
 0x2ac   : > { %1390 = vadd.xlane.f32.xlu0 %v1389_v6  ;;  %v1852_v10 = vrot.slane %v1451_v42, %v5645_v49  ;;  %v874_v6 = vmax.f32 %v746_v54, 0.0  ;;  %v4549_v54 = vld [vmem:[#allocation18] ss:$0 sm:$0xff] }
 0x2ad   : > { %v1118_v55 = vpop.xlane.xlu0 %1117  ;;  %v6026_v33 = vpop.xlane.xlu1 %1249 }
 0x2ae   : > { %v1452_v37 = vadd.f32 %v5555_v16, %v1118_v55  ;;  %v1853_v42 = vsel %vm1767_vm13, %v1852_v10, %v1848_v39  ;;  %v980_v10 = vmul.f32 %v4549_v54, %v845_v30 }
 0x2b0   : > { %1393 = vadd.xlane.f32.xlu0 %v1392_v3  ;;  %v1857_v20 = vrot.slane %v1452_v37, %v5677_v44  ;;  %v1009_v3 = vmul.f32 %v4549_v54, %v874_v6 }
 0x2b1   : > { %v1121_v45 = vpop.xlane.xlu0 %1120  ;;  %v1163_v31 = vpop.xlane.xlu1 %1162 }
 0x2b2   : > { %v1453_v7 = vadd.f32 %v5555_v16, %v1121_v45  ;;  %v1858_v57 = vsel %vm1774_vm14, %v1857_v20, %v1853_v42  ;;  %v1353_v50 = vsel %vm7563_vm1, %v1009_v3, 0.0 }
 0x2b4   : > { %1396 = vadd.xlane.f32.xlu0 %v1395_v38  ;;  %v1862_v56 = vrot.slane %v1453_v7, %v5687_v53  ;;  %v733_v7 = vadd.f32 %v4016_v52, %v5427_v13  ;;  %v4076_v38 = vunpack.c.h.bf16 %v5873_v34  ;;  %v4079_v13 = vunpack.c.l.bf16 %v5897_v12 }
 0x2b5   : > { %v1124_v41 = vpop.xlane.xlu0 %1123  ;;  %v6042_v55 = vpop.xlane.xlu1 %1252  ;;  %v1465_v34 = vadd.f32 %v5555_v16, %v6010_v35  ;;  %v1466_v52 = vadd.f32 %v5555_v16, %v6021_v28 }
 0x2b6   : > { %v1454_v17 = vadd.f32 %v5555_v16, %v1124_v41  ;;  %v1863_v40 = vsel %vm1781_vm15, %v1862_v56, %v1858_v57  ;;  %v861_v20 = vmax.f32 %v733_v7, 0.0  ;;  %v1266_v56 = vsel %vm7563_vm1, %v980_v10, 0.0 }
 0x2b7   : > { %v1010_v41 = vmul.f32 %v4549_v54, %v875_v5  ;;  %v763_v39 = vadd.f32 %v4076_v38, %v5559_v19  ;;  %v764_v12 = vadd.f32 %v4079_v13, %v5559_v19  ;;  %v1921_v35 = vrot.slane %v1465_v34, %v5734_v62 }
 0x2b8   : > { %v1867_v37 = vrot.slane %v1454_v17, %v5730_v47  ;;  %1264 = vadd.xlane.f32.xlu0 %v1263_v46  ;;  %v996_v42 = vmul.f32 %v4549_v54, %v861_v20  ;;  %v1467_v46 = vadd.f32 %v5555_v16, %v1163_v31  ;;  %v1926_v31 = vrot.slane %v1466_v52, %v5626_v63 }
 0x2b9   : > { %v6053_v45 = vpop.xlane.xlu0 %1177  ;;  %v1166_v36 = vpop.xlane.xlu1 %1165  ;;  %v1356_v3 = vsel %vm7563_vm1, %v1010_v41, 0.0  ;;  %v891_v30 = vmax.f32 %v763_v39, 0.0  ;;  %v892_v7 = vmax.f32 %v764_v12, 0.0 }
 0x2ba   : > { %v1868_v11 = vsel %vm1788_vm0, %v1867_v37, %v1863_v40  ;;  %v1468_v57 = vadd.f32 %v5555_v16, %v1166_v36  ;;  %v1314_v5 = vsel %vm7563_vm1, %v996_v42, 0.0 }
 0x2bb   : > { %v2344_v29 = vsel %vm7549_vm5, %v1868_v11, %v5812_v61  ;;  %v1464_v61 = vadd.f32 %v5555_v16, %v5999_v51  ;;  %v1931_v11 = vrot.slane %v1467_v46, %v5645_v49  ;;  %v1026_v19 = vmul.f32 %v4549_v54, %v891_v30 }
 0x2bc   : > { %1354 = vadd.xlane.f32.xlu0 %v1353_v50  ;;  %v1936_v50 = vrot.slane %v1468_v57, %v5677_v44  ;;  %v1027_v34 = vmul.f32 %v4549_v54, %v892_v7  ;;  %vm7562_vm5 = vcmask 1042434  }
 0x2bd   : > { %v6061_v25 = vpop.xlane.xlu0 %1180  ;;  %v6063_v6 = vpop.xlane.xlu1 %1255  ;;  %v1916_v51 = vrot.slane %v1464_v61, %v5693_v24  ;;  %v1404_v61 = vsel %vm7563_vm1, %v1026_v19, 0.0 }
 0x2be   : > { %v1407_v12 = vsel %vm7563_vm1, %v1027_v34, 0.0  ;;  %vm2349_vm1 = vcmask 1044484  }
 0x2bf   : > { %v1917_v36 = vsel %vm1746_vm10, %v1916_v51, %v5996_v0 }
 0x2c0   : > { %1267 = vadd.xlane.f32.xlu0 %v1266_v56  ;;  %v1922_v10 = vsel %vm1753_vm11, %v1921_v35, %v1917_v36 }
 0x2c1   : > { %v6072_v17 = vpop.xlane.xlu0 %1183  ;;  %v1169_v43 = vpop.xlane.xlu1 %1168  ;;  %v1927_v41 = vsel %vm1760_vm12, %v1926_v31, %v1922_v10 }
 0x2c2   : > { %v1469_v37 = vadd.f32 %v5555_v16, %v1169_v43  ;;  %v1932_v13 = vsel %vm1767_vm13, %v1931_v11, %v1927_v41 }
 0x2c3   : > { %v1937_v0 = vsel %vm1774_vm14, %v1936_v50, %v1932_v13 }
 0x2c4   : > { %1357 = vadd.xlane.f32.xlu0 %v1356_v3  ;;  %v1941_v38 = vrot.slane %v1469_v37, %v5687_v53 }
 0x2c5   : > { %v6083_v40 = vpop.xlane.xlu1 %1258  ;;  %v6085_v28 = vpop.xlane.xlu0 %1270 }
 0x2c6   : > { %v1942_v52 = vsel %vm1781_vm15, %v1941_v38, %v1937_v0 }
 0x2c8   : > { %1315 = vadd.xlane.f32.xlu0 %v1314_v5 }
 0x2c9   : > { %v1172_v20 = vpop.xlane.xlu1 %1171  ;;  %v6095_v56 = vpop.xlane.xlu0 %1318 }
 0x2ca   : > { %v1470_v39 = vadd.f32 %v5555_v16, %v1172_v20 }
 0x2cc   : > { %v1946_v43 = vrot.slane %v1470_v39, %v5730_v47  ;;  %1405 = vadd.xlane.f32.xlu0 %v1404_v61 }
 0x2cd   : > { %v6104_v42 = vpop.xlane.xlu1 %1261  ;;  %v6106_v46 = vpop.xlane.xlu0 %1324 }
 0x2ce   : > { %v1947_v3 = vsel %vm1788_vm0, %v1946_v43, %v1942_v52 }
 0x2cf   : > { %v6110_v30 = vsel %vm7562_vm5, %v1947_v3, %v2344_v29  ;;  %vm7631_vm5 = vcmask 326912  }
 0x2d0   : > { %7615 = vst [vmem:[#allocation41_spill] sm:$0xff] %v6110_v30  ;;  %1408 = vadd.xlane.f32.xlu0 %v1407_v12 }
 0x2d1   : > { %v1175_v54 = vpop.xlane.xlu1 %1174  ;;  %v6113_v51 = vpop.xlane.xlu0 %1192 }
 0x2d5   : > { %v6115_v57 = vpop.xlane.xlu0 %1282  ;;  %v1274_v35 = vpop.xlane.xlu1 %1273 }
 0x2d9   : > { %v6117_v37 = vpop.xlane.xlu0 %1195  ;;  %v1187_v31 = vpop.xlane.xlu1 %1186 }
 0x2dd   : > { %v6119_v11 = vpop.xlane.xlu0 %1285  ;;  %v1277_v19 = vpop.xlane.xlu1 %1276 }
 0x2e1   : > { %v6121_v5 = vpop.xlane.xlu0 %1330  ;;  %v6125_v29 = vpop.xlane.xlu1 %1321 }
 0x2e5   : > { %v6123_v7 = vpop.xlane.xlu0 %1198  ;;  %v1190_v10 = vpop.xlane.xlu1 %1189 }
 0x2e9   : > { %v6127_v36 = vpop.xlane.xlu0 %1288  ;;  %v1280_v20 = vpop.xlane.xlu1 %1279 }
 0x2ed   : > { %v6129_v50 = vpop.xlane.xlu0 %1201  ;;  %v6137_v13 = vpop.xlane.xlu1 %1327 }
 0x2f1   : > { %v6131_v38 = vpop.xlane.xlu0 %1291  ;;  %v6141_v34 = vpop.xlane.xlu1 %1333 }
 0x2f5   : > { %v6133_v41 = vpop.xlane.xlu0 %1204  ;;  %v6147_v52 = vpop.xlane.xlu1 %1336 }
 0x2f9   : > { %v6135_v39 = vpop.xlane.xlu0 %1294  ;;  %v6151_v12 = vpop.xlane.xlu1 %1339 }
 0x2fd   : > { %v6139_v61 = vpop.xlane.xlu0 %1207  ;;  %v6157_v15 = vpop.xlane.xlu1 %1342 }
 0x2fe   : > { %7621 = vst [vmem:[#allocation47_spill] sm:$0xff] %v6157_v15 }
 0x301   : > { %v6143_v0 = vpop.xlane.xlu0 %1297  ;;  %v6161_v30 = vpop.xlane.xlu1 %1345 }
 0x302   : > { %7616 = vst [vmem:[#allocation42_spill] sm:$0xff] %v6143_v0 }
 0x305   : > { %v6145_v43 = vpop.xlane.xlu0 %1210  ;;  %v6167_v0 = vpop.xlane.xlu1 %1348 }
 0x306   : > { %7617 = vst [vmem:[#allocation43_spill] sm:$0xff] %v6145_v43  ;;  %7625 = vst [vmem:[#allocation51_spill] sm:$0xff] %v6167_v0 }
 0x309   : > { %v6149_v3 = vpop.xlane.xlu0 %1300 }
 0x30a   : > { %7618 = vst [vmem:[#allocation44_spill] sm:$0xff] %v6149_v3  ;;  %v1492_v3 = vadd.f32 %v5555_v16, %v5985_v9  ;;  %v1472_v9 = vadd.f32 %v5555_v16, %v6053_v45 }
 0x30d   : > { %v6153_v18 = vpop.xlane.xlu0 %1213 }
 0x30e   : > { %7619 = vst [vmem:[#allocation45_spill] sm:$0xff] %v6153_v18  ;;  %v6175_v18 = vpop.xlane.xlu1 %1366 }
 0x30f   : > { %7627 = vst [vmem:[#allocation53_spill] sm:$0xff] %v6175_v18 }
 0x311   : > { %v6155_v27 = vpop.xlane.xlu0 %1303 }
 0x312   : > { %7620 = vst [vmem:[#allocation46_spill] sm:$0xff] %v6155_v27  ;;  %v1493_v27 = vadd.f32 %v5555_v16, %v6001_v23  ;;  %v1496_v23 = vadd.f32 %v5555_v16, %v6026_v33 }
 0x314   : > { %v2059_v0 = vrot.slane %v1493_v27, %v5648_v1  ;;  %v1955_v27 = vrot.slane %v1472_v9, %v5595_v59 }
 0x315   : > { %v6159_v2 = vpop.xlane.xlu0 %1216 }
 0x316   : > { %7622 = vst [vmem:[#allocation48_spill] sm:$0xff] %v6159_v2  ;;  %v1471_v2 = vadd.f32 %v5555_v16, %v1175_v54 }
 0x318   : > { %v1951_v54 = vrot.slane %v1471_v2, %v5565_v21  ;;  %v2074_v2 = vrot.slane %v1496_v23, %v5693_v24 }
 0x319   : > { %v6163_v47 = vpop.xlane.xlu0 %1306 }
 0x31a   : > { %7623 = vst [vmem:[#allocation49_spill] sm:$0xff] %v6163_v47  ;;  %v1494_v47 = vadd.f32 %v5555_v16, %v6008_v32  ;;  %v1473_v32 = vadd.f32 %v5555_v16, %v6061_v25  ;;  %v1474_v25 = vadd.f32 %v5555_v16, %v6072_v17  ;;  %v1506_v17 = vadd.f32 %v5555_v16, %v1280_v20 }
 0x31c   : > { %v1960_v9 = vrot.slane %v1473_v32, %v5614_v8 }
 0x31d   : > { %v6165_v53 = vpop.xlane.xlu0 %1369 }
 0x31e   : > { %7624 = vst [vmem:[#allocation50_spill] sm:$0xff] %v6165_v53  ;;  %v2054_v53 = vrot.slane %v1492_v3, %v5588_v22  ;;  %v6196_v3 = vpop.xlane.xlu1 %1351 }
 0x31f   : > { %7630 = vst [vmem:[#allocation56_spill] sm:$0xff] %v6196_v3  ;;  %v1956_v3 = vsel %vm1690_vm2, %v1955_v27, %v1951_v54 }
 0x321   : > { %v6169_v43 = vpop.xlane.xlu0 %1372 }
 0x322   : > { %7626 = vst [vmem:[#allocation52_spill] sm:$0xff] %v6169_v43  ;;  %v1495_v43 = vadd.f32 %v5555_v16, %v6016_v14  ;;  %v2055_v14 = vsel %vm1718_vm6, %v2054_v53, %v5956_v4  ;;  %v1504_v53 = vadd.f32 %v5555_v16, %v1274_v35  ;;  %v1476_v4 = vadd.f32 %v5555_v16, %v1190_v10 }
 0x323   : > { %v2060_v33 = vsel %vm1725_vm7, %v2059_v0, %v2055_v14  ;;  %v1498_v35 = vadd.f32 %v5555_v16, %v6063_v6  ;;  %v1961_v10 = vsel %vm1697_vm3, %v1960_v9, %v1956_v3  ;;  %v6226_v14 = vpop.xlane.xlu1 %1219  ;;  %v1477_v3 = vadd.f32 %v5555_v16, %v6113_v51 }
 0x324   : > { %v2069_v45 = vrot.slane %v1495_v43, %v5598_v58  ;;  %v1478_v9 = vadd.f32 %v5555_v16, %v6117_v37  ;;  %v1508_v37 = vadd.f32 %v5555_v16, %v6119_v11 }
 0x325   : > { %v6178_v15 = vpop.xlane.xlu0 %1375 }
 0x326   : > { %7628 = vst [vmem:[#allocation54_spill] sm:$0xff] %v6178_v15  ;;  %v2064_v15 = vrot.slane %v1494_v47, %v5680_v26  ;;  %v1475_v47 = vadd.f32 %v5555_v16, %v1187_v31  ;;  %v1505_v31 = vadd.f32 %v5555_v16, %v1277_v19  ;;  %v2113_v19 = vrot.slane %v1504_v53, %v5595_v59 }
 0x327   : > { %v1985_v11 = vrot.slane %v1478_v9, %v5680_v26 }
 0x328   : > { %v2065_v0 = vsel %vm1732_vm8, %v2064_v15, %v2060_v33  ;;  %v1970_v15 = vrot.slane %v1475_v47, %v5581_v60  ;;  %v2118_v27 = vrot.slane %v1505_v31, %v5614_v8  ;;  %v1500_v33 = vadd.f32 %v5555_v16, %v6104_v42 }
 0x329   : > { %v6191_v18 = vpop.xlane.xlu0 %1378  ;;  %v2070_v23 = vsel %vm1739_vm9, %v2069_v45, %v2065_v0  ;;  %v1975_v45 = vrot.slane %v1476_v4, %v5588_v22  ;;  %v1520_v47 = vadd.f32 %v5555_v16, %v6125_v29  ;;  %v1507_v4 = vadd.f32 %v5555_v16, %v6115_v57 }
 0x32a   : > { %7629 = vst [vmem:[#allocation55_spill] sm:$0xff] %v6191_v18  ;;  %v1497_v18 = vadd.f32 %v5555_v16, %v6042_v55  ;;  %v1503_v55 = vadd.f32 %v5555_v16, %v6085_v28  ;;  %v2075_v32 = vsel %vm1746_vm10, %v2074_v2, %v2070_v23  ;;  %v1965_v28 = vrot.slane %v1474_v25, %v5629_v48 }
 0x32b   : > { %v2123_v25 = vrot.slane %v1506_v17, %v5629_v48  ;;  %v1519_v0 = vadd.f32 %v5555_v16, %v6095_v56  ;;  %v1521_v23 = vadd.f32 %v5555_v16, %v6106_v46  ;;  %v1980_v57 = vrot.slane %v1477_v3, %v5648_v1 }
 0x32c   : > { %v2079_v54 = vrot.slane %v1497_v18, %v5734_v62  ;;  %v1499_v18 = vadd.f32 %v5555_v16, %v6083_v40  ;;  %v2109_v6 = vrot.slane %v1503_v55, %v5565_v21  ;;  %v1966_v2 = vsel %vm1704_vm4, %v1965_v28, %v1961_v10 }
 0x32d   : > { %v6212_v43 = vpop.xlane.xlu0 %1381  ;;  %v2084_v40 = vrot.slane %v1498_v35, %v5626_v63  ;;  %v1971_v51 = vsel %vm7631_vm5, %v1970_v15, %v1966_v2  ;;  %v2094_v56 = vrot.slane %v1500_v33, %v5677_v44  ;;  %v2192_v35 = vrot.slane %v1520_v47, %v5595_v59 }
 0x32e   : > { %v2080_v53 = vsel %vm1753_vm11, %v2079_v54, %v2075_v32  ;;  %v2114_v42 = vsel %vm1690_vm2, %v2113_v19, %v2109_v6  ;;  %v1976_v29 = vsel %vm1718_vm6, %v1975_v45, %v1971_v51  ;;  %v2089_v31 = vrot.slane %v1499_v18, %v5645_v49  ;;  %v6264_v54 = vpop.xlane.xlu1 %1309 }
 0x32f   : > { %v2119_v17 = vsel %vm1697_vm3, %v2118_v27, %v2114_v42  ;;  %v2128_v15 = vrot.slane %v1507_v4, %v5581_v60  ;;  %v1981_v32 = vsel %vm1725_vm7, %v1980_v57, %v1976_v29  ;;  %v1479_v46 = vadd.f32 %v5555_v16, %v6123_v7 }
 0x330   : > { %v2124_v10 = vsel %vm1704_vm4, %v2123_v25, %v2119_v17  ;;  %v1522_v28 = vadd.f32 %v5555_v16, %v6137_v13  ;;  %v2085_v19 = vsel %vm1760_vm12, %v2084_v40, %v2080_v53  ;;  %v2188_v45 = vrot.slane %v1519_v0, %v5565_v21 }
 0x331   : > { %v6232_v20 = vpop.xlane.xlu0 %1384  ;;  %v1523_v18 = vadd.f32 %v5555_v16, %v6121_v5  ;;  %v2090_v3 = vsel %vm1767_vm13, %v2089_v31, %v2085_v19  ;;  %v2197_v27 = vrot.slane %v1521_v23, %v5614_v8  ;;  %v2129_v7 = vsel %vm7631_vm5, %v2128_v15, %v2124_v10  ;;  %v7632_v10 = vld [vmem:[#allocation43_spill] sm:$0xff] }
 0x332   : > { %v1509_v13 = vadd.f32 %v5555_v16, %v6127_v36  ;;  %v2133_v33 = vrot.slane %v1508_v37, %v5588_v22  ;;  %v2193_v2 = vsel %vm1690_vm2, %v2192_v35, %v2188_v45  ;;  %v1986_v47 = vsel %vm1732_vm8, %v1985_v11, %v1981_v32  ;;  %v6301_v36 = vpop.xlane.xlu1 %1399  ;;  %v7635_v11 = vld [vmem:[#allocation42_spill] sm:$0xff] }
 0x333   : > { %v1480_v5 = vadd.f32 %v5555_v16, %v6129_v50  ;;  %v6295_v25 = vsel %vm1774_vm14, %v2094_v56, %v2090_v3  ;;  %v1990_v53 = vrot.slane %v1479_v46, %v5598_v58  ;;  %v2202_v40 = vrot.slane %v1522_v28, %v5629_v48  ;;  %v7636_v3 = vld [vmem:[#allocation48_spill] sm:$0xff] }
 0x334   : > { %v1524_v4 = vadd.f32 %v5555_v16, %v6141_v34  ;;  %v2207_v51 = vrot.slane %v1523_v18, %v5581_v60  ;;  %v2134_v0 = vsel %vm1718_vm6, %v2133_v33, %v2129_v7  ;;  %v1510_v42 = vadd.f32 %v5555_v16, %v6131_v38 }
 0x335   : > { %v6257_v55 = vpop.xlane.xlu0 %1387  ;;  %v1525_v50 = vadd.f32 %v5555_v16, %v6147_v52  ;;  %v1991_v29 = vsel %vm1739_vm9, %v1990_v53, %v1986_v47  ;;  %v2138_v31 = vrot.slane %v1509_v13, %v5648_v1  ;;  %v2198_v34 = vsel %vm1697_vm3, %v2197_v27, %v2193_v2 }
 0x336   : > { %v1481_v23 = vadd.f32 %v5555_v16, %v6133_v41  ;;  %v1995_v57 = vrot.slane %v1480_v5, %v5693_v24  ;;  %v1526_v17 = vadd.f32 %v5555_v16, %v6151_v12  ;;  %v1511_v38 = vadd.f32 %v5555_v16, %v6135_v39  ;;  %v7633_v12 = vld [vmem:[#allocation47_spill] sm:$0xff]  ;;  %v7634_v39 = vld [vmem:[#allocation45_spill] sm:$0xff]  ;;  %v6343_v7 = vpop.xlane.xlu1 %1312 }
 0x337   : > { %v1482_v52 = vadd.f32 %v5555_v16, %v6139_v61  ;;  %v2139_v56 = vsel %vm1725_vm7, %v2138_v31, %v2134_v0  ;;  %v2203_v37 = vsel %vm1704_vm4, %v2202_v40, %v2198_v34  ;;  %v2212_v35 = vrot.slane %v1524_v4, %v5588_v22  ;;  %v7637_v40 = vld [vmem:[#allocation44_spill] sm:$0xff] }
 0x338   : > { %v1483_v41 = vadd.f32 %v5555_v16, %v7632_v10  ;;  %v2143_v15 = vrot.slane %v1510_v42, %v5680_v26  ;;  %v2217_v32 = vrot.slane %v1525_v50, %v5648_v1  ;;  %v1527_v46 = vadd.f32 %v5555_v16, %v7633_v12 }
 0x339   : > { %v6282_v6 = vpop.xlane.xlu0 %1390  ;;  %v1484_v28 = vadd.f32 %v5555_v16, %v7634_v39  ;;  %v2000_v19 = vrot.slane %v1481_v23, %v5734_v62  ;;  %v1528_v45 = vadd.f32 %v5555_v16, %v6161_v30  ;;  %v1512_v18 = vadd.f32 %v5555_v16, %v7635_v11 }
 0x33a   : > { %v1485_v27 = vadd.f32 %v5555_v16, %v7636_v3  ;;  %v2208_v13 = vsel %vm7631_vm5, %v2207_v51, %v2203_v37  ;;  %v2222_v33 = vrot.slane %v1526_v17, %v5680_v26  ;;  %v2148_v2 = vrot.slane %v1511_v38, %v5598_v58 }
 0x33b   : > { %v2005_v47 = vrot.slane %v1482_v52, %v5626_v63  ;;  %v1996_v5 = vsel %vm1746_vm10, %v1995_v57, %v1991_v29  ;;  %v2213_v30 = vsel %vm1718_vm6, %v2212_v35, %v2208_v13  ;;  %v2010_v53 = vrot.slane %v1483_v41, %v5645_v49  ;;  %v7638_v57 = vld [vmem:[#allocation39_spill] sm:$0xff]  ;;  %v7642_v13 = vld [vmem:[#allocation52_spill] sm:$0xff] }
 0x33c   : > { %v1513_v4 = vadd.f32 %v5555_v16, %v7637_v40  ;;  %v2144_v0 = vsel %vm1732_vm8, %v2143_v15, %v2139_v56  ;;  %v2218_v42 = vsel %vm1725_vm7, %v2217_v32, %v2213_v30  ;;  %v2227_v51 = vrot.slane %v1527_v46, %v5598_v58  ;;  %v7639_v35 = vld [vmem:[#allocation51_spill] sm:$0xff]  ;;  %v7640_v32 = vld [vmem:[#allocation53_spill] sm:$0xff]  ;;  %v6375_v46 = vpop.xlane.xlu1 %1402 }
 0x33d   : > { %v6309_v9 = vpop.xlane.xlu0 %1393  ;;  %v2015_v50 = vrot.slane %v1484_v28, %v5677_v44  ;;  %vm2347_vm5 = vcmask 1043459   ;;  %v2001_v34 = vsel %vm1753_vm11, %v2000_v19, %v1996_v5  ;;  %v2232_v29 = vrot.slane %v1528_v45, %v5693_v24  ;;  %v7641_v19 = vld [vmem:[#allocation50_spill] sm:$0xff]  ;;  %v7644_v5 = vld [vmem:[#allocation40_spill] sm:$0xff] }
 0x33e   : > { %v2153_v23 = vrot.slane %v1512_v18, %v5693_v24  ;;  %v2020_v17 = vrot.slane %v1485_v27, %v7638_v57  ;;  %v2223_v38 = vsel %vm1732_vm8, %v2222_v33, %v2218_v42  ;;  %v2149_v52 = vsel %vm1739_vm9, %v2148_v2, %v2144_v0  ;;  %v7643_v2 = vld [vmem:[#allocation46_spill] sm:$0xff] }
 0x33f   : > { %v2006_v56 = vsel %vm1760_vm12, %v2005_v47, %v2001_v34  ;;  %v1486_v37 = vadd.f32 %v5555_v16, %v6226_v14  ;;  %v6369_v10 = vadd.f32 %v5555_v16, %v7639_v35  ;;  %v2158_v15 = vrot.slane %v1513_v4, %v5734_v62  ;;  %v7646_v4 = vld [vmem:[#allocation54_spill] sm:$0xff] }
 0x340   : > { %v2011_v41 = vsel %vm1767_vm13, %v2010_v53, %v2006_v56  ;;  %v1535_v12 = vadd.f32 %v5555_v16, %v7640_v32  ;;  %v2228_v39 = vsel %vm1739_vm9, %v2227_v51, %v2223_v38  ;;  %v1536_v14 = vadd.f32 %v5555_v16, %v7641_v19  ;;  %v7645_v53 = vld [vmem:[#allocation49_spill] sm:$0xff]  ;;  %v7648_v56 = vld [vmem:[#allocation56_spill] sm:$0xff] }
 0x341   : > { %v6334_v61 = vpop.xlane.xlu0 %1396  ;;  %v2016_v28 = vsel %vm1774_vm14, %v2015_v50, %v2011_v41  ;;  %v6383_v18 = vsel %vm1746_vm10, %v2232_v29, %v2228_v39  ;;  %v2154_v3 = vsel %vm1746_vm10, %v2153_v23, %v2149_v52  ;;  %v1537_v33 = vadd.f32 %v5555_v16, %v7642_v13 }
 0x342   : > { %v2021_v27 = vsel %vm1781_vm15, %v2020_v17, %v2016_v28  ;;  %v1514_v47 = vadd.f32 %v5555_v16, %v7643_v2  ;;  %v2025_v30 = vrot.slane %v1486_v37, %v7644_v5  ;;  %v1515_v40 = vadd.f32 %v5555_v16, %v7645_v53  ;;  %v7649_v28 = vld [vmem:[#allocation41_spill] sm:$0xff] }
 0x343   : > { %v1538_v0 = vadd.f32 %v5555_v16, %v7646_v4  ;;  %v2237_v42 = vrot.slane %v6369_v10, %v5734_v62  ;;  %v2159_v51 = vsel %vm1753_vm11, %v2158_v15, %v2154_v3  ;;  %v2267_v50 = vrot.slane %v1535_v12, %v5565_v21  ;;  %v1361_v10 = vpop.xlane.xlu1 %1360 }
 0x344   : > { %v2026_v29 = vsel %vm1788_vm0, %v2025_v30, %v2021_v27  ;;  %v2271_v23 = vrot.slane %v1536_v14, %v5595_v59  ;;  %v1540_v17 = vadd.f32 %v5555_v16, %v6212_v43  ;;  %v1530_v37 = vadd.f32 %v5555_v16, %v7648_v56 }
 0x345   : > { %v1265_v31 = vpop.xlane.xlu0 %1264  ;;  %v2276_v35 = vrot.slane %v1537_v33, %v5614_v8  ;;  %v1541_v21 = vadd.f32 %v5555_v16, %v6232_v20  ;;  %v2163_v15 = vrot.slane %v1514_v47, %v5626_v63  ;;  %v2168_v59 = vrot.slane %v1515_v40, %v5645_v49 }
 0x346   : > { %v1501_v45 = vadd.f32 %v5555_v16, %v1265_v31  ;;  %v7647_v31 = vld [vmem:[#allocation55_spill] sm:$0xff]  ;;  %v2281_v43 = vrot.slane %v1538_v0, %v5629_v48  ;;  %v1542_v32 = vadd.f32 %v5555_v16, %v6257_v55  ;;  %v1543_v8 = vadd.f32 %v5555_v16, %v6282_v6 }
 0x347   : > { %v1539_v34 = vadd.f32 %v5555_v16, %v7647_v31  ;;  %v2348_v20 = vsel %vm2347_vm5, %v2026_v29, %v7649_v28  ;;  %v2272_v19 = vsel %vm1690_vm2, %v2271_v23, %v2267_v50  ;;  %v2291_v14 = vrot.slane %v1540_v17, %v5588_v22  ;;  %v1364_v47 = vpop.xlane.xlu1 %1363 }
 0x348   : > { %v2099_v38 = vrot.slane %v1501_v45, %v7638_v57  ;;  %v1544_v48 = vadd.f32 %v5555_v16, %v6309_v9  ;;  %v2296_v6 = vrot.slane %v1541_v21, %v5648_v1  ;;  %v1545_v3 = vadd.f32 %v5555_v16, %v6334_v61 }
 0x349   : > { %v1355_v11 = vpop.xlane.xlu0 %1354  ;;  %v2286_v12 = vrot.slane %v1539_v34, %v5581_v60  ;;  %v2277_v60 = vsel %vm1697_vm3, %v2276_v35, %v2272_v19  ;;  %v2301_v22 = vrot.slane %v1542_v32, %v5680_v26  ;;  %vm7650_vm2 = vcmask 326912  }
 0x34a   : > { %v2100_v55 = vsel %vm1781_vm15, %v2099_v38, %v6295_v25  ;;  %v2282_v13 = vsel %vm1704_vm4, %v2281_v43, %v2277_v60  ;;  %v1531_v33 = vadd.f32 %v5555_v16, %v1355_v11  ;;  %v1517_v25 = vadd.f32 %v5555_v16, %v6343_v7 }
 0x34b   : > { %v2287_v2 = vsel %vm7650_vm2, %v2286_v12, %v2282_v13  ;;  %v2306_v1 = vrot.slane %v1543_v8, %v5598_v58  ;;  %v2242_v30 = vrot.slane %v1530_v37, %v5626_v63  ;;  %v1516_v53 = vadd.f32 %v5555_v16, %v6264_v54  ;;  %v1412_v35 = vpop.xlane.xlu1 %1411  ;;  %v7651_v13 = vld [vmem:[#allocation32_spill] sm:$0xff] }
 0x34c   : > { %v2292_v26 = vsel %vm1718_vm6, %v2291_v14, %v2287_v2  ;;  %v2311_v11 = vrot.slane %v1544_v48, %v5693_v24  ;;  %v2164_v4 = vsel %vm1760_vm12, %v2163_v15, %v2159_v51  ;;  %v2316_v0 = vrot.slane %v1545_v3, %v5734_v62 }
 0x34d   : > { %v1268_v52 = vpop.xlane.xlu0 %1267  ;;  %v2297_v7 = vsel %vm1725_vm7, %v2296_v6, %v2292_v26  ;;  %v2169_v50 = vsel %vm1767_vm13, %v2168_v59, %v2164_v4  ;;  %v1546_v31 = vadd.f32 %v5555_v16, %v6301_v36  ;;  %v2247_v34 = vrot.slane %v1531_v33, %v5645_v49 }
 0x34e   : > { %v1502_v41 = vadd.f32 %v5555_v16, %v1268_v52  ;;  %v2302_v54 = vsel %vm1732_vm8, %v2301_v22, %v2297_v7  ;;  %v2178_v24 = vrot.slane %v1517_v25, %v7638_v57  ;;  %v1533_v29 = vadd.f32 %v5555_v16, %v1361_v10 }
 0x34f   : > { %v2307_v51 = vsel %vm1739_vm9, %v2306_v1, %v2302_v54  ;;  %v2238_v62 = vsel %vm1753_vm11, %v2237_v42, %v6383_v18  ;;  %v2173_v17 = vrot.slane %v1516_v53, %v5677_v44  ;;  %v1547_v37 = vadd.f32 %v5555_v16, %v6375_v46  ;;  %v7656_v53 = vld [vmem:[#allocation38_spill] sm:$0xff] }
 0x350   : > { %v2104_v39 = vrot.slane %v1502_v41, %v7644_v5  ;;  %v2312_v38 = vsel %vm1746_vm10, %v2311_v11, %v2307_v51  ;;  %v2243_v56 = vsel %vm1760_vm12, %v2242_v30, %v2238_v62  ;;  %v2321_v41 = vrot.slane %v1546_v31, %v5626_v63 }
 0x351   : > { %v1358_v45 = vpop.xlane.xlu0 %1357  ;;  %v2317_v10 = vsel %vm1753_vm11, %v2316_v0, %v2312_v38  ;;  %v2174_v18 = vsel %vm1774_vm14, %v2173_v17, %v2169_v50  ;;  %v2248_v42 = vsel %vm1767_vm13, %v2247_v34, %v2243_v56  ;;  %vm2351_vm3 = vcmask 1045509  }
 0x352   : > { %v2105_v27 = vsel %vm1788_vm0, %v2104_v39, %v2100_v55  ;;  %v1532_v61 = vadd.f32 %v5555_v16, %v1358_v45  ;;  %v2179_v15 = vsel %vm1781_vm15, %v2178_v24, %v2174_v18  ;;  %v2257_v59 = vrot.slane %v1533_v29, %v7638_v57 }
 0x353   : > { %v2350_v9 = vsel %vm2349_vm1, %v2105_v27, %v2348_v20  ;;  %v1534_v43 = vadd.f32 %v5555_v16, %v1364_v47  ;;  %v1550_v32 = vadd.f32 %v5555_v16, %v1412_v35  ;;  %v2322_v12 = vsel %vm1760_vm12, %v2321_v41, %v2317_v10 }
 0x354   : > { %v2252_v23 = vrot.slane %v1532_v61, %v5677_v44  ;;  %v2326_v28 = vrot.slane %v1547_v37, %v5645_v49  ;;  %vm2353_vm4 = vcmask 1046534   ;;  %vm2355_vm6 = vcmask 1047559   ;;  %v7655_v61 = vld [vmem:[#allocation35_spill] sm:$0xff] }
 0x355   : > { %v1316_v40 = vpop.xlane.xlu0 %1315  ;;  %v2262_v14 = vrot.slane %v1534_v43, %v7644_v5  ;;  %v2341_v60 = vrot.slane %v1550_v32, %v7644_v5  ;;  %vm7652_vm7 = vcmp.lt.s32.totalorder %v7651_v13, 16  ;;  %v2438_v30 = vsub.s32 1, %v7655_v61  ;;  %v6697_v13 = vld [vmem:[#allocation3 + $0xc0] sm:$0xff]  }
 0x356   : > { %v1518_v58 = vadd.f32 %v5555_v16, %v1316_v40  ;;  %v2253_v46 = vsel %vm1774_vm14, %v2252_v23, %v2248_v42  ;;  %v2327_v48 = vsel %vm1767_vm13, %v2326_v28, %v2322_v12  ;;  %vm7653_vm8 = vmmov %vm7652_vm7  ;;  %v2505_v11 = vsub.s32 2, %v7655_v61 }
 0x357   : > { %v2258_v19 = vsel %vm1781_vm15, %v2257_v59, %v2253_v46  ;;  %v2572_v7 = vsub.s32 3, %v7655_v61  ;;  %v2639_v0 = vsub.s32 4, %v7655_v61  ;;  %v2706_v31 = vsub.s32 5, %v7655_v61 }
 0x358   : > { %v2183_v36 = vrot.slane %v1518_v58, %v7644_v5  ;;  %v2263_v49 = vsel %vm1788_vm0, %v2262_v14, %v2258_v19  ;;  %v2773_v34 = vsub.s32 6, %v7655_v61  ;;  %v2840_v29 = vsub.s32 7, %v7655_v61 }
 0x359   : > { %v1406_v52 = vpop.xlane.xlu0 %1405 }
 0x35a   : > { %v1548_v21 = vadd.f32 %v5555_v16, %v1406_v52  ;;  %v2184_v8 = vsel %vm1788_vm0, %v2183_v36, %v2179_v15 }
 0x35b   : > { %v2352_v45 = vsel %vm2351_vm3, %v2184_v8, %v2350_v9 }
 0x35c   : > { %v2331_v63 = vrot.slane %v1548_v21, %v5677_v44  ;;  %v2354_v3 = vsel %vm2353_vm4, %v2263_v49, %v2352_v45  ;;  %v6687_v49 = vld [vmem:[#allocation3 + $0x80] sm:$0xff]  }
 0x35d   : > { %v1409_v39 = vpop.xlane.xlu0 %1408 }
 0x35e   : > { %v1549_v20 = vadd.f32 %v5555_v16, %v1409_v39  ;;  %v2332_v44 = vsel %vm1774_vm14, %v2331_v63, %v2327_v48 }
 0x360   : > { %v2336_v55 = vrot.slane %v1549_v20, %v7638_v57 }
 0x362   : > { %v2337_v16 = vsel %vm1781_vm15, %v2336_v55, %v2332_v44  ;;  %v6685_v44 = vld [vmem:[#allocation3 + $0x40] sm:$0xff]  }
 0x363   : > { %v2342_v6 = vsel %vm1788_vm0, %v2341_v60, %v2337_v16  ;;  %v6683_v60 = vld [vmem:[#allocation3] sm:$0xff]   ;;  %v6689_v16 = vld [vmem:[#allocation3 + $0x8] sm:$0xff]   ;;  %vm7689_vm0 = vcmask 261120  }
 0x364   : > { %v2356_v27 = vsel %vm2355_vm6, %v2342_v6, %v2354_v3  ;;  %v6691_v6 = vld [vmem:[#allocation3 + $0x48] sm:$0xff]   ;;  %vm7690_vm9 = vmmov %vm7689_vm0 }
 0x365   : > { %v2358_v57 = vsel %vm7652_vm7, %v2356_v27, -1e+30  ;;  %vm7691_vm10 = vmmov %vm7689_vm0 }
 0x366   : > { %2359 = vmax.xlane.f32.xlu0 %v2358_v57  ;;  %vm7692_vm11 = vmmov %vm7689_vm0 }
 0x367   : > { %vm7693_vm12 = vmmov %vm7689_vm0 }
 0x368   : > { %vm7694_vm13 = vmmov %vm7689_vm0 }
 0x369   : > { %vm7695_vm14 = vmmov %vm7689_vm0 }
 0x36a   : > { %vm7696_vm15 = vmmov %vm7689_vm0 }
 0x36b   : > { %vm7705_vm2 = vmmov %vm7689_vm0 }
 0x36c   : > { %vm7707_vm7 = vmmov %vm7689_vm0 }
 0x3f3   : > { %v2360_v22 = vpop.xlane.xlu0 %2359 }
 0x3f4   : > { %v2361_v33 = vsub.f32 %v2358_v57, %v2360_v22  ;;  %v6699_v57 = vld [vmem:[#allocation3 + $0x88] sm:$0xff]   ;;  %v6701_v22 = vld [vmem:[#allocation3 + $0x100] sm:$0xff]  }
 0x3f6   : > { %v2362_v5 = vmul.f32 1.442695, %v2361_v33  ;;  %v6769_v33 = vld [vmem:[#allocation3 + $0x18] sm:$0xff]  }
 0x3f8   : > { %4532 = vpow2.f32 %v2362_v5  ;;  %v6735_v5 = vld [vmem:[#allocation3 + $0x50] sm:$0xff]  }
 0x3f9   : > { %7667 = vst [vmem:[#allocation46_spill] sm:$0xff] %v6735_v5  ;;  %v6809_v5 = vld [vmem:[#allocation3 + $0xd8] sm:$0xff]  }
 0x402   : > { %v4533_v9 = vpop.eup %4532 }
 0x403   : > { %v2364_v25 = vsel %vm7653_vm8, %v4533_v9, 0.0  ;;  %v6747_v9 = vld [vmem:[#allocation3 + $0x188] sm:$0xff]   ;;  %vm7708_vm8 = vmmov %vm7689_vm0 }
 0x404   : > { %2365 = vadd.xlane.f32.xlu1 %v2364_v25  ;;  %7671 = vst [vmem:[#allocation55_spill] sm:$0xff] %v6747_v9 }
 0x491   : > { %v2366_v2 = vpop.xlane.xlu1 %2365 }
 0x492   : > { %4534 = vrcp.f32 %v2366_v2  ;;  %v6707_v2 = vld [vmem:[#allocation3 + $0xc8] sm:$0xff]  }
 0x49c   : > { %v4535_v47 = vpop.eup %4534 }
 0x49d   : > { %v6501_v1 = vmul.f32 %v4535_v47, %v2364_v25  ;;  %v6723_v25 = vld [vmem:[#allocation3 + $0x180] sm:$0xff]   ;;  %v6725_v47 = vld [vmem:[#allocation3 + $0x10] sm:$0xff]  }
 0x49f   : > { %7654 = vst [vmem:[#allocation43_spill] sm:$0xff] %v6501_v1  ;;  %v6506_v26 = vrot.slane %v6501_v1, %v7656_v53  ;;  %v6512_v40 = vrot.slane %v6501_v1, %v2438_v30  ;;  %v6517_v4 = vrot.slane %v6501_v1, %v2505_v11  ;;  %v6526_v58 = vrot.slane %v6501_v1, %v2572_v7  ;;  %v6715_v11 = vld [vmem:[#allocation3 + $0x140] sm:$0xff]   ;;  %v6717_v7 = vld [vmem:[#allocation3 + $0x108] sm:$0xff]  }
 0x4a0   : > { %v6531_v50 = vrot.slane %v6501_v1, %v2639_v0  ;;  %v6541_v54 = vrot.slane %v6501_v1, %v2706_v31  ;;  %v6549_v24 = vrot.slane %v6501_v1, %v2773_v34  ;;  %v6559_v51 = vrot.slane %v6501_v1, %v2840_v29  ;;  %v6737_v34 = vld [vmem:[#allocation3 + $0x148] sm:$0xff]   ;;  %v6739_v29 = vld [vmem:[#allocation3 + $0x1c0] sm:$0xff]   ;;  %v6767_v0 = vld [vmem:[#allocation3 + $0x110] sm:$0xff]  }
 0x4a1   : > { %2378 = vbcast.lane.b32.xlu1 %v6506_v26, 264  ;;  %2374 = vbcast.lane.b32.xlu0 %v6506_v26, 256  ;;  %7668 = vst [vmem:[#allocation40_spill] sm:$0xff] %v6737_v34  ;;  %7669 = vst [vmem:[#allocation49_spill] sm:$0xff] %v6739_v29  ;;  %v6785_v1 = vld [vmem:[#allocation3 + $0x98] sm:$0xff]   ;;  %v7682_v53 = vunpack.c.l.bf16 %v6685_v44 }
 0x4a2   : > { %7676 = vst [vmem:[#allocation57_spill] sm:$0xff] %v6785_v1 }
 0x4a5   : > { %2441 = vbcast.lane.b32.xlu1 %v6512_v40, 256  ;;  %2445 = vbcast.lane.b32.xlu0 %v6512_v40, 264 }
 0x4a9   : > { %2508 = vbcast.lane.b32.xlu1 %v6517_v4, 256  ;;  %2512 = vbcast.lane.b32.xlu0 %v6517_v4, 264 }
 0x4ad   : > { %2382 = vbcast.lane.b32.xlu1 %v6506_v26, 272  ;;  %2449 = vbcast.lane.b32.xlu0 %v6512_v40, 272 }
 0x4b1   : > { %2575 = vbcast.lane.b32.xlu1 %v6526_v58, 256  ;;  %2579 = vbcast.lane.b32.xlu0 %v6526_v58, 264 }
 0x4b5   : > { %2516 = vbcast.lane.b32.xlu1 %v6517_v4, 272  ;;  %2642 = vbcast.lane.b32.xlu0 %v6531_v50, 256 }
 0x4b9   : > { %2646 = vbcast.lane.b32.xlu1 %v6531_v50, 264  ;;  %2386 = vbcast.lane.b32.xlu0 %v6506_v26, 280 }
 0x4bd   : > { %2453 = vbcast.lane.b32.xlu1 %v6512_v40, 280  ;;  %2583 = vbcast.lane.b32.xlu0 %v6526_v58, 272 }
 0x4c1   : > { %2709 = vbcast.lane.b32.xlu1 %v6541_v54, 256  ;;  %2713 = vbcast.lane.b32.xlu0 %v6541_v54, 264 }
 0x4c5   : > { %2520 = vbcast.lane.b32.xlu1 %v6517_v4, 280  ;;  %2650 = vbcast.lane.b32.xlu0 %v6531_v50, 272 }
 0x4c9   : > { %2776 = vbcast.lane.b32.xlu1 %v6549_v24, 256  ;;  %2780 = vbcast.lane.b32.xlu0 %v6549_v24, 264 }
 0x4cd   : > { %2390 = vbcast.lane.b32.xlu1 %v6506_v26, 288  ;;  %2457 = vbcast.lane.b32.xlu0 %v6512_v40, 288 }
 0x4d1   : > { %2587 = vbcast.lane.b32.xlu1 %v6526_v58, 280  ;;  %2717 = vbcast.lane.b32.xlu0 %v6541_v54, 272 }
 0x4d5   : > { %2843 = vbcast.lane.b32.xlu1 %v6559_v51, 256  ;;  %2847 = vbcast.lane.b32.xlu0 %v6559_v51, 264 }
 0x4d9   : > { %2524 = vbcast.lane.b32.xlu1 %v6517_v4, 288  ;;  %2654 = vbcast.lane.b32.xlu0 %v6531_v50, 280 }
 0x4dd   : > { %2784 = vbcast.lane.b32.xlu1 %v6549_v24, 272  ;;  %2394 = vbcast.lane.b32.xlu0 %v6506_v26, 296 }
 0x4e1   : > { %2461 = vbcast.lane.b32.xlu1 %v6512_v40, 296  ;;  %2591 = vbcast.lane.b32.xlu0 %v6526_v58, 288 }
 0x4e5   : > { %2721 = vbcast.lane.b32.xlu1 %v6541_v54, 280  ;;  %2851 = vbcast.lane.b32.xlu0 %v6559_v51, 272 }
 0x4e9   : > { %2528 = vbcast.lane.b32.xlu1 %v6517_v4, 296  ;;  %2658 = vbcast.lane.b32.xlu0 %v6531_v50, 288 }
 0x4ed   : > { %2788 = vbcast.lane.b32.xlu1 %v6549_v24, 280  ;;  %2398 = vbcast.lane.b32.xlu0 %v6506_v26, 304 }
 0x4f1   : > { %2465 = vbcast.lane.b32.xlu1 %v6512_v40, 304  ;;  %2595 = vbcast.lane.b32.xlu0 %v6526_v58, 296 }
 0x4f5   : > { %2725 = vbcast.lane.b32.xlu1 %v6541_v54, 288  ;;  %2855 = vbcast.lane.b32.xlu0 %v6559_v51, 280 }
 0x4f9   : > { %2532 = vbcast.lane.b32.xlu1 %v6517_v4, 304  ;;  %2662 = vbcast.lane.b32.xlu0 %v6531_v50, 296 }
 0x4fd   : > { %2792 = vbcast.lane.b32.xlu1 %v6549_v24, 288  ;;  %2402 = vbcast.lane.b32.xlu0 %v6506_v26, 312 }
 0x501   : > { %2469 = vbcast.lane.b32.xlu1 %v6512_v40, 312  ;;  %2599 = vbcast.lane.b32.xlu0 %v6526_v58, 304 }
 0x505   : > { %2729 = vbcast.lane.b32.xlu1 %v6541_v54, 296  ;;  %2859 = vbcast.lane.b32.xlu0 %v6559_v51, 288 }
 0x509   : > { %2536 = vbcast.lane.b32.xlu1 %v6517_v4, 312  ;;  %2666 = vbcast.lane.b32.xlu0 %v6531_v50, 304 }
 0x50d   : > { %2796 = vbcast.lane.b32.xlu1 %v6549_v24, 296  ;;  %2406 = vbcast.lane.b32.xlu0 %v6506_v26, 320 }
 0x511   : > { %2473 = vbcast.lane.b32.xlu1 %v6512_v40, 320  ;;  %2603 = vbcast.lane.b32.xlu0 %v6526_v58, 312 }
 0x513   : > { %v6593_v23 = vpop.permute.xlu1 %2378  ;;  %v6595_v62 = vpop.permute.xlu0 %2374 }
 0x515   : > { %2733 = vbcast.lane.b32.xlu1 %v6541_v54, 304  ;;  %2863 = vbcast.lane.b32.xlu0 %v6559_v51, 296 }
 0x517   : > { %v6599_v17 = vpop.permute.xlu1 %2441  ;;  %v6601_v38 = vpop.permute.xlu0 %2445 }
 0x519   : > { %2540 = vbcast.lane.b32.xlu1 %v6517_v4, 320  ;;  %2670 = vbcast.lane.b32.xlu0 %v6531_v50, 312 }
 0x51b   : > { %v6605_v36 = vpop.permute.xlu1 %2508  ;;  %v6607_v52 = vpop.permute.xlu0 %2512 }
 0x51d   : > { %2800 = vbcast.lane.b32.xlu1 %v6549_v24, 304  ;;  %2410 = vbcast.lane.b32.xlu0 %v6506_v26, 328 }
 0x51f   : > { %v6611_v56 = vpop.permute.xlu1 %2382  ;;  %v6613_v37 = vpop.permute.xlu0 %2449 }
 0x521   : > { %2477 = vbcast.lane.b32.xlu1 %v6512_v40, 328  ;;  %2607 = vbcast.lane.b32.xlu0 %v6526_v58, 320 }
 0x523   : > { %v6617_v35 = vpop.permute.xlu1 %2575  ;;  %v6619_v10 = vpop.permute.xlu0 %2579 }
 0x525   : > { %2737 = vbcast.lane.b32.xlu1 %v6541_v54, 312  ;;  %2867 = vbcast.lane.b32.xlu0 %v6559_v51, 304 }
 0x527   : > { %v6623_v21 = vpop.permute.xlu1 %2516  ;;  %v6625_v41 = vpop.permute.xlu0 %2642 }
 0x529   : > { %2544 = vbcast.lane.b32.xlu1 %v6517_v4, 328  ;;  %2674 = vbcast.lane.b32.xlu0 %v6531_v50, 320 }
 0x52b   : > { %v6629_v18 = vpop.permute.xlu1 %2646  ;;  %v6631_v42 = vpop.permute.xlu0 %2386 }
 0x52d   : > { %2804 = vbcast.lane.b32.xlu1 %v6549_v24, 312  ;;  %2414 = vbcast.lane.b32.xlu0 %v6506_v26, 336 }
 0x52f   : > { %v6635_v15 = vpop.permute.xlu1 %2453  ;;  %v6637_v59 = vpop.permute.xlu0 %2583 }
 0x531   : > { %2481 = vbcast.lane.b32.xlu1 %v6512_v40, 336  ;;  %2611 = vbcast.lane.b32.xlu0 %v6526_v58, 328 }
 0x533   : > { %v6641_v43 = vpop.permute.xlu1 %2709  ;;  %v6643_v46 = vpop.permute.xlu0 %2713 }
 0x535   : > { %2741 = vbcast.lane.b32.xlu1 %v6541_v54, 320  ;;  %2871 = vbcast.lane.b32.xlu0 %v6559_v51, 312 }
 0x537   : > { %v6647_v32 = vpop.permute.xlu1 %2520  ;;  %v6649_v12 = vpop.permute.xlu0 %2650 }
 0x539   : > { %2548 = vbcast.lane.b32.xlu1 %v6517_v4, 336  ;;  %2678 = vbcast.lane.b32.xlu0 %v6531_v50, 328 }
 0x53b   : > { %v6653_v8 = vpop.permute.xlu1 %2776  ;;  %v6655_v63 = vpop.permute.xlu0 %2780 }
 0x53d   : > { %2808 = vbcast.lane.b32.xlu1 %v6549_v24, 320  ;;  %2418 = vbcast.lane.b32.xlu0 %v6506_v26, 344 }
 0x53f   : > { %v6659_v39 = vpop.permute.xlu1 %2390  ;;  %v6661_v28 = vpop.permute.xlu0 %2457 }
 0x541   : > { %2485 = vbcast.lane.b32.xlu1 %v6512_v40, 344  ;;  %2615 = vbcast.lane.b32.xlu0 %v6526_v58, 336 }
 0x543   : > { %v6665_v20 = vpop.permute.xlu1 %2587  ;;  %v6667_v19 = vpop.permute.xlu0 %2717 }
 0x544   : > { %7657 = vst [vmem:[#allocation47_spill] sm:$0xff] %v6665_v20  ;;  %7658 = vst [vmem:[#allocation45_spill] sm:$0xff] %v6667_v19  ;;  %v6791_v20 = vld [vmem:[#allocation3 + $0x190] sm:$0xff]  }
 0x545   : > { %2745 = vbcast.lane.b32.xlu1 %v6541_v54, 328  ;;  %2875 = vbcast.lane.b32.xlu0 %v6559_v51, 320  ;;  %7677 = vst [vmem:[#allocation58_spill] sm:$0xff] %v6791_v20 }
 0x547   : > { %v6671_v14 = vpop.permute.xlu1 %2843  ;;  %v6673_v48 = vpop.permute.xlu0 %2847 }
 0x548   : > { %7659 = vst [vmem:[#allocation42_spill] sm:$0xff] %v6671_v14  ;;  %7660 = vst [vmem:[#allocation48_spill] sm:$0xff] %v6673_v48  ;;  %v6763_v48 = vld [vmem:[#allocation3 + $0x1c8] sm:$0xff]   ;;  %v6775_v14 = vld [vmem:[#allocation3 + $0x58] sm:$0xff]  }
 0x549   : > { %2552 = vbcast.lane.b32.xlu1 %v6517_v4, 344  ;;  %2682 = vbcast.lane.b32.xlu0 %v6531_v50, 336  ;;  %7673 = vst [vmem:[#allocation41_spill] sm:$0xff] %v6763_v48 }
 0x54b   : > { %v6677_v55 = vpop.permute.xlu1 %2524  ;;  %v6679_v45 = vpop.permute.xlu0 %2654 }
 0x54c   : > { %7661 = vst [vmem:[#allocation44_spill] sm:$0xff] %v6677_v55  ;;  %7662 = vst [vmem:[#allocation39_spill] sm:$0xff] %v6679_v45  ;;  %v6777_v45 = vld [vmem:[#allocation3 + $0x150] sm:$0xff]  }
 0x54d   : > { %2812 = vbcast.lane.b32.xlu1 %v6549_v24, 328  ;;  %2422 = vbcast.lane.b32.xlu0 %v6506_v26, 352  ;;  %7675 = vst [vmem:[#allocation38_spill] sm:$0xff] %v6777_v45 }
 0x54f   : > { %v6693_v3 = vpop.permute.xlu1 %2784  ;;  %v6695_v27 = vpop.permute.xlu0 %2394 }
 0x550   : > { %7663 = vst [vmem:[#allocation51_spill] sm:$0xff] %v6693_v3  ;;  %7664 = vst [vmem:[#allocation53_spill] sm:$0xff] %v6695_v27  ;;  %v6755_v27 = vld [vmem:[#allocation3 + $0xd0] sm:$0xff]   ;;  %v7683_v3 = vunpack.c.h.bf16 %v6685_v44 }
 0x551   : > { %2489 = vbcast.lane.b32.xlu1 %v6512_v40, 352  ;;  %2619 = vbcast.lane.b32.xlu0 %v6526_v58, 344 }
 0x552   : > { %v3178_v34 = vmul.f32 %v7683_v3, %v6601_v38  ;;  %v7687_v38 = vunpack.c.l.bf16 %v6689_v16 }
 0x553   : > { %v6727_v61 = vpop.permute.xlu1 %2461  ;;  %v6729_v30 = vpop.permute.xlu0 %2591 }
 0x554   : > { %7665 = vst [vmem:[#allocation50_spill] sm:$0xff] %v6727_v61  ;;  %7666 = vst [vmem:[#allocation52_spill] sm:$0xff] %v6729_v30  ;;  %v6745_v61 = vld [vmem:[#allocation3 + $0x90] sm:$0xff]   ;;  %v7680_v30 = vunpack.c.h.bf16 %v6683_v60  ;;  %v3163_v44 = vmul.f32 %v7687_v38, %v6611_v56  ;;  %v3327_v48 = vsel %vm7692_vm11, %v3178_v34, 0.0  ;;  %v7697_v38 = vunpack.c.l.bf16 %v6697_v13 }
 0x555   : > { %7670 = vst [vmem:[#allocation54_spill] sm:$0xff] %v6745_v61  ;;  %2749 = vbcast.lane.b32.xlu1 %v6541_v54, 336  ;;  %2879 = vbcast.lane.b32.xlu0 %v6559_v51, 328  ;;  %v3177_v61 = vmul.f32 %v7682_v53, %v6599_v17  ;;  %v7686_v17 = vunpack.c.h.bf16 %v6687_v49  ;;  %vm7715_vm11 = vmmov %vm7689_vm0 }
 0x556   : > { %v3162_v19 = vmul.f32 %v7680_v30, %v6593_v23  ;;  %v7684_v23 = vunpack.c.l.bf16 %v6687_v49  ;;  %v3292_v49 = vsel %vm7695_vm14, %v3163_v44, 0.0  ;;  %vm7724_vm14 = vmmov %vm7689_vm0 }
 0x557   : > { %v6761_v55 = vpop.permute.xlu1 %2721  ;;  %v6765_v31 = vpop.permute.xlu0 %2851  ;;  %v3194_v53 = vmul.f32 %v7686_v17, %v6607_v52 }
 0x558   : > { %7672 = vst [vmem:[#allocation56_spill] sm:$0xff] %v6761_v55  ;;  %7674 = vst [vmem:[#allocation35_spill] sm:$0xff] %v6765_v31  ;;  %v7681_v55 = vunpack.c.l.bf16 %v6683_v60  ;;  %v3193_v30 = vmul.f32 %v7684_v23, %v6605_v36  ;;  %v6825_v60 = vld [vmem:[#allocation3 + $0x118] sm:$0xff]   ;;  %v7688_v36 = vunpack.c.l.bf16 %v6691_v6  ;;  %v3290_v56 = vsel %vm7689_vm0, %v3162_v19, 0.0 }
 0x559   : > { %2556 = vbcast.lane.b32.xlu1 %v6517_v4, 352  ;;  %2686 = vbcast.lane.b32.xlu0 %v6531_v50, 344  ;;  %7685 = vst [vmem:[#allocation61_spill] sm:$0xff] %v6825_v60  ;;  %v3364_v19 = vsel %vm7694_vm13, %v3194_v53, 0.0  ;;  %v7701_v53 = vunpack.c.h.bf16 %v6701_v22  ;;  %vm7723_vm13 = vmmov %vm7689_vm0 }
 0x55a   : > { %v3161_v9 = vmul.f32 %v7681_v55, %v6595_v62  ;;  %v6823_v55 = vld [vmem:[#allocation3 + $0x1d0] sm:$0xff]   ;;  %v3179_v3 = vmul.f32 %v7688_v36, %v6613_v37  ;;  %v6849_v36 = vld [vmem:[#allocation3 + $0x20] sm:$0xff]   ;;  %v3363_v52 = vsel %vm7693_vm12, %v3193_v30, 0.0  ;;  %v7700_v30 = vunpack.c.l.bf16 %v6699_v57  ;;  %vm7719_vm12 = vmmov %vm7689_vm0 }
 0x55b   : > { %v6793_v31 = vpop.permute.xlu1 %2528  ;;  %v6795_v29 = vpop.permute.xlu0 %2658  ;;  %v6863_v37 = vld [vmem:[#allocation3 + $0x60] sm:$0xff]   ;;  %v3226_v44 = vmul.f32 %v7701_v53, %v6629_v18  ;;  %v7704_v18 = vunpack.c.l.bf16 %v6707_v2 }
 0x55c   : > { %7678 = vst [vmem:[#allocation59_spill] sm:$0xff] %v6793_v31  ;;  %7679 = vst [vmem:[#allocation60_spill] sm:$0xff] %v6795_v29  ;;  %v3289_v23 = vsel %vm7690_vm9, %v3161_v9, 0.0  ;;  %v3326_v29 = vsel %vm7691_vm10, %v3177_v61, 0.0  ;;  %v3329_v17 = vsel %vm7696_vm15, %v3179_v3, 0.0  ;;  %v3209_v9 = vmul.f32 %v7697_v38, %v6617_v35 }
 0x55d   : > { %2816 = vbcast.lane.b32.xlu1 %v6549_v24, 336  ;;  %2426 = vbcast.lane.b32.xlu0 %v6506_v26, 360  ;;  %7698 = vst [vmem:[#allocation62_spill] sm:$0xff] %v6863_v37  ;;  %v7699_v61 = vunpack.c.h.bf16 %v6697_v13  ;;  %v3195_v1 = vmul.f32 %v7700_v30, %v6623_v21  ;;  %v7702_v3 = vunpack.c.h.bf16 %v6689_v16  ;;  %v3291_v38 = vadd.f32 %v3290_v56, %v3289_v23  ;;  %vm7709_vm9 = vmmov %vm7689_vm0  ;;  %v7745_v21 = vld [vmem:[#allocation51_spill] sm:$0xff] }
 0x55e   : > { %v3328_v20 = vadd.f32 %v3327_v48, %v3326_v29  ;;  %v3211_v30 = vmul.f32 %v7704_v18, %v6637_v59  ;;  %v3438_v56 = vsel %vm7689_vm0, %v3226_v44, 0.0  ;;  %vm7710_vm10 = vmmov %vm7689_vm0  ;;  %v7716_v44 = vunpack.c.l.bf16 %v6717_v7 }
 0x55f   : > { %v6837_v31 = vpop.permute.xlu1 %2788  ;;  %v6839_v62 = vpop.permute.xlu0 %2398  ;;  %v3210_v34 = vmul.f32 %v7699_v61, %v6619_v10  ;;  %v3164_v45 = vmul.f32 %v7702_v3, %v6631_v42  ;;  %v7703_v10 = vunpack.c.h.bf16 %v6691_v6  ;;  %v3365_v61 = vadd.f32 %v3364_v19, %v3363_v52  ;;  %vm7725_vm15 = vmmov %vm7689_vm0 }
 0x560   : > { %v3293_v48 = vadd.f32 %v3292_v49, %v3291_v38  ;;  %v3330_v29 = vadd.f32 %v3329_v17, %v3328_v20  ;;  %v3400_v6 = vsel %vm7705_vm2, %v3209_v9, 0.0  ;;  %v3366_v59 = vsel %vm7708_vm8, %v3195_v1, 0.0  ;;  %vm7726_vm2 = vmmov %vm7689_vm0 }
 0x561   : > { %2493 = vbcast.lane.b32.xlu1 %v6512_v40, 360  ;;  %2623 = vbcast.lane.b32.xlu0 %v6526_v58, 352  ;;  %v3180_v13 = vmul.f32 %v7703_v10, %v6635_v15  ;;  %v7706_v15 = vunpack.c.l.bf16 %v6701_v22  ;;  %v3401_v52 = vsel %vm7707_vm7, %v3210_v34, 0.0  ;;  %v3294_v19 = vsel %vm7709_vm9, %v3164_v45, 0.0  ;;  %v6914_v34 = vld [vmem:[#allocation3 + $0x158] sm:$0xff]   ;;  %vm7727_vm7 = vmmov %vm7689_vm0 }
 0x562   : > { %v7711_v49 = vunpack.c.l.bf16 %v6715_v11  ;;  %v7713_v1 = vunpack.c.h.bf16 %v6699_v57  ;;  %7714 = vst [vmem:[#allocation63_spill] sm:$0xff] %v6914_v34  ;;  %v3403_v45 = vsel %vm7715_vm11, %v3211_v30, 0.0  ;;  %v3227_v38 = vmul.f32 %v7716_v44, %v6649_v12  ;;  %v7721_v12 = vld [vmem:[#allocation46_spill] sm:$0xff]  ;;  %vm7728_vm8 = vmmov %vm7689_vm0  ;;  %v7746_v34 = vld [vmem:[#allocation55_spill] sm:$0xff] }
 0x563   : > { %v6877_v60 = vpop.permute.xlu1 %2465  ;;  %v6879_v35 = vpop.permute.xlu0 %2595  ;;  %v3225_v23 = vmul.f32 %v7706_v15, %v6625_v41  ;;  %v3331_v20 = vsel %vm7710_vm10, %v3180_v13, 0.0  ;;  %v7712_v41 = vunpack.c.h.bf16 %v6715_v11  ;;  %v7717_v10 = vunpack.c.l.bf16 %v6723_v25  ;;  %vm7729_vm9 = vmmov %vm7689_vm0 }
 0x564   : > { %v3241_v17 = vmul.f32 %v7711_v49, %v6641_v43  ;;  %v3196_v9 = vmul.f32 %v7713_v1, %v6647_v32  ;;  %v7718_v11 = vunpack.c.h.bf16 %v6723_v25  ;;  %v3402_v32 = vadd.f32 %v3401_v52, %v3400_v6  ;;  %v7743_v1 = vld [vmem:[#allocation39_spill] sm:$0xff]  ;;  %vm7748_vm10 = vmmov %vm7689_vm0 }
 0x565   : > { %2753 = vbcast.lane.b32.xlu1 %v6541_v54, 344  ;;  %2883 = vbcast.lane.b32.xlu0 %v6559_v51, 336  ;;  %v3242_v22 = vmul.f32 %v7712_v41, %v6643_v46  ;;  %v3257_v43 = vmul.f32 %v7717_v10, %v6653_v8  ;;  %v3437_v57 = vsel %vm7719_vm12, %v3225_v23, 0.0  ;;  %v7720_v13 = vunpack.c.l.bf16 %v6725_v47  ;;  %vm7749_vm11 = vmmov %vm7689_vm0 }
 0x566   : > { %v3258_v46 = vmul.f32 %v7718_v11, %v6655_v63  ;;  %v7722_v30 = vunpack.c.l.bf16 %v7721_v12  ;;  %v3367_v8 = vadd.f32 %v3366_v59, %v3365_v61  ;;  %v3439_v49 = vadd.f32 %v3438_v56, %v3437_v57  ;;  %v7730_v59 = vld [vmem:[#allocation47_spill] sm:$0xff]  ;;  %vm7754_vm12 = vmmov %vm7689_vm0 }
 0x567   : > { %v6900_v53 = vpop.permute.xlu1 %2725  ;;  %v6902_v3 = vpop.permute.xlu0 %2855  ;;  %v3165_v18 = vmul.f32 %v7720_v13, %v6659_v39  ;;  %v3295_v41 = vadd.f32 %v3294_v19, %v3293_v48  ;;  %v3332_v44 = vadd.f32 %v3331_v20, %v3330_v29  ;;  %v3404_v6 = vadd.f32 %v3403_v45, %v3402_v32  ;;  %v7732_v20 = vld [vmem:[#allocation45_spill] sm:$0xff]  ;;  %v7735_v45 = vld [vmem:[#allocation42_spill] sm:$0xff]  ;;  %v7740_v13 = vld [vmem:[#allocation44_spill] sm:$0xff] }
 0x568   : > { %v3181_v15 = vmul.f32 %v7722_v30, %v6661_v28  ;;  %v3474_v23 = vsel %vm7723_vm13, %v3241_v17, 0.0  ;;  %v3475_v52 = vsel %vm7724_vm14, %v3242_v22, 0.0  ;;  %v3368_v39 = vsel %vm7725_vm15, %v3196_v9, 0.0  ;;  %v7733_v17 = vld [vmem:[#allocation40_spill] sm:$0xff]  ;;  %vm7755_vm13 = vmmov %vm7689_vm0 }
 0x569   : > { %2560 = vbcast.lane.b32.xlu1 %v6517_v4, 360  ;;  %2690 = vbcast.lane.b32.xlu0 %v6531_v50, 352  ;;  %v3440_v10 = vsel %vm7726_vm2, %v3227_v38, 0.0  ;;  %v3511_v28 = vsel %vm7727_vm7, %v3257_v43, 0.0  ;;  %v3512_v61 = vsel %vm7728_vm8, %v3258_v46, 0.0  ;;  %v3296_v48 = vsel %vm7689_vm0, %v3165_v18, 0.0  ;;  %vm7756_vm14 = vmmov %vm7689_vm0 }
 0x56a   : > { %v3333_v29 = vsel %vm7729_vm9, %v3181_v15, 0.0  ;;  %v7731_v56 = vunpack.c.h.bf16 %v6707_v2  ;;  %v7734_v22 = vunpack.c.l.bf16 %v7733_v17  ;;  %v7736_v38 = vld [vmem:[#allocation49_spill] sm:$0xff]  ;;  %v7738_v46 = vld [vmem:[#allocation48_spill] sm:$0xff]  ;;  %v7741_v18 = vld [vmem:[#allocation54_spill] sm:$0xff]  ;;  %v7744_v2 = vunpack.c.h.bf16 %v6717_v7 }
 0x56b   : > { %v6935_v25 = vpop.permute.xlu1 %2532  ;;  %v2663_v63 = vpop.permute.xlu0 %2662  ;;  %v7737_v43 = vunpack.c.l.bf16 %v7736_v38  ;;  %v7739_v32 = vunpack.c.h.bf16 %v7736_v38  ;;  %v7742_v30 = vunpack.c.l.bf16 %v7741_v18  ;;  %v3476_v42 = vadd.f32 %v3475_v52, %v3474_v23  ;;  %v7750_v23 = vld [vmem:[#allocation53_spill] sm:$0xff]  ;;  %v7752_v52 = vld [vmem:[#allocation50_spill] sm:$0xff]  ;;  %vm7757_vm15 = vmmov %vm7689_vm0 }
 0x56c   : > { %v3212_v19 = vmul.f32 %v7731_v56, %v7730_v59  ;;  %v3243_v9 = vmul.f32 %v7734_v22, %v7732_v20  ;;  %v3228_v59 = vmul.f32 %v7744_v2, %v7743_v1  ;;  %v3369_v20 = vadd.f32 %v3368_v39, %v3367_v8  ;;  %vm7758_vm2 = vmmov %vm7689_vm0 }
 0x56d   : > { %2820 = vbcast.lane.b32.xlu1 %v6549_v24, 344  ;;  %2430 = vbcast.lane.b32.xlu0 %v6506_v26, 368  ;;  %v3273_v11 = vmul.f32 %v7737_v43, %v7735_v45  ;;  %v3274_v57 = vmul.f32 %v7739_v32, %v7738_v46  ;;  %v3197_v15 = vmul.f32 %v7742_v30, %v7740_v13  ;;  %v7747_v45 = vunpack.c.l.bf16 %v7746_v34  ;;  %vm7768_vm7 = vmmov %vm7689_vm0 }
 0x56e   : > { %v3441_v22 = vadd.f32 %v3440_v10, %v3439_v49  ;;  %v3513_v37 = vadd.f32 %v3512_v61, %v3511_v28  ;;  %v3297_v38 = vadd.f32 %v3296_v48, %v3295_v41  ;;  %v3334_v46 = vadd.f32 %v3333_v29, %v3332_v44  ;;  %v6980_v41 = vld [vmem:[#allocation3 + $0xa0] sm:$0xff]   ;;  %vm7769_vm8 = vmmov %vm7689_vm0 }
 0x56f   : > { %v2793_v56 = vpop.permute.xlu1 %2792  ;;  %v2403_v16 = vpop.permute.xlu0 %2402  ;;  %v3259_v43 = vmul.f32 %v7747_v45, %v7745_v21  ;;  %v4316_v32 = vunpack.c.h.bf16 %v6823_v55  ;;  %v3405_v7 = vsel %vm7748_vm10, %v3212_v19, 0.0  ;;  %v3477_v1 = vsel %vm7749_vm11, %v3243_v9, 0.0  ;;  %v7763_v45 = vld [vmem:[#allocation60_spill] sm:$0xff]  ;;  %vm7772_vm9 = vmmov %vm7689_vm0 }
 0x570   : > { %v7751_v8 = vunpack.c.h.bf16 %v6725_v47  ;;  %v7753_v21 = vunpack.c.h.bf16 %v7721_v12  ;;  %v3548_v44 = vsel %vm7754_vm12, %v3273_v11, 0.0  ;;  %v3549_v10 = vsel %vm7755_vm13, %v3274_v57, 0.0  ;;  %v7759_v47 = vld [vmem:[#allocation52_spill] sm:$0xff]  ;;  %vm7773_vm10 = vmmov %vm7689_vm0 }
 0x571   : > { %2497 = vbcast.lane.b32.xlu1 %v6512_v40, 368  ;;  %2627 = vbcast.lane.b32.xlu0 %v6526_v58, 360  ;;  %v3370_v28 = vsel %vm7756_vm14, %v3197_v15, 0.0  ;;  %v3442_v61 = vsel %vm7757_vm15, %v3228_v59, 0.0  ;;  %v3514_v19 = vsel %vm7758_vm2, %v3259_v43, 0.0  ;;  %v7760_v9 = vunpack.c.l.bf16 %v6755_v27  ;;  %v7761_v12 = vld [vmem:[#allocation56_spill] sm:$0xff]  ;;  %vm7775_vm11 = vmmov %vm7689_vm0 }
 0x572   : > { %v3166_v49 = vmul.f32 %v7751_v8, %v7750_v23  ;;  %v3182_v39 = vmul.f32 %v7753_v21, %v7752_v52  ;;  %v7762_v30 = vunpack.c.h.bf16 %v7733_v17  ;;  %v7764_v11 = vunpack.c.l.bf16 %v6767_v0  ;;  %v7765_v8 = vld [vmem:[#allocation35_spill] sm:$0xff]  ;;  %v7766_v59 = vld [vmem:[#allocation41_spill] sm:$0xff]  ;;  %vm7777_vm12 = vmmov %vm7689_vm0 }
 0x573   : > { %v2470_v48 = vpop.permute.xlu1 %2469  ;;  %v2600_v29 = vpop.permute.xlu0 %2599  ;;  %v3213_v13 = vmul.f32 %v7760_v9, %v7759_v47  ;;  %v3406_v23 = vadd.f32 %v3405_v7, %v3404_v6  ;;  %v3478_v15 = vadd.f32 %v3477_v1, %v3476_v42  ;;  %v7767_v52 = vunpack.c.l.bf16 %v7766_v59  ;;  %vm7778_vm13 = vmmov %vm7689_vm0 }
 0x574   : > { %v3244_v2 = vmul.f32 %v7762_v30, %v7761_v12  ;;  %v3229_v57 = vmul.f32 %v7764_v11, %v7763_v45  ;;  %v4163_v43 = vunpack.c.l.bf16 %v6980_v41  ;;  %v3298_v47 = vsel %vm7768_vm7, %v3166_v49, 0.0  ;;  %vm7785_vm14 = vmmov %vm7689_vm0 }
 0x575   : > { %v3275_v21 = vmul.f32 %v7767_v52, %v7765_v8  ;;  %2757 = vbcast.lane.b32.xlu1 %v6541_v54, 352  ;;  %2887 = vbcast.lane.b32.xlu0 %v6559_v51, 344  ;;  %v3335_v17 = vsel %vm7769_vm8, %v3182_v39, 0.0  ;;  %v7770_v9 = vunpack.c.h.bf16 %v7746_v34  ;;  %v7771_v42 = vunpack.c.h.bf16 %v6767_v0  ;;  %vm7788_vm15 = vmmov %vm7689_vm0 }
 0x576   : > { %v3550_v7 = vadd.f32 %v3549_v10, %v3548_v44  ;;  %v7009_v1 = vadd.f32 %v3370_v28, %v3369_v20  ;;  %v3443_v30 = vadd.f32 %v3442_v61, %v3441_v22  ;;  %v3515_v45 = vadd.f32 %v3514_v19, %v3513_v37  ;;  %v7779_v10 = vld [vmem:[#allocation58_spill] sm:$0xff]  ;;  %vm7790_vm2 = vmmov %vm7689_vm0 }
 0x577   : > { %v3260_v12 = vmul.f32 %v7770_v9, %v6837_v31  ;;  %v3230_v6 = vmul.f32 %v7771_v42, %v2663_v63  ;;  %v2730_v11 = vpop.permute.xlu1 %2729  ;;  %v2860_v8 = vpop.permute.xlu0 %2859  ;;  %v3407_v52 = vsel %vm7689_vm0, %v3213_v13, 0.0  ;;  %v3479_v49 = vsel %vm7772_vm9, %v3244_v2, 0.0  ;;  %vm7791_vm7 = vmmov %vm7689_vm0 }
 0x578   : > { %v3444_v39 = vsel %vm7773_vm10, %v3229_v57, 0.0  ;;  %v7774_v34 = vunpack.c.l.bf16 %v6769_v33  ;;  %v3299_v9 = vadd.f32 %v3298_v47, %v3297_v38  ;;  %v3336_v0 = vadd.f32 %v3335_v17, %v3334_v46  ;;  %v7783_v17 = vld [vmem:[#allocation59_spill] sm:$0xff]  ;;  %vm7793_vm8 = vmmov %vm7689_vm0 }
 0x579   : > { %v3551_v63 = vsel %vm7775_vm11, %v3275_v21, 0.0  ;;  %v7776_v20 = vunpack.c.l.bf16 %v6775_v14  ;;  %2564 = vbcast.lane.b32.xlu1 %v6517_v4, 368  ;;  %2694 = vbcast.lane.b32.xlu0 %v6531_v50, 360  ;;  %v3516_v22 = vsel %vm7777_vm12, %v3260_v12, 0.0  ;;  %v3446_v44 = vsel %vm7778_vm13, %v3230_v6, 0.0  ;;  %vm7799_vm9 = vmmov %vm7689_vm0 }
 0x57a   : > { %v3167_v31 = vmul.f32 %v7774_v34, %v6839_v62  ;;  %v7780_v28 = vunpack.c.l.bf16 %v7779_v10  ;;  %v7781_v62 = vunpack.c.h.bf16 %v6769_v33  ;;  %v3408_v46 = vadd.f32 %v3407_v52, %v3406_v23  ;;  %vm7801_vm10 = vmmov %vm7689_vm0 }
 0x57b   : > { %v3183_v37 = vmul.f32 %v7776_v20, %v6877_v60  ;;  %v3480_v19 = vadd.f32 %v3479_v49, %v3478_v15  ;;  %v3445_v13 = vadd.f32 %v3444_v39, %v3443_v30  ;;  %v7782_v60 = vunpack.c.h.bf16 %v6755_v27  ;;  %v2537_v57 = vpop.permute.xlu1 %2536  ;;  %v2667_v21 = vpop.permute.xlu0 %2666  ;;  %vm7803_vm11 = vmmov %vm7689_vm0 }
 0x57c   : > { %v3261_v61 = vmul.f32 %v7780_v28, %v2793_v56  ;;  %v3168_v38 = vmul.f32 %v7781_v62, %v2403_v16  ;;  %v3552_v47 = vadd.f32 %v3551_v63, %v3550_v7  ;;  %v7784_v12 = vunpack.c.h.bf16 %v7741_v18  ;;  %v7786_v56 = vld [vmem:[#allocation61_spill] sm:$0xff]  ;;  %vm7804_vm12 = vmmov %vm7689_vm0 }
 0x57d   : > { %v3214_v2 = vmul.f32 %v7782_v60, %v6879_v35  ;;  %v3300_v6 = vsel %vm7785_vm14, %v3167_v31, 0.0  ;;  %v7787_v34 = vunpack.c.l.bf16 %v7786_v56  ;;  %v3517_v16 = vadd.f32 %v3516_v22, %v3515_v45  ;;  %2824 = vbcast.lane.b32.xlu1 %v6549_v24, 352  ;;  %2434 = vbcast.lane.b32.xlu0 %v6506_v26, 376  ;;  %v7794_v31 = vld [vmem:[#allocation38_spill] sm:$0xff]  ;;  %vm7805_vm13 = vmmov %vm7689_vm0 }
 0x57e   : > { %v3198_v42 = vmul.f32 %v7784_v12, %v7783_v17  ;;  %v3337_v23 = vsel %vm7788_vm15, %v3183_v37, 0.0  ;;  %v3447_v15 = vadd.f32 %v3446_v44, %v3445_v13  ;;  %v7789_v30 = vunpack.c.h.bf16 %v6775_v14  ;;  %vm7806_vm14 = vmmov %vm7689_vm0 }
 0x57f   : > { %v3231_v33 = vmul.f32 %v7787_v34, %v2667_v21  ;;  %v3518_v35 = vsel %vm7790_vm2, %v3261_v61, 0.0  ;;  %v3302_v18 = vsel %vm7791_vm7, %v3168_v38, 0.0  ;;  %v7792_v7 = vunpack.c.l.bf16 %v6809_v5  ;;  %v2797_v20 = vpop.permute.xlu1 %2796  ;;  %v2407_v26 = vpop.permute.xlu0 %2406  ;;  %vm7812_vm15 = vmmov %vm7689_vm0 }
 0x580   : > { %v3184_v27 = vmul.f32 %v7789_v30, %v2470_v48  ;;  %v3301_v45 = vadd.f32 %v3300_v6, %v3299_v9  ;;  %v3409_v39 = vsel %vm7689_vm0, %v3214_v2, 0.0  ;;  %v7795_v14 = vunpack.c.l.bf16 %v7794_v31  ;;  %vm7813_vm2 = vmmov %vm7689_vm0 }
 0x581   : > { %v3215_v52 = vmul.f32 %v7792_v7, %v2600_v29  ;;  %v3448_v49 = vsel %vm7793_vm8, %v3231_v33, 0.0  ;;  %v3338_v37 = vadd.f32 %v3337_v23, %v3336_v0  ;;  %v7796_v22 = vunpack.c.h.bf16 %v7766_v59  ;;  %2501 = vbcast.lane.b32.xlu1 %v6512_v40, 376  ;;  %2631 = vbcast.lane.b32.xlu0 %v6526_v58, 368  ;;  %v7807_v33 = vld [vmem:[#allocation57_spill] sm:$0xff]  ;;  %vm7814_vm7 = vmmov %vm7689_vm0 }
 0x582   : > { %v3245_v48 = vmul.f32 %v7795_v14, %v6900_v53  ;;  %v7052_v63 = vadd.f32 %v3448_v49, %v3447_v15  ;;  %v7797_v29 = vunpack.c.h.bf16 %v7779_v10  ;;  %v7798_v9 = vunpack.c.l.bf16 %v6849_v36  ;;  %vm7816_vm8 = vmmov %vm7689_vm0 }
 0x583   : > { %v3276_v44 = vmul.f32 %v7796_v22, %v6902_v3  ;;  %v3519_v62 = vadd.f32 %v3518_v35, %v3517_v16  ;;  %v3303_v38 = vadd.f32 %v3302_v18, %v3301_v45  ;;  %v3339_v13 = vsel %vm7799_vm9, %v3184_v27, 0.0  ;;  %v2604_v40 = vpop.permute.xlu0 %2603  ;;  %vm7817_vm9 = vmmov %vm7689_vm0  ;;  %v7818_v22 = vld [vmem:[#allocation63_spill] sm:$0xff] }
 0x584   : > { %v3262_v28 = vmul.f32 %v7797_v29, %v2797_v20  ;;  %v3169_v61 = vmul.f32 %v7798_v9, %v2407_v26  ;;  %v7800_v53 = vunpack.c.h.bf16 %v7794_v31  ;;  %v3411_v59 = vsel %vm7801_vm10, %v3215_v52, 0.0  ;;  %vm7820_vm10 = vmmov %vm7689_vm0 }
 0x585   : > { %v7802_v3 = vunpack.c.l.bf16 %v6823_v55  ;;  %v3410_v21 = vadd.f32 %v3409_v39, %v3408_v46  ;;  %v3481_v17 = vsel %vm7805_vm13, %v3245_v48, 0.0  ;;  %v3553_v34 = vsel %vm7806_vm14, %v3276_v44, 0.0  ;;  %2761 = vbcast.lane.b32.xlu1 %v6541_v54, 360  ;;  %2891 = vbcast.lane.b32.xlu0 %v6559_v51, 352  ;;  %vm7823_vm13 = vmmov %vm7689_vm0 }
 0x586   : > { %v3246_v60 = vmul.f32 %v7800_v53, %v2730_v11  ;;  %v3520_v10 = vsel %vm7803_vm11, %v3262_v28, 0.0  ;;  %v3304_v2 = vsel %vm7804_vm12, %v3169_v61, 0.0  ;;  %v2474_v11 = vpop.permute.xlu1 %2473  ;;  %v7808_v16 = vunpack.c.l.bf16 %v7807_v33  ;;  %vm7821_vm11 = vmmov %vm7689_vm0 }
 0x587   : > { %v3277_v0 = vmul.f32 %v7802_v3, %v2860_v8  ;;  %v7072_v12 = vadd.f32 %v3520_v10, %v3519_v62  ;;  %v7074_v6 = vadd.f32 %v3304_v2, %v3303_v38  ;;  %v7809_v8 = vld [vmem:[#allocation62_spill] sm:$0xff]  ;;  %v7811_v27 = vunpack.c.h.bf16 %v6809_v5  ;;  %v2864_v26 = vpop.permute.xlu0 %2863  ;;  %vm7822_vm12 = vmmov %vm7689_vm0  ;;  %v7113_v10 = vld [vmem:[#allocation3 + $0xe0] sm:$0xff]  }
 0x588   : > { %v3199_v23 = vmul.f32 %v7808_v16, %v6935_v25  ;;  %v7810_v15 = vunpack.c.l.bf16 %v7809_v8  ;;  %v3372_v35 = vsel %vm7812_vm15, %v3198_v42, 0.0  ;;  %v3340_v18 = vadd.f32 %v3339_v13, %v3338_v37  ;;  %vm7824_vm14 = vmmov %vm7689_vm0 }
 0x589   : > { %v3216_v46 = vmul.f32 %v7811_v27, %v2604_v40  ;;  %v3412_v7 = vadd.f32 %v3411_v59, %v3410_v21  ;;  %v3483_v52 = vsel %vm7813_vm2, %v3246_v60, 0.0  ;;  %v3555_v49 = vsel %vm7814_vm7, %v3277_v0, 0.0  ;;  %2568 = vbcast.lane.b32.xlu1 %v6517_v4, 376  ;;  %2698 = vbcast.lane.b32.xlu0 %v6531_v50, 368  ;;  %vm7825_vm15 = vmmov %vm7689_vm0 }
 0x58a   : > { %v3185_v30 = vmul.f32 %v7810_v15, %v2474_v11  ;;  %v7815_v25 = vunpack.c.h.bf16 %v7807_v33  ;;  %v3482_v31 = vadd.f32 %v3481_v17, %v3480_v19  ;;  %v3554_v14 = vadd.f32 %v3553_v34, %v3552_v47  ;;  %v2734_v20 = vpop.permute.xlu1 %2733  ;;  %v7102_v19 = vld [vmem:[#allocation3 + $0x198] sm:$0xff]   ;;  %vm7826_vm2 = vmmov %vm7689_vm0 }
 0x58b   : > { %v3413_v5 = vsel %vm7689_vm0, %v3216_v46, 0.0  ;;  %v3374_v37 = vsel %vm7817_vm9, %v3199_v23, 0.0  ;;  %v7819_v44 = vunpack.c.l.bf16 %v7818_v22  ;;  %v3278_v28 = vmul.f32 %v4316_v32, %v2864_v26  ;;  %v2671_v60 = vpop.permute.xlu0 %2670  ;;  %vm7827_vm7 = vmmov %vm7689_vm0 }
 0x58c   : > { %v3200_v45 = vmul.f32 %v7815_v25, %v2537_v57  ;;  %v3341_v39 = vsel %vm7816_vm8, %v3185_v30, 0.0  ;;  %v3414_v48 = vadd.f32 %v3413_v5, %v3412_v7  ;;  %v4224_v57 = vunpack.c.h.bf16 %v7786_v56  ;;  %vm7828_vm8 = vmmov %vm7689_vm0 }
 0x58d   : > { %v3342_v42 = vadd.f32 %v3341_v39, %v3340_v18  ;;  %v3247_v29 = vmul.f32 %v7819_v44, %v2734_v20  ;;  %v3373_v9 = vadd.f32 %v3372_v35, %v7009_v1  ;;  %v3484_v61 = vadd.f32 %v3483_v52, %v3482_v31  ;;  %2828 = vbcast.lane.b32.xlu1 %v6549_v24, 360  ;;  %v7132_v52 = vld [vmem:[#allocation3 + $0x120] sm:$0xff]   ;;  %vm7829_vm9 = vmmov %vm7689_vm0 }
 0x58e   : > { %v3556_v62 = vadd.f32 %v3555_v49, %v3554_v14  ;;  %v3376_v47 = vsel %vm7820_vm10, %v3200_v45, 0.0  ;;  %v3557_v13 = vsel %vm7822_vm12, %v3278_v28, 0.0  ;;  %v2541_v56 = vpop.permute.xlu1 %2540  ;;  %v3232_v59 = vmul.f32 %v4224_v57, %v2671_v60  ;;  %2635 = vbcast.lane.b32.xlu0 %v6526_v58, 376  ;;  %v7122_v58 = vld [vmem:[#allocation3 + $0x1d8] sm:$0xff]   ;;  %vm7830_vm10 = vmmov %vm7689_vm0 }
 0x58f   : > { %v3485_v38 = vsel %vm7821_vm11, %v3247_v29, 0.0  ;;  %v3375_v55 = vadd.f32 %v3374_v37, %v3373_v9  ;;  %v3201_v1 = vmul.f32 %v4163_v43, %v2541_v56  ;;  %v4287_v4 = vunpack.c.l.bf16 %v7102_v19  ;;  %v2411_v40 = vpop.permute.xlu0 %2410  ;;  %vm7831_vm11 = vmmov %vm7689_vm0 }
 0x590   : > { %v3486_v32 = vadd.f32 %v3485_v38, %v3484_v61  ;;  %v3558_v53 = vadd.f32 %v3557_v13, %v3556_v62  ;;  %v4100_v3 = vunpack.c.h.bf16 %v6849_v36  ;;  %v3450_v21 = vsel %vm7824_vm14, %v3232_v59, 0.0  ;;  %v3812_v62 = vld [vmem:[#allocation17] ss:$0 sm:$0xff]  ;;  %vm7832_vm12 = vmmov %vm7689_vm0 }
 0x591   : > { %v3377_v0 = vadd.f32 %v3376_v47, %v3375_v55  ;;  %v3378_v2 = vsel %vm7823_vm13, %v3201_v1, 0.0  ;;  %v3451_v11 = vadd.f32 %v3450_v21, %v7052_v63  ;;  %v4132_v36 = vunpack.c.h.bf16 %v7809_v8  ;;  %2765 = vbcast.lane.b32.xlu1 %v6541_v54, 368  ;;  %vm7833_vm13 = vmmov %vm7689_vm0 }
 0x592   : > { %v2801_v43 = vpop.permute.xlu1 %2800  ;;  %v3170_v33 = vmul.f32 %v4100_v3, %v2411_v40  ;;  %v4195_v16 = vunpack.c.l.bf16 %v7113_v10  ;;  %2895 = vbcast.lane.b32.xlu0 %v6559_v51, 360  ;;  %v4256_v18 = vunpack.c.h.bf16 %v7818_v22  ;;  %v4319_v7 = vunpack.c.l.bf16 %v7122_v58  ;;  %vm7834_vm14 = vmmov %vm7689_vm0 }
 0x593   : > { %v3379_v17 = vadd.f32 %v3378_v2, %v3377_v0  ;;  %v3263_v34 = vmul.f32 %v4287_v4, %v2801_v43  ;;  %v2608_v46 = vpop.permute.xlu0 %2607  ;;  %v4164_v14 = vunpack.c.h.bf16 %v6980_v41  ;;  %v4227_v20 = vunpack.c.l.bf16 %v7132_v52 }
 0x594   : > { %v3306_v15 = vsel %vm7826_vm2, %v3170_v33, 0.0  ;;  %v3217_v8 = vmul.f32 %v4195_v16, %v2608_v46  ;;  %v4288_v41 = vunpack.c.h.bf16 %v7102_v19  ;;  %v4196_v56 = vunpack.c.h.bf16 %v7113_v10  ;;  %v7161_v10 = vld [vmem:[#allocation3 + $0xa8] sm:$0xff]   ;;  %vm7836_vm2 = vmmov %vm7689_vm0 }
 0x595   : > { %v3522_v23 = vsel %vm7825_vm15, %v3263_v34, 0.0  ;;  %v3307_v30 = vadd.f32 %v3306_v15, %v7074_v6  ;;  %2702 = vbcast.lane.b32.xlu1 %v6531_v50, 376  ;;  %v7140_v50 = vld [vmem:[#allocation3 + $0x28] sm:$0xff]   ;;  %vm7835_vm15 = vmmov %vm7689_vm0  ;;  %v4167_v15 = vunpack.c.l.bf16 %v7161_v10 }
 0x596   : > { %v3523_v63 = vadd.f32 %v3522_v23, %v7072_v12  ;;  %v2478_v27 = vpop.permute.xlu1 %2477  ;;  %2832 = vbcast.lane.b32.xlu0 %v6549_v24, 368  ;;  %v3415_v12 = vsel %vm7828_vm8, %v3217_v8, 0.0  ;;  %v4103_v57 = vunpack.c.l.bf16 %v7140_v50  ;;  %vm7838_vm8 = vmmov %vm7689_vm0 }
 0x597   : > { %v3186_v35 = vmul.f32 %v4132_v36, %v2478_v27  ;;  %v3416_v6 = vadd.f32 %v3415_v12, %v3414_v48  ;;  %v2868_v39 = vpop.permute.xlu0 %2867 }
 0x598   : > { %v3279_v31 = vmul.f32 %v4319_v7, %v2868_v39 }
 0x599   : > { %v3343_v49 = vsel %vm7827_vm7, %v3186_v35, 0.0  ;;  %2769 = vbcast.lane.b32.xlu1 %v6541_v54, 376  ;;  %v7148_v54 = vld [vmem:[#allocation3 + $0x68] sm:$0xff]   ;;  %vm7837_vm7 = vmmov %vm7689_vm0 }
 0x59a   : > { %v3344_v25 = vadd.f32 %v3343_v49, %v3342_v42  ;;  %v2738_v45 = vpop.permute.xlu1 %2737  ;;  %2899 = vbcast.lane.b32.xlu0 %v6559_v51, 368  ;;  %v3559_v37 = vsel %vm7829_vm9, %v3279_v31, 0.0  ;;  %v4135_v19 = vunpack.c.l.bf16 %v7148_v54  ;;  %vm7839_vm9 = vmmov %vm7689_vm0 }
 0x59b   : > { %v3248_v5 = vmul.f32 %v4256_v18, %v2738_v45  ;;  %v3560_v48 = vadd.f32 %v3559_v37, %v3558_v53  ;;  %v2675_v44 = vpop.permute.xlu0 %2674  ;;  %v4136_v37 = vunpack.c.h.bf16 %v7148_v54 }
 0x59c   : > { %v3233_v28 = vmul.f32 %v4227_v20, %v2675_v44 }
 0x59d   : > { %v3487_v26 = vsel %vm7689_vm0, %v3248_v5, 0.0  ;;  %2836 = vbcast.lane.b32.xlu1 %v6549_v24, 376  ;;  %v7155_v24 = vld [vmem:[#allocation3 + $0x160] sm:$0xff]  }
 0x59e   : > { %v3488_v42 = vadd.f32 %v3487_v26, %v3486_v32  ;;  %v2545_v22 = vpop.permute.xlu1 %2544  ;;  %2903 = vbcast.lane.b32.xlu0 %v6559_v51, 376  ;;  %v3452_v61 = vsel %vm7831_vm11, %v3233_v28, 0.0  ;;  %v4259_v21 = vunpack.c.l.bf16 %v7155_v24  ;;  %vm7841_vm11 = vmmov %vm7689_vm0 }
 0x59f   : > { %v3202_v29 = vmul.f32 %v4164_v14, %v2545_v22  ;;  %v3453_v38 = vadd.f32 %v3452_v61, %v3451_v11  ;;  %v2415_v55 = vpop.permute.xlu0 %2414  ;;  %v4260_v61 = vunpack.c.h.bf16 %v7155_v24 }
 0x5a0   : > { %v3171_v53 = vmul.f32 %v4103_v57, %v2415_v55 }
 0x5a1   : > { %v3380_v9 = vsel %vm7830_vm10, %v3202_v29, 0.0  ;;  %282 = vrot.lane.b32.xlu1 %v3812_v62, %s4893_s29  ;;  %vm7840_vm10 = vmmov %vm7689_vm0 }
 0x5a2   : > { %v3381_v47 = vadd.f32 %v3380_v9, %v3379_v17  ;;  %v2805_v13 = vpop.permute.xlu1 %2804  ;;  %v3308_v60 = vsel %vm7833_vm13, %v3171_v53, 0.0  ;;  %v4320_v17 = vunpack.c.h.bf16 %v7122_v58  ;;  %vm7843_vm13 = vmmov %vm7689_vm0 }
 0x5a3   : > { %v3264_v32 = vmul.f32 %v4288_v41, %v2805_v13  ;;  %v3309_v59 = vadd.f32 %v3308_v60, %v3307_v30  ;;  %v2612_v3 = vpop.permute.xlu0 %2611  ;;  %v7167_v30 = vld [vmem:[#allocation3 + $0x1a0] sm:$0xff]  }
 0x5a4   : > { %v3218_v2 = vmul.f32 %v4196_v56, %v2612_v3  ;;  %v4291_v12 = vunpack.c.l.bf16 %v7167_v30 }
 0x5a5   : > { %v3524_v51 = vsel %vm7832_vm12, %v3264_v32, 0.0  ;;  %vm7842_vm12 = vmmov %vm7689_vm0 }
 0x5a6   : > { %v3525_v1 = vadd.f32 %v3524_v51, %v3523_v63  ;;  %v2482_v4 = vpop.permute.xlu1 %2481  ;;  %v3417_v43 = vsel %vm7835_vm15, %v3218_v2, 0.0  ;;  %v4228_v63 = vunpack.c.h.bf16 %v7132_v52  ;;  %v4168_v51 = vunpack.c.h.bf16 %v7161_v10  ;;  %vm7845_vm15 = vmmov %vm7689_vm0 }
 0x5a7   : > { %v3187_v0 = vmul.f32 %v4135_v19, %v2482_v4  ;;  %v3418_v34 = vadd.f32 %v3417_v43, %v3416_v6  ;;  %v2872_v36 = vpop.permute.xlu0 %2871  ;;  %v7173_v6 = vld [vmem:[#allocation3 + $0xe8] sm:$0xff]   ;;  %v7201_v43 = vld [vmem:[#allocation3 + $0x70] sm:$0xff]  }
 0x5a8   : > { %v3280_v23 = vmul.f32 %v4320_v17, %v2872_v36 }
 0x5a9   : > { %v3345_v11 = vsel %vm7834_vm14, %v3187_v0, 0.0  ;;  %vm7844_vm14 = vmmov %vm7689_vm0 }
 0x5aa   : > { %v3346_v40 = vadd.f32 %v3345_v11, %v3344_v25  ;;  %v2742_v33 = vpop.permute.xlu1 %2741  ;;  %v3561_v27 = vsel %vm7837_vm7, %v3280_v23, 0.0  ;;  %v4104_v25 = vunpack.c.h.bf16 %v7140_v50  ;;  %v4292_v11 = vunpack.c.h.bf16 %v7167_v30  ;;  %vm7847_vm7 = vmmov %vm7689_vm0 }
 0x5ab   : > { %v3249_v16 = vmul.f32 %v4259_v21, %v2742_v33  ;;  %v3562_v35 = vadd.f32 %v3561_v27, %v3560_v48  ;;  %v2679_v18 = vpop.permute.xlu0 %2678  ;;  %v7179_v48 = vld [vmem:[#allocation3 + $0x1e0] sm:$0xff]   ;;  %v4200_v30 = vunpack.c.h.bf16 %v7173_v6 }
 0x5ac   : > { %v3234_v49 = vmul.f32 %v4228_v63, %v2679_v18  ;;  %v4323_v62 = vunpack.c.l.bf16 %v7179_v48 }
 0x5ad   : > { %v3489_v58 = vsel %vm7836_vm2, %v3249_v16, 0.0  ;;  %vm7846_vm2 = vmmov %vm7689_vm0 }
 0x5ae   : > { %v3490_v46 = vadd.f32 %v3489_v58, %v3488_v42  ;;  %v2549_v8 = vpop.permute.xlu1 %2548  ;;  %v3454_v45 = vsel %vm7689_vm0, %v3234_v49, 0.0  ;;  %v4199_v42 = vunpack.c.l.bf16 %v7173_v6  ;;  %v4139_v58 = vunpack.c.l.bf16 %v7201_v43 }
 0x5af   : > { %v3203_v7 = vmul.f32 %v4167_v15, %v2549_v8  ;;  %v3455_v5 = vadd.f32 %v3454_v45, %v3453_v38  ;;  %v2419_v14 = vpop.permute.xlu0 %2418 }
 0x5b0   : > { %v3172_v26 = vmul.f32 %v4104_v25, %v2419_v14 }
 0x5b1   : > { %v3382_v52 = vsel %vm7838_vm8, %v3203_v7, 0.0  ;;  %vm7848_vm8 = vmmov %vm7689_vm0 }
 0x5b2   : > { %v3383_v39 = vadd.f32 %v3382_v52, %v3381_v47  ;;  %v2809_v31 = vpop.permute.xlu1 %2808  ;;  %v3310_v22 = vsel %vm7840_vm10, %v3172_v26, 0.0  ;;  %v7185_v47 = vld [vmem:[#allocation3 + $0x128] sm:$0xff]   ;;  %vm7850_vm10 = vmmov %vm7689_vm0 }
 0x5b3   : > { %v3265_v20 = vmul.f32 %v4291_v12, %v2809_v31  ;;  %v3311_v29 = vadd.f32 %v3310_v22, %v3309_v59  ;;  %v2616_v41 = vpop.permute.xlu0 %2615  ;;  %v4231_v60 = vunpack.c.l.bf16 %v7185_v47 }
 0x5b4   : > { %v3219_v9 = vmul.f32 %v4199_v42, %v2616_v41 }
 0x5b5   : > { %v3526_v50 = vsel %vm7839_vm9, %v3265_v20, 0.0  ;;  %vm7849_vm9 = vmmov %vm7689_vm0 }
 0x5b6   : > { %v3527_v44 = vadd.f32 %v3526_v50, %v3525_v1  ;;  %v2486_v28 = vpop.permute.xlu1 %2485  ;;  %v3419_v38 = vsel %vm7842_vm12, %v3219_v9, 0.0  ;;  %v7191_v1 = vld [vmem:[#allocation3 + $0x30] sm:$0xff]   ;;  %vm7852_vm12 = vmmov %vm7689_vm0 }
 0x5b7   : > { %v3188_v57 = vmul.f32 %v4136_v37, %v2486_v28  ;;  %v3420_v55 = vadd.f32 %v3419_v38, %v3418_v34  ;;  %v2876_v53 = vpop.permute.xlu0 %2875  ;;  %v4107_v10 = vunpack.c.l.bf16 %v7191_v1  ;;  %v7247_v9 = vld [vmem:[#allocation3 + $0xb0] sm:$0xff]  }
 0x5b8   : > { %v3281_v56 = vmul.f32 %v4323_v62, %v2876_v53  ;;  %v7251_v62 = vld [vmem:[#allocation3 + $0x38] sm:$0xff]  }
 0x5b9   : > { %v3347_v54 = vsel %vm7841_vm11, %v3188_v57, 0.0  ;;  %v7245_v57 = vld [vmem:[#allocation3 + $0x168] sm:$0xff]   ;;  %vm7851_vm11 = vmmov %vm7689_vm0 }
 0x5ba   : > { %v3348_v13 = vadd.f32 %v3347_v54, %v3346_v40  ;;  %v2746_v32 = vpop.permute.xlu1 %2745  ;;  %v3563_v59 = vsel %vm7844_vm14, %v3281_v56, 0.0  ;;  %v4263_v53 = vunpack.c.l.bf16 %v7245_v57  ;;  %v4171_v56 = vunpack.c.l.bf16 %v7247_v9  ;;  %vm7854_vm14 = vmmov %vm7689_vm0 }
 0x5bb   : > { %v3250_v19 = vmul.f32 %v4260_v61, %v2746_v32  ;;  %v7197_v3 = vadd.f32 %v3563_v59, %v3562_v35  ;;  %v2683_v2 = vpop.permute.xlu0 %2682  ;;  %v7249_v61 = vld [vmem:[#allocation3 + $0x1a8] sm:$0xff]  }
 0x5bc   : > { %v3235_v17 = vmul.f32 %v4231_v60, %v2683_v2  ;;  %v7258_v32 = vld [vmem:[#allocation3 + $0x1e8] sm:$0xff]   ;;  %v7264_v60 = vld [vmem:[#allocation3 + $0x130] sm:$0xff]   ;;  %v4295_v59 = vunpack.c.l.bf16 %v7249_v61  ;;  %v4111_v2 = vunpack.c.l.bf16 %v7251_v62 }
 0x5bd   : > { %v3491_v24 = vsel %vm7843_vm13, %v3250_v19, 0.0  ;;  %v4324_v19 = vunpack.c.h.bf16 %v7179_v48  ;;  %vm7853_vm13 = vmmov %vm7689_vm0 }
 0x5be   : > { %v7195_v4 = vadd.f32 %v3491_v24, %v3490_v46  ;;  %v2553_v0 = vpop.permute.xlu1 %2552  ;;  %v3456_v34 = vsel %vm7846_vm2, %v3235_v17, 0.0  ;;  %v7266_v24 = vld [vmem:[#allocation3 + $0x78] sm:$0xff]   ;;  %vm7856_vm2 = vmmov %vm7689_vm0 }
 0x5bf   : > { %v3204_v21 = vmul.f32 %v4168_v51, %v2553_v0  ;;  %v7207_v36 = vadd.f32 %v3456_v34, %v3455_v5  ;;  %v2423_v23 = vpop.permute.xlu0 %2422  ;;  %v4232_v51 = vunpack.c.h.bf16 %v7185_v47  ;;  %v7274_v17 = vld [vmem:[#allocation3 + $0xb8] sm:$0xff]  }
 0x5c0   : > { %v3173_v63 = vmul.f32 %v4107_v10, %v2423_v23 }
 0x5c1   : > { %v3384_v40 = vsel %vm7845_vm15, %v3204_v21, 0.0  ;;  %v7272_v21 = vld [vmem:[#allocation3 + $0x170] sm:$0xff]   ;;  %vm7855_vm15 = vmmov %vm7689_vm0 }
 0x5c2   : > { %v7205_v33 = vadd.f32 %v3384_v40, %v3383_v39  ;;  %v2813_v16 = vpop.permute.xlu1 %2812  ;;  %v3312_v46 = vsel %vm7848_vm8, %v3173_v63, 0.0  ;;  %vm7858_vm8 = vmmov %vm7689_vm0 }
 0x5c3   : > { %v3266_v15 = vmul.f32 %v4292_v11, %v2813_v16  ;;  %v7215_v8 = vadd.f32 %v3312_v46, %v3311_v29  ;;  %v2620_v7 = vpop.permute.xlu0 %2619  ;;  %v4172_v11 = vunpack.c.h.bf16 %v7247_v9 }
 0x5c4   : > { %v3220_v12 = vmul.f32 %v4200_v30, %v2620_v7  ;;  %v7291_v30 = vld [vmem:[#allocation3 + $0x1f0] sm:$0xff]  }
 0x5c5   : > { %v3528_v27 = vsel %vm7847_vm7, %v3266_v15, 0.0  ;;  %v4143_v15 = vunpack.c.l.bf16 %v7266_v24  ;;  %vm7857_vm7 = vmmov %vm7689_vm0 }
 0x5c6   : > { %v7213_v35 = vadd.f32 %v3528_v27, %v3527_v44  ;;  %v2490_v18 = vpop.permute.xlu1 %2489  ;;  %v3421_v52 = vsel %vm7849_vm9, %v3220_v12, 0.0  ;;  %v7317_v27 = vld [vmem:[#allocation3 + $0x1b8] sm:$0xff]   ;;  %vm7861_vm9 = vmmov %vm7689_vm0 }
 0x5c7   : > { %v3189_v49 = vmul.f32 %v4139_v58, %v2490_v18  ;;  %v7221_v39 = vadd.f32 %v3421_v52, %v3420_v55  ;;  %v7225_v5 = vpop.permute.xlu0 %2879  ;;  %v7256_v55 = vld [vmem:[#allocation3 + $0xf0] sm:$0xff]   ;;  %v7289_v58 = vld [vmem:[#allocation3 + $0xf8] sm:$0xff]   ;;  %v4175_v18 = vunpack.c.l.bf16 %v7274_v17  ;;  %v4144_v52 = vunpack.c.h.bf16 %v7266_v24 }
 0x5c8   : > { %v4203_v48 = vunpack.c.l.bf16 %v7256_v55 }
 0x5c9   : > { %v3349_v25 = vsel %vm7689_vm0, %v3189_v49, 0.0 }
 0x5ca   : > { %v7219_v45 = vadd.f32 %v3349_v25, %v3348_v13  ;;  %v7223_v6 = vpop.permute.xlu1 %2749  ;;  %v4108_v13 = vunpack.c.h.bf16 %v7191_v1  ;;  %v4140_v1 = vunpack.c.h.bf16 %v7201_v43  ;;  %v7284_v43 = vld [vmem:[#allocation3 + $0x1b0] sm:$0xff]   ;;  %v4112_v25 = vunpack.c.h.bf16 %v7251_v62 }
 0x5cb   : > { %v7229_v14 = vpop.permute.xlu0 %2686  ;;  %v3251_v7 = vmul.f32 %v4263_v53, %v7223_v6 }
 0x5cc   : > { %v3236_v12 = vmul.f32 %v4232_v51, %v7229_v14 }
 0x5ce   : > { %v7227_v31 = vpop.permute.xlu1 %2556 }
 0x5cf   : > { %v2427_v26 = vpop.permute.xlu0 %2426  ;;  %v3205_v24 = vmul.f32 %v4171_v56, %v7227_v31  ;;  %v4304_v31 = vunpack.c.h.bf16 %v7317_v27 }
 0x5d0   : > { %v3174_v16 = vmul.f32 %v4108_v13, %v2427_v26  ;;  %v7300_v26 = vld [vmem:[#allocation3 + $0x138] sm:$0xff]  }
 0x5d1   : > { %v7302_v13 = vld [vmem:[#allocation3 + $0x178] sm:$0xff]  }
 0x5d2   : > { %v7231_v20 = vpop.permute.xlu1 %2816  ;;  %v4272_v63 = vunpack.c.h.bf16 %v7302_v13 }
 0x5d3   : > { %v7233_v42 = vpop.permute.xlu0 %2623  ;;  %v3267_v6 = vmul.f32 %v4295_v59, %v7231_v20  ;;  %v3386_v59 = vsel %vm7857_vm7, %v3205_v24, 0.0  ;;  %v7859_v24 = vunpack.c.h.bf16 %v7245_v57  ;;  %vm7876_vm7 = vmmov %vm7689_vm0 }
 0x5d6   : > { %v2494_v37 = vpop.permute.xlu1 %2493 }
 0x5d7   : > { %v7237_v22 = vpop.permute.xlu0 %2883  ;;  %v3190_v62 = vmul.f32 %v4140_v1, %v2494_v37 }
 0x5da   : > { %v7235_v50 = vpop.permute.xlu1 %2753 }
 0x5db   : > { %v7241_v29 = vpop.permute.xlu0 %2690 }
 0x5de   : > { %v7239_v44 = vpop.permute.xlu1 %2560 }
 0x5df   : > { %v2431_v41 = vpop.permute.xlu0 %2430 }
 0x5e0   : > { %v3175_v49 = vmul.f32 %v4111_v2, %v2431_v41  ;;  %v3314_v2 = vsel %vm7850_vm10, %v3174_v16, 0.0  ;;  %v3282_v41 = vmul.f32 %v4324_v19, %v7225_v5  ;;  %v7322_v16 = vld [vmem:[#allocation3 + $0x1f8] sm:$0xff]   ;;  %v3351_v5 = vsel %vm7852_vm12, %v3190_v62, 0.0  ;;  %vm7862_vm10 = vmmov %vm7689_vm0 }
 0x5e1   : > { %v3315_v47 = vadd.f32 %v3314_v2, %v7215_v8  ;;  %v4336_v14 = vunpack.c.h.bf16 %v7322_v16  ;;  %v3493_v8 = vsel %vm7853_vm13, %v3251_v7, 0.0  ;;  %v3530_v62 = vsel %vm7689_vm0, %v3267_v6, 0.0  ;;  %vm7865_vm12 = vmmov %vm7689_vm0 }
 0x5e2   : > { %v7243_v28 = vpop.permute.xlu1 %2820  ;;  %v3316_v37 = vsel %vm7851_vm11, %v3175_v49, 0.0  ;;  %v3565_v56 = vsel %vm7854_vm14, %v3282_v41, 0.0  ;;  %v3221_v7 = vmul.f32 %v4203_v48, %v7233_v42  ;;  %v3206_v41 = vmul.f32 %v4172_v11, %v7239_v44  ;;  %vm7863_vm11 = vmmov %vm7689_vm0 }
 0x5e3   : > { %v7253_v38 = vpop.permute.xlu0 %2627  ;;  %v3317_v19 = vadd.f32 %v3316_v37, %v3315_v47  ;;  %v3352_v47 = vadd.f32 %v3351_v5, %v7219_v45  ;;  %v7860_v45 = vunpack.c.l.bf16 %v7258_v32  ;;  %v3494_v6 = vadd.f32 %v3493_v8, %v7195_v4  ;;  %vm7866_vm13 = vmmov %vm7689_vm0 }
 0x5e4   : > { %v3387_v44 = vadd.f32 %v3386_v59, %v7205_v33  ;;  %v7864_v4 = vunpack.c.h.bf16 %v7256_v55  ;;  %v7867_v8 = vunpack.c.l.bf16 %v7264_v60  ;;  %vm7869_vm14 = vmmov %vm7689_vm0 }
 0x5e6   : > { %v2498_v54 = vpop.permute.xlu1 %2497 }
 0x5e7   : > { %v7282_v34 = vpop.permute.xlu0 %2887  ;;  %v3191_v1 = vmul.f32 %v4143_v15, %v2498_v54  ;;  %v4303_v54 = vunpack.c.l.bf16 %v7317_v27  ;;  %v4335_v15 = vunpack.c.l.bf16 %v7322_v16 }
 0x5e9   : > { %v3353_v51 = vsel %vm7855_vm15, %v3191_v1, 0.0  ;;  %v3283_v1 = vmul.f32 %v7860_v45, %v7237_v22  ;;  %v3423_v22 = vsel %vm7862_vm10, %v3221_v7, 0.0  ;;  %vm7871_vm15 = vmmov %vm7689_vm0 }
 0x5ea   : > { %v7280_v40 = vpop.permute.xlu1 %2757  ;;  %v3354_v5 = vadd.f32 %v3353_v51, %v3352_v47  ;;  %v3388_v51 = vsel %vm7863_vm11, %v3206_v41, 0.0  ;;  %v7870_v47 = vunpack.c.l.bf16 %v7289_v58  ;;  %vm7882_vm10 = vmmov %vm7689_vm0 }
 0x5eb   : > { %v7304_v23 = vpop.permute.xlu0 %2694  ;;  %v3567_v33 = vsel %vm7866_vm13, %v3283_v1, 0.0  ;;  %vm7886_vm11 = vmmov %vm7689_vm0 }
 0x5ec   : > { %vm7888_vm13 = vmmov %vm7689_vm0 }
 0x5ee   : > { %v2565_v10 = vpop.permute.xlu1 %2564 }
 0x5ef   : > { %v2435_v46 = vpop.permute.xlu0 %2434  ;;  %v3207_v42 = vmul.f32 %v4175_v18, %v2565_v10 }
 0x5f0   : > { %v3176_v53 = vmul.f32 %v4112_v25, %v2435_v46  ;;  %v3458_v46 = vsel %vm7858_vm8, %v3236_v12, 0.0  ;;  %v3252_v12 = vmul.f32 %v7859_v24, %v7235_v50  ;;  %vm7877_vm8 = vmmov %vm7689_vm0 }
 0x5f1   : > { %v3459_v9 = vadd.f32 %v3458_v46, %v7207_v36  ;;  %v3390_v46 = vsel %vm7869_vm14, %v3207_v42, 0.0  ;;  %vm7889_vm14 = vcmask 1041409  }
 0x5f2   : > { %v7327_v0 = vpop.permute.xlu1 %2824  ;;  %v3318_v20 = vsel %vm7856_vm2, %v3176_v53, 0.0  ;;  %v3495_v10 = vsel %vm7865_vm12, %v3252_v12, 0.0  ;;  %vm7875_vm2 = vmmov %vm7689_vm0 }
 0x5f3   : > { %v3319_v49 = vadd.f32 %v3318_v20, %v3317_v19  ;;  %v2632_v2 = vpop.permute.xlu0 %2631  ;;  %v3566_v19 = vadd.f32 %v3565_v56, %v7197_v3  ;;  %v3531_v20 = vadd.f32 %v3530_v62, %v7213_v35  ;;  %v3222_v3 = vmul.f32 %v7864_v4, %v7253_v38  ;;  %vm7887_vm12 = vmmov %vm7689_vm0 }
 0x5f4   : > { %v3237_v56 = vmul.f32 %v7867_v8, %v7241_v29  ;;  %v7868_v35 = vunpack.c.h.bf16 %v7249_v61  ;;  %v3223_v55 = vmul.f32 %v7870_v47, %v2632_v2  ;;  %v3424_v38 = vadd.f32 %v3423_v22, %v7221_v39 }
 0x5f5   : > { %v3320_v53 = vrot.slane %v3319_v49, 4  ;;  %v3425_v24 = vsel %vm7871_vm15, %v3222_v3, 0.0  ;;  %v7872_v29 = vunpack.c.l.bf16 %v7272_v21  ;;  %v3568_v45 = vadd.f32 %v3567_v33, %v3566_v19  ;;  %vm7891_vm15 = vmmov %vm7689_vm0 }
 0x5f6   : > { %v2502_v25 = vpop.permute.xlu1 %2501  ;;  %v3268_v59 = vmul.f32 %v7868_v35, %v7243_v28  ;;  %v7873_v28 = vunpack.c.h.bf16 %v7274_v17  ;;  %v7874_v39 = vunpack.c.h.bf16 %v7264_v60  ;;  %v3427_v42 = vsel %vm7877_vm8, %v3223_v55, 0.0  ;;  %vm7897_vm8 = vmmov %vm7689_vm0 }
 0x5f7   : > { %v3192_v37 = vmul.f32 %v4144_v52, %v2502_v25  ;;  %v3321_v11 = vadd.f32 %v3320_v53, %v3319_v49  ;;  %v2892_v52 = vpop.permute.xlu0 %2891  ;;  %v3389_v49 = vadd.f32 %v3388_v51, %v3387_v44  ;;  %v3253_v61 = vmul.f32 %v7872_v29, %v7280_v40 }
 0x5f8   : > { %v3238_v2 = vmul.f32 %v7874_v39, %v7304_v23  ;;  %v3460_v53 = vsel %vm7875_vm2, %v3237_v56, 0.0  ;;  %v3426_v44 = vadd.f32 %v3425_v24, %v3424_v38  ;;  %v7879_v60 = vunpack.c.h.bf16 %v7258_v32  ;;  %vm7892_vm2 = vmmov %vm7689_vm0 }
 0x5f9   : > { %v3355_v48 = vsel %vm7861_vm9, %v3192_v37, 0.0  ;;  %v3322_v18 = vrot.slane %v3321_v11, 2  ;;  %v3496_v37 = vadd.f32 %v3495_v10, %v3494_v6  ;;  %v3391_v1 = vadd.f32 %v3390_v46, %v3389_v49  ;;  %vm7878_vm9 = vmmov %vm7689_vm0 }
 0x5fa   : > { %v3356_v57 = vadd.f32 %v3355_v48, %v3354_v5  ;;  %v2762_v50 = vpop.permute.xlu1 %2761  ;;  %v3532_v6 = vsel %vm7876_vm7, %v3268_v59, 0.0  ;;  %v3497_v22 = vsel %vm7878_vm9, %v3253_v61, 0.0  ;;  %v3284_v23 = vmul.f32 %v7879_v60, %v7282_v34  ;;  %vm7893_vm7 = vmmov %vm7689_vm0 }
 0x5fb   : > { %v3323_v25 = vadd.f32 %v3322_v18, %v3321_v11  ;;  %v2699_v41 = vpop.permute.xlu0 %2698  ;;  %v7880_v51 = vunpack.c.l.bf16 %v7300_v26  ;;  %v7881_v3 = vunpack.c.h.bf16 %v7289_v58  ;;  %v3462_v33 = vsel %vm7882_vm10, %v3238_v2, 0.0  ;;  %vm7898_vm9 = vmmov %vm7689_vm0 }
 0x5fc   : > { %v3357_v36 = vrot.slane %v3356_v57, 4  ;;  %v7883_v56 = vunpack.c.l.bf16 %v7284_v43  ;;  %v7884_v59 = vunpack.c.h.bf16 %v7272_v21  ;;  %v7885_v32 = vunpack.c.l.bf16 %v7291_v30  ;;  %vm7899_vm10 = vmmov %vm7689_vm0 }
 0x5fd   : > { %v3324_v40 = vrot.slane %v3323_v25, 1  ;;  %v3239_v4 = vmul.f32 %v7880_v51, %v2699_v41  ;;  %v3461_v41 = vadd.f32 %v3460_v53, %v3459_v9  ;;  %v3533_v24 = vadd.f32 %v3532_v6, %v3531_v20 }
 0x5fe   : > { %v3358_v62 = vadd.f32 %v3357_v36, %v3356_v57  ;;  %v2569_v7 = vpop.permute.xlu1 %2568  ;;  %v3428_v36 = vadd.f32 %v3427_v42, %v3426_v44  ;;  %v3269_v35 = vmul.f32 %v7883_v56, %v7327_v0  ;;  %v3254_v46 = vmul.f32 %v7884_v59, %v2762_v50 }
 0x5ff   : > { %v3208_v12 = vmul.f32 %v7873_v28, %v2569_v7  ;;  %v3285_v34 = vmul.f32 %v7885_v32, %v2892_v52  ;;  %v3325_v55 = vadd.f32 %v3324_v40, %v3323_v25  ;;  %v3569_v29 = vsel %vm7887_vm12, %v3284_v23, 0.0  ;;  %vm7901_vm12 = vmmov %vm7689_vm0 }
 0x600   : > { %v3359_v5 = vrot.slane %v3358_v62, 2  ;;  %v2636_v19 = vpop.permute.xlu0 %2635  ;;  %v3464_v0 = vsel %vm7888_vm13, %v3239_v4, 0.0  ;;  %v7890_v52 = vunpack.c.l.bf16 %v7302_v13  ;;  %v3463_v25 = vadd.f32 %v3462_v33, %v3461_v41  ;;  %vm7902_vm13 = vmmov %vm7689_vm0 }
 0x601   : > { %v3392_v48 = vsel %vm7689_vm0, %v3208_v12, 0.0  ;;  %v3224_v10 = vmul.f32 %v7881_v3, %v2636_v19  ;;  %v3498_v12 = vadd.f32 %v3497_v22, %v3496_v37  ;;  %v3499_v39 = vsel %vm7892_vm2, %v3254_v46, 0.0  ;;  %vm7905_vm2 = vmmov %vm7689_vm0 }
 0x602   : > { %v3360_v11 = vadd.f32 %v3359_v5, %v3358_v62  ;;  %v3393_v17 = vadd.f32 %v3392_v48, %v3391_v1  ;;  %v2829_v57 = vpop.permute.xlu1 %2828  ;;  %v3534_v1 = vsel %vm7891_vm15, %v3269_v35, 0.0  ;;  %v3571_v9 = vsel %vm7893_vm7, %v3285_v34, 0.0  ;;  %vm7904_vm15 = vmmov %vm7689_vm0 }
 0x603   : > { %v3429_v47 = vsel %vm7886_vm11, %v3224_v10, 0.0  ;;  %v7894_v2 = vunpack.c.h.bf16 %v7284_v43  ;;  %v3570_v48 = vadd.f32 %v3569_v29, %v3568_v45  ;;  %v3465_v44 = vadd.f32 %v3464_v0, %v3463_v25 }
 0x604   : > { %v3361_v18 = vrot.slane %v3360_v11, 1  ;;  %v3394_v8 = vrot.slane %v3393_v17, 4  ;;  %v3430_v49 = vadd.f32 %v3429_v47, %v3428_v36  ;;  %v2896_v7 = vpop.permute.xlu0 %2895  ;;  %v7895_v40 = vunpack.c.h.bf16 %v7291_v30 }
 0x605   : > { %v3270_v5 = vmul.f32 %v7894_v2, %v2829_v57  ;;  %v7896_v37 = vunpack.c.h.bf16 %v7300_v26  ;;  %v3535_v43 = vadd.f32 %v3534_v1, %v3533_v24  ;;  %v3500_v57 = vadd.f32 %v3499_v39, %v3498_v12 }
 0x606   : > { %v3362_v58 = vadd.f32 %v3361_v18, %v3360_v11  ;;  %v3395_v38 = vadd.f32 %v3394_v8, %v3393_v17  ;;  %v2766_v62 = vpop.permute.xlu1 %2765  ;;  %v3431_v61 = vrot.slane %v3430_v49, 4  ;;  %v3286_v11 = vmul.f32 %v7895_v40, %v2896_v7 }
 0x607   : > { %v3255_v28 = vmul.f32 %v7890_v52, %v2766_v62  ;;  %v3572_v51 = vadd.f32 %v3571_v9, %v3570_v48  ;;  %v3536_v3 = vsel %vm7898_vm9, %v3270_v5, 0.0  ;;  %vm7900_vm11 = vcmask 1042434  }
 0x608   : > { %v3593_v21 = vsel %vm7889_vm14, %v3362_v58, %v3325_v55  ;;  %v3396_v50 = vrot.slane %v3395_v38, 2  ;;  %v3432_v53 = vadd.f32 %v3431_v61, %v3430_v49  ;;  %v2833_v42 = vpop.permute.xlu0 %2832  ;;  %v3573_v36 = vsel %vm7899_vm10, %v3286_v11, 0.0  ;;  %vm7903_vm14 = vmmov %vm7689_vm0 }
 0x609   : > { %v3501_v60 = vsel %vm7897_vm8, %v3255_v28, 0.0  ;;  %v3271_v23 = vmul.f32 %v4303_v54, %v2833_v42  ;;  %v3537_v32 = vadd.f32 %v3536_v3, %v3535_v43  ;;  %v3574_v58 = vadd.f32 %v3573_v36, %v3572_v51  ;;  %v3709_v36 = vld [vmem:[#allocation9] sm:$0xff] }
 0x60a   : > { %v3397_v20 = vadd.f32 %v3396_v50, %v3395_v38  ;;  %v2703_v6 = vpop.permute.xlu1 %2702  ;;  %v3433_v22 = vrot.slane %v3432_v53, 2  ;;  %v3502_v18 = vadd.f32 %v3501_v60, %v3500_v57  ;;  %v4530_v60 = vld [vmem:[#allocation20] sm:$0xff]   ;;  %v4895_v43 = vmov 0.0   ;;  %v4531_v57 = vld [vmem:[#allocation20 + $0x8] sm:$0xff]  }
 0x60b   : > { %v3240_v17 = vmul.f32 %v7896_v37, %v2703_v6  ;;  %v3538_v46 = vsel %vm7901_vm12, %v3271_v23, 0.0  ;;  %v7906_v23 = vld [vmem:[#allocation36_spill] sm:$0xff]  ;;  %4466 = vmatprep.subr.bf16.mxu1 %v4895_v43  ;;  %vm3732_vm7 = vcmask 257024  }
 0x60c   : > { %v3398_v19 = vrot.slane %v3397_v20, 1  ;;  %v3434_v30 = vadd.f32 %v3433_v22, %v3432_v53  ;;  %v2900_v26 = vpop.permute.xlu0 %2899  ;;  %v3539_v62 = vadd.f32 %v3538_v46, %v3537_v32  ;;  %4467 = vmatpush3.bf16.msra.mxu1 %v4530_v60  ;;  %v7912_v32 = vld [vmem:[#allocation34_spill] sm:$0xff] }
 0x60d   : > { %v3466_v4 = vsel %vm7689_vm0, %v3240_v17, 0.0  ;;  %v3287_v54 = vmul.f32 %v4335_v15, %v2900_v26  ;;  %4468 = vmatprep.subr.bf16.mxu1 %v4895_v43 }
 0x60e   : > { %v3399_v45 = vadd.f32 %v3398_v19, %v3397_v20  ;;  %v3467_v10 = vadd.f32 %v3466_v4, %v3465_v44  ;;  %v2770_v33 = vpop.permute.xlu1 %2769  ;;  %v3435_v35 = vrot.slane %v3434_v30, 1 }
 0x60f   : > { %v3256_v8 = vmul.f32 %v4272_v63, %v2770_v33  ;;  %v3575_v47 = vsel %vm7903_vm14, %v3287_v54, 0.0  ;;  %v7907_v54 = vld [vmem:[#allocation37_spill] sm:$0xff] }
 0x610   : > { %v3594_v56 = vsel %vm7900_vm11, %v3399_v45, %v3593_v21  ;;  %v3468_v59 = vrot.slane %v3467_v10, 4  ;;  %v3436_v55 = vadd.f32 %v3435_v35, %v3434_v30  ;;  %v2904_v63 = vpop.permute.xlu0 %2903  ;;  %v3576_v29 = vadd.f32 %v3575_v47, %v3574_v58  ;;  %4469 = vmatpush3.bf16.msra.mxu1 %v4531_v57  ;;  %v7910_v35 = vld [vmem:[#allocation33_spill] sm:$0xff] }
 0x611   : > { %v3503_v34 = vsel %vm7902_vm13, %v3256_v8, 0.0  ;;  %v3288_v7 = vmul.f32 %v4336_v14, %v2904_v63  ;;  %v3710_v8 = vstv %s4874_s11  ;;  %s195_s11 = sadd.s32 1, %s4874_s11  }
 0x612   : > { %v3469_v38 = vadd.f32 %v3468_v59, %v3467_v10  ;;  %v3504_v49 = vadd.f32 %v3503_v34, %v3502_v18  ;;  %v2837_v13 = vpop.permute.xlu1 %2836  ;;  %v3595_v0 = vsel %vm2347_vm5, %v3436_v55, %v3594_v56  ;;  %vm7459_vm5 = vcmp.gt.s32.totalorder %v3709_v36, %v3710_v8  ;;  %p192_p4 = scmp.ge.s32.totalorder %s195_s11, 7  }
 0x613   : > { %v3272_v15 = vmul.f32 %v4304_v31, %v2837_v13  ;;  %v3577_v50 = vsel %vm7905_vm2, %v3288_v7, 0.0  ;;  %v7911_v59 = vmov 0   ;;  %s4898_s15 = smov (%p192_p4), [#allocation21]   ;;  %s4899_s6 = smov (%p192_p4), [#allocation22]  }
 0x614   : > { %v3470_v41 = vrot.slane %v3469_v38, 2  ;;  %v3505_v24 = vrot.slane %v3504_v49, 4  ;;  %v3578_v12 = vadd.f32 %v3577_v50, %v3576_v29  ;;  %v3712_v46 = vsel %vm7459_vm5, 1, %v7911_v59  ;;  %s3756_s1 = sshll.u32 (%p192_p4), %s4898_s15, 4  ;;  %s3768_s26 = sshll.u32 (%p192_p4), %s4899_s6, 4  ;;  %s3757_s1 = int_to_ptr.vmem [resolvable:$true] %s3756_s1  ;;  %s7494_s26 = int_to_ptr.vmem [resolvable:$true] %s3768_s26 }
 0x615   : > { %v3540_v21 = vsel %vm7904_vm15, %v3272_v15, 0.0  ;;  %s4792_s28 = scalar_lea.vmem (%p192_p4), %s3757_s1, 448  ;;  %p4797_p6 = scmp.lt.s32.totalorder (%p192_p4), %s3757_s1, %s3757_s1 }
 0x616   : > { %v3471_v61 = vadd.f32 %v3470_v41, %v3469_v38  ;;  %v3506_v52 = vadd.f32 %v3505_v24, %v3504_v49  ;;  %v3541_v28 = vadd.f32 %v3540_v21, %v3539_v62  ;;  %v3579_v31 = vrot.slane %v3578_v12, 4  ;;  %v283_v51 = vpop.permute.xlu1 %282  ;;  %v3606_v38 = vld [vmem:[%s3605_s30] sm:$0xff]  ;;  %p4793_p5 = scmp.ne.s32.totalorder (%p192_p4), %s3757_s1, %s4792_s28  ;;  %p4798_p7 = scmp.lt.s32.totalorder (%p192_p4), %s4792_s28, %s4792_s28 }
 0x617   : > { %v285_v4 = vadd.f32 %v283_v51, %v7906_v23 }
 0x618   : > { %v3472_v25 = vrot.slane %v3471_v61, 1  ;;  %v3507_v1 = vrot.slane %v3506_v52, 2  ;;  %v3542_v27 = vrot.slane %v3541_v28, 4  ;;  %v3580_v9 = vadd.f32 %v3579_v31, %v3578_v12  ;;  %p4799_p8 = por (%p192_p4), %p4798_p7, %p4797_p6 }
 0x619   : > { %v3813_v45 = vmul.f32 -1.442695, %v285_v4 }
 0x61a   : > { %v3473_v39 = vadd.f32 %v3472_v25, %v3471_v61  ;;  %v3508_v16 = vadd.f32 %v3507_v1, %v3506_v52  ;;  %v3543_v14 = vadd.f32 %v3542_v27, %v3541_v28  ;;  %v3581_v5 = vrot.slane %v3580_v9, 2  ;;  %p4800_p9 = pnand (%p192_p4), %p4799_p8, %p4793_p5 }
 0x61b   : > { %4536 = vpow2.f32 %v3813_v45  ;;  %v3823_v27 = vsel %vm7459_vm5, 1.0, %v4895_v43 }
 0x61c   : > { %v3509_v20 = vrot.slane %v3508_v16, 1  ;;  %v3544_v2 = vrot.slane %v3543_v14, 2  ;;  %v3596_v53 = vsel %vm2349_vm1, %v3473_v39, %v3595_v0  ;;  %v3582_v48 = vadd.f32 %v3581_v5, %v3580_v9 }
 0x61d   : > { %vm4896_vm1 = vmmov 0  }
 0x61e   : > { %v3510_v6 = vadd.f32 %v3509_v20, %v3508_v16  ;;  %v3545_v42 = vadd.f32 %v3544_v2, %v3543_v14  ;;  %v3583_v40 = vrot.slane %v3582_v48, 1  ;;  %4470 = vmatprep.mubr.msk.bf16.mxu1 %vm4896_vm1, %v4895_v43 }
 0x620   : > { %v3546_v44 = vrot.slane %v3545_v42, 1  ;;  %v3597_v11 = vsel %vm2351_vm3, %v3510_v6, %v3596_v53  ;;  %v3584_v17 = vadd.f32 %v3583_v40, %v3582_v48  ;;  %vm7913_vm3 = vmmov %vm7689_vm0  ;;  %v7914_v53 = vld [vmem:[#allocation43_spill] sm:$0xff] }
 0x622   : > { %v3547_v37 = vadd.f32 %v3546_v44, %v3545_v42 }
 0x624   : > { %v3598_v19 = vsel %vm2353_vm4, %v3547_v37, %v3597_v11  ;;  %vm3613_vm4 = vcmask 523264  }
 0x625   : > { %v3599_v22 = vsel %vm2355_vm6, %v3584_v17, %v3598_v19  ;;  %v4537_v3 = vpop.eup %4536 }
 0x626   : > { %3600 = vrot.lane.b32.xlu0 %v3599_v22, %s4893_s29  ;;  %v289_v30 = vadd.f32 1.0, %v4537_v3 }
 0x628   : > { %4538 = vrcp.f32 %v289_v30 }
 0x62a   : > { %3609 = vrot.lane.b32.xlu0 %v7906_v23, %s4894_s3 }
 0x632   : > { %v4539_v10 = vpop.eup %4538 }
 0x698   : > { %v3601_v33 = vpop.permute.xlu0 %3600 }
 0x699   : > { %v3603_v26 = vmul.f32 %v4539_v10, %v3601_v33 }
 0x69b   : > { %v3617_v18 = vpack.c.bf16 %v3603_v26, %v3603_v26 }
 0x69c   : > { %v3610_v55 = vpop.permute.xlu0 %3609 }
 0x69d   : > { %3623 = vrot.lane.b32.xlu1 %v3617_v18, %s4897_s9 }
 0x6a1   : > { %3611 = vrot.lane.b32.xlu1 %v7907_v54, %s4894_s3 }
 0x6a5   : > { %3689 = vrot.lane.b32.xlu1 %v7910_v35, %s4893_s29 }
 0x6a9   : > { %3714 = vperm.xlu1 %4522, %v3712_v46  }
 0x6ad   : > { %3718 = vrot.lane.b32.xlu1 %v7912_v32, %s4897_s9 }
 0x70f   : > { %v3624_v34 = vpop.permute.xlu1 %3623 }
 0x710   : > { %4471 = vmatmul.mubr.msk.bf16.vlgmr.msra.gmra.mrb[0].mxu1 %vm7913_vm3, %v3624_v34 }
 0x713   : > { %v3612_v47 = vpop.permute.xlu1 %3611 }
 0x714   : > { %v3614_v58 = vsel %vm3613_vm4, %v3610_v55, %v3612_v47 }
 0x715   : > { %v3616_v49 = vadd.f32 %v3614_v58, %v3606_v38 }
 0x717   : > { %v3690_v52 = vpop.permute.xlu1 %3689 }
 0x728   : > { %v3715_v31 = vpop.permute.xlu1 %3714 }
 0x729   : > { %vm3716_vm6 = vcmp.eq.s32.totalorder %v3715_v31, 1 }
 0x72c   : > { %v3719_v20 = vpop.permute.xlu1 %3718 }
 0x7e3   : > { %v3674_v13 = vpop.f32.mrb[0].mxu1 }
 0x7e4   : > { %v3680_v63 = vadd.f32 %v3674_v13, %v3616_v49  ;;  %v4472_v62 = vpop.f32.mrb[1].mxu1 }
 0x7e5   : > { %v3677_v15 = vpop.f32.mrb[2].mxu1 }
 0x7e6   : > { %4540 = vtanh.f32 %v3680_v63  ;;  %v4473_v7 = vpop.f32.mrb[3].mxu1  ;;  %v3820_v24 = vmul.f32 -1.442695, %v3680_v63 }
 0x7e8   : > { %4542 = vpow2.f32 %v3820_v24 }
 0x7f0   : > { %v4541_v41 = vpop.eup %4540 }
 0x7f1   : > { %3694 = vrot.lane.b32.xlu0 %v4541_v41, %s4894_s3 }
 0x7f2   : > { %v4543_v29 = vpop.eup %4542 }
 0x7f3   : > { %v3684_v0 = vadd.f32 1.0, %v4543_v29 }
 0x7f5   : > { %4544 = vrcp.f32 %v3684_v0 }
 0x7ff   : > { %v4545_v21 = vpop.eup %4544 }
 0x800   : > { %v3692_v28 = vmul.f32 %v4545_v21, %v3690_v52 }
 0x863   : > { %v3695_v50 = vpop.permute.xlu0 %3694 }
 0x864   : > { %v3697_v61 = vmul.f32 %v4545_v21, %v3695_v50 }
 0x866   : > { %3699 = vrot.lane.b32.xlu0 %v3697_v61, %s4893_s29 }
 0x8d8   : > { %v3700_v12 = vpop.permute.xlu0 %3699 }
 0x8d9   : > { %v3702_v25 = vadd.f32 %v3700_v12, %v3692_v28 }
 0x8db   : > { %4546 = vtanh.f32 %v3702_v25  ;;  %v3722_v39 = vsel %vm3716_vm6, %v3702_v25, %v3690_v52 }
 0x8e5   : > { %v4547_v1 = vpop.eup %4546 }
 0x8e6   : > { %3705 = vrot.lane.b32.xlu0 %v4547_v1, %s4894_s3 }
 0x8ea   : > { %3737 = vperm.xlu0 %4523, %v3823_v27  }
 0x8ee   : > { %3748 = vrot.lane.b32.xlu0 %v3722_v39, %s4897_s9 }
 0x958   : > { %v3706_v16 = vpop.permute.xlu0 %3705 }
 0x959   : > { %v3708_v14 = vmul.f32 %v4545_v21, %v3706_v16 }
 0x95b   : > { %v3824_v9 = vpack.c.bf16 %v3708_v14, %v3708_v14  ;;  %v3721_v2 = vsel %vm3716_vm6, %v3708_v14, %v3719_v20 }
 0x95d   : > { %3727 = vrot.lane.b32.xlu1 %v3824_v9, %s4893_s29 }
 0x961   : > { %3744 = vrot.lane.b32.xlu1 %v3721_v2, %s4893_s29 }
 0x969   : > { %v3738_v5 = vpop.permute.xlu0 %3737 }
 0x96a   : > { %v3740_v6 = vmul.f32 %v3738_v5, %v7914_v53 }
 0x96c   : > { %3742 = vst [vmem:[%s3741_s16] sm:$0xff] %v3740_v6 }
 0x96d   : > { %v3749_v4 = vpop.permute.xlu0 %3748  }
 0x9cd   :  { %194 = sbr.rel (!%p192_p4) target bundleno = 207 (0xcf), region = 130 }
 0x9cf   : > { %v3728_v42 = vpop.permute.xlu1 %3727 }
 0x9d0   : > { %3733 = vst.msk [vmem:[%s3731_s2] sm:$0xf] %vm3732_vm7, %v3728_v42 }
 0x9d3   : > { %v3745_v3 = vpop.permute.xlu1 %3744  }
 0x9d4   :  { %4803 = shalt.err (!%p4800_p9)
}
 0x9d5   :  { %s4804_s17 = scalar_lea.hbm %s7543_s12, 448 }
 0x9d6   :  { %p4805_p10 = scmp.ne.s32.totalorder %s7543_s12, %s4804_s17  ;;  %p4808_p11 = scmp.lt.u32.totalorder %s4804_s17, %s7543_s12 }
 0x9d8   :  { %p4810_p12 = pnand %p4808_p11, %p4805_p10 }
 0x9da   :  { %4813 = shalt.err (!%p4810_p12)
}
 0x9db   :  { %3762 = dma.vmem_to_hbm [thread:$0]  %s3757_s1, 448, %s7543_s12, [#allocation5], %s4878_s21, %s4878_s21, %s4879_s22  }
 0x9dc   :  { %s4814_s8 = scalar_lea.vmem %s7494_s26, 896  ;;  %p4819_p0 = scmp.lt.s32.totalorder %s7494_s26, %s7494_s26 }
 0x9dd   :  { %p4815_p13 = scmp.ne.s32.totalorder %s7494_s26, %s4814_s8  ;;  %p4820_p1 = scmp.lt.s32.totalorder %s4814_s8, %s4814_s8 }
 0x9df   :  { %p4821_p2 = por %p4820_p1, %p4819_p0 }
 0x9e1   :  { %p4822_p3 = pnand %p4821_p2, %p4815_p13 }
 0x9e3   :  { %4825 = shalt.err (!%p4822_p3)
}
 0x9e4   :  { %s4826_s29 = scalar_lea.hbm %s7544_s13, 896 }
 0x9e5   :  { %p4827_p4 = scmp.ne.s32.totalorder %s7544_s13, %s4826_s29  ;;  %p4830_p5 = scmp.lt.u32.totalorder %s4826_s29, %s7544_s13 }
 0x9e7   :  { %p4832_p6 = pnand %p4830_p5, %p4827_p4 }
 0x9e9   :  { %4835 = shalt.err (!%p4832_p6)
}
 0x9ea   :  { %3774 = dma.vmem_to_hbm [thread:$0]  %s7494_s26, 896, %s7544_s13, [#allocation23], %s4885_s0, %s4885_s0, %s4886_s14  }
 0x9eb   :  { %4860 = dma.done.wait [#allocation5], 448  }
 0x9ec   :  { %4861 = vsyncadd [#allocation5], 4294966848 }
 0x9ed   :  { %4862 = dma.done.wait [#allocation23], 896  }
 0x9ee   :  { %4863 = vsyncadd [#allocation23], 4294966400 }
 0x9ef   :  { %3781 = vsyncpa [#allocation4], 1 }
 0x9f0   :  { %3782 = vsyncpa [#allocation7], 1 }
 0x9f1   :  { %3783 = vsyncpa [#allocation10], 1 }
 0x9f2   :  { %3784 = vsyncpa [#allocation13], 1 }
 0x9f3   :  { %3785 = vsyncpa [#allocation16], 1 }
 0x9f4   :  { %3786 = vsyncpa [#allocation19], 1 }
 0x9f5   :  { %3787 = vsyncpa [#allocation5], 1 }
 0x9f6   :  { %3788 = vsyncpa [#allocation23], 1 }

</bundles_post_ra>
